<compile_context>
chip_gen: v5e
topology: v5e:2x2
jax: 0.10.0
libtpu: 0.0.40
codegen_flags: <defaults>
</compile_context>

<pallas_src>
import functools
import math

import jax
import jax.numpy as jnp
from jax.experimental import pallas as pl
from jax.experimental.pallas import tpu as pltpu

# Set to jnp.bfloat16 on v6e/v7x for ~2x MXU throughput (f32 accumulation kept);
# default f32 preserves exact reference semantics.
MATMUL_DTYPE = jnp.float32
LN_EPS = 1e-6


def _pick_tile(dim, max_tile, align):
    """Largest tile <= max_tile that divides `dim` and is `align`-aligned, else full dim."""
    if dim <= max_tile:
        return dim
    t = (max_tile // align) * align
    while t >= align:
        if dim % t == 0:
            return t
        t -= align
    return dim


# ----------------------------------------------------------------------------
# Generic tiled linear (+ optional ReLU, + optional fused residual add)
# ----------------------------------------------------------------------------
def _linear_kernel(*refs, relu, has_res, nk):
    if has_res:
        x_ref, w_ref, b_ref, r_ref, o_ref, acc_ref = refs
    else:
        x_ref, w_ref, b_ref, o_ref, acc_ref = refs
        r_ref = None
    k = pl.program_id(2)

    @pl.when(k == 0)
    def _():
        acc_ref[...] = jnp.zeros_like(acc_ref)

    acc_ref[...] += jnp.dot(
        x_ref[...].astype(MATMUL_DTYPE),
        w_ref[...].astype(MATMUL_DTYPE),
        preferred_element_type=jnp.float32)

    @pl.when(k == nk - 1)
    def _():
        y = acc_ref[...] + b_ref[...]
        if relu:
            y = jnp.maximum(y, 0.0)
        if has_res:
            y = y + r_ref[...]
        o_ref[...] = y


def pallas_linear(x2d, w, b, relu=False, residual=None,
                  tm_max=256, tn_max=512, tk_max=512):
    """x2d: (M, K), w: (K, N), b: (N,), residual: optional (M, N) -> (M, N)."""
    M, K = x2d.shape
    N = w.shape[1]
    tm = _pick_tile(M, tm_max, 8)
    tn = _pick_tile(N, tn_max, 128)
    tk = _pick_tile(K, tk_max, 128)
    nk = K // tk
    has_res = residual is not None

    in_specs = [
        pl.BlockSpec((tm, tk), lambda i, j, k: (i, k)),
        pl.BlockSpec((tk, tn), lambda i, j, k: (k, j)),
        pl.BlockSpec((1, tn), lambda i, j, k: (0, j)),
    ]
    inputs = [x2d, w, b.reshape(1, N)]
    if has_res:
        in_specs.append(pl.BlockSpec((tm, tn), lambda i, j, k: (i, j)))
        inputs.append(residual)

    return pl.pallas_call(
        functools.partial(_linear_kernel, relu=relu, has_res=has_res, nk=nk),
        out_shape=jax.ShapeDtypeStruct((M, N), jnp.float32),
        grid_spec=pltpu.PrefetchScalarGridSpec(
            num_scalar_prefetch=0,
            grid=(M // tm, N // tn, nk),
            in_specs=in_specs,
            out_specs=pl.BlockSpec((tm, tn), lambda i, j, k: (i, j)),
            scratch_shapes=[pltpu.VMEM((tm, tn), jnp.float32)]),
        compiler_params=pltpu.CompilerParams(
            dimension_semantics=("parallel", "parallel", "arbitrary")),
    )(*inputs)


# ----------------------------------------------------------------------------
# Fused LayerNorm + Linear (+ optional ReLU, + optional fused residual add)
#   y = LN(x) @ w + b [+ residual].  K (= hidden_dim) is kept un-tiled so the
#   LN row statistics can be computed in a single pass; grid is (M/tm, N/tn).
# ----------------------------------------------------------------------------
def _ln_linear_kernel(*refs, relu, has_res, eps):
    if has_res:
        x_ref, g_ref, be_ref, w_ref, b_ref, r_ref, o_ref = refs
    else:
        x_ref, g_ref, be_ref, w_ref, b_ref, o_ref = refs
        r_ref = None
    x = x_ref[...]                                      # (tm, D) f32
    mu = jnp.mean(x, axis=-1, keepdims=True)
    var = jnp.mean((x - mu) * (x - mu), axis=-1, keepdims=True)
    xn = (x - mu) * jax.lax.rsqrt(var + eps) * g_ref[...] + be_ref[...]
    y = jnp.dot(xn.astype(MATMUL_DTYPE), w_ref[...].astype(MATMUL_DTYPE),
                preferred_element_type=jnp.float32) + b_ref[...]
    if relu:
        y = jnp.maximum(y, 0.0)
    if has_res:
        y = y + r_ref[...]
    o_ref[...] = y


def pallas_ln_linear(x2d, gamma, beta, w, b, relu=False, residual=None,
                     tm_max=256, tn_max=512, eps=LN_EPS):
    """x2d: (M, D), gamma/beta: (D,), w: (D, N), b: (N,) -> (M, N)."""
    M, D = x2d.shape
    N = w.shape[1]
    tm = _pick_tile(M, tm_max, 8)
    tn = _pick_tile(N, tn_max, 128)
    has_res = residual is not None

    in_specs = [
        pl.BlockSpec((tm, D), lambda i, j: (i, 0)),
        pl.BlockSpec((1, D), lambda i, j: (0, 0)),
        pl.BlockSpec((1, D), lambda i, j: (0, 0)),
        pl.BlockSpec((D, tn), lambda i, j: (0, j)),
        pl.BlockSpec((1, tn), lambda i, j: (0, j)),
    ]
    inputs = [x2d, gamma.reshape(1, D), beta.reshape(1, D), w, b.reshape(1, N)]
    if has_res:
        in_specs.append(pl.BlockSpec((tm, tn), lambda i, j: (i, j)))
        inputs.append(residual)

    return pl.pallas_call(
        functools.partial(_ln_linear_kernel, relu=relu, has_res=has_res, eps=eps),
        out_shape=jax.ShapeDtypeStruct((M, N), jnp.float32),
        grid=(M // tm, N // tn),
        in_specs=in_specs,
        out_specs=pl.BlockSpec((tm, tn), lambda i, j: (i, j)),
        compiler_params=pltpu.CompilerParams(
            dimension_semantics=("parallel", "parallel")),
    )(*inputs)


# ----------------------------------------------------------------------------
# Fused pre-norm FFN sublayer:  x + relu(LN(x)@w1 + b1)@w2 + b2
#   Residual is the already-loaded x tile (no extra residual DMA).
# ----------------------------------------------------------------------------
def _ln_ffn_kernel(x_ref, g_ref, be_ref, w1_ref, b1_ref, w2_ref, b2_ref, o_ref,
                   *, eps):
    x = x_ref[...]                                      # (tm, D)
    mu = jnp.mean(x, axis=-1, keepdims=True)
    var = jnp.mean((x - mu) * (x - mu), axis=-1, keepdims=True)
    xn = (x - mu) * jax.lax.rsqrt(var + eps) * g_ref[...] + be_ref[...]
    h = jnp.dot(xn.astype(MATMUL_DTYPE), w1_ref[...].astype(MATMUL_DTYPE),
                preferred_element_type=jnp.float32) + b1_ref[...]
    h = jnp.maximum(h, 0.0)
    y = jnp.dot(h.astype(MATMUL_DTYPE), w2_ref[...].astype(MATMUL_DTYPE),
                preferred_element_type=jnp.float32) + b2_ref[...]
    o_ref[...] = x + y


def pallas_ln_ffn(x2d, gamma, beta, w1, b1, w2, b2, eps=LN_EPS):
    M, D = x2d.shape
    F = w1.shape[1]
    tm = _pick_tile(M, 256, 8)
    return pl.pallas_call(
        functools.partial(_ln_ffn_kernel, eps=eps),
        out_shape=jax.ShapeDtypeStruct((M, D), jnp.float32),
        grid=(M // tm,),
        in_specs=[
            pl.BlockSpec((tm, D), lambda i: (i, 0)),
            pl.BlockSpec((1, D), lambda i: (0, 0)),
            pl.BlockSpec((1, D), lambda i: (0, 0)),
            pl.BlockSpec((D, F), lambda i: (0, 0)),
            pl.BlockSpec((1, F), lambda i: (0, 0)),
            pl.BlockSpec((F, D), lambda i: (0, 0)),
            pl.BlockSpec((1, D), lambda i: (0, 0)),
        ],
        out_specs=pl.BlockSpec((tm, D), lambda i: (i, 0)),
        compiler_params=pltpu.CompilerParams(dimension_semantics=("parallel",)),
    )(x2d, gamma.reshape(1, D), beta.reshape(1, D), w1, b1.reshape(1, F),
      w2, b2.reshape(1, D))


# ----------------------------------------------------------------------------
# Multi-head scaled-dot-product attention (heads packed in lane dim).
# Self-attention consumes the packed (B, T, 3D) QKV projection directly;
# cross-attention consumes q (B, Tq, D) and packed kv (B, Tk, 2D).
# ----------------------------------------------------------------------------
def _attn_kernel(*refs, n_heads, causal, scale, fused_qkv):
    if fused_qkv:
        qkv_ref, km_ref, o_ref = refs
        xx = qkv_ref[...][0]                      # (T, 3D)
        D = xx.shape[-1] // 3
        q, k, v = xx[:, :D], xx[:, D:2 * D], xx[:, 2 * D:]
    else:
        q_ref, kv_ref, km_ref, o_ref = refs
        q = q_ref[...][0]                         # (Tq, D)
        kv = kv_ref[...][0]                       # (Tk, 2D)
        D = q.shape[-1]
        k, v = kv[:, :D], kv[:, D:]
    km = km_ref[...][0]                           # (1, Tk) float, 1.0 = keep
    Tq = q.shape[0]
    Tk = k.shape[0]
    dk = D // n_heads

    keep = km > 0.0                                              # (1, Tk)
    if causal:
        row = jax.lax.broadcasted_iota(jnp.int32, (Tq, Tk), 0)
        col = jax.lax.broadcasted_iota(jnp.int32, (Tq, Tk), 1)
        keep = jnp.logical_and(keep, col <= row)                 # (Tq, Tk)

    outs = []
    for h in range(n_heads):                                     # static head loop
        qh = q[:, h * dk:(h + 1) * dk].astype(MATMUL_DTYPE)
        kh = k[:, h * dk:(h + 1) * dk].astype(MATMUL_DTYPE)
        vh = v[:, h * dk:(h + 1) * dk].astype(MATMUL_DTYPE)
        s = jnp.dot(qh, kh.T, preferred_element_type=jnp.float32) * scale
        s = jnp.where(keep, s, -1e9)
        s = s - jnp.max(s, axis=-1, keepdims=True)
        p = jnp.exp(s)
        p = p * pl.reciprocal(jnp.sum(p, axis=-1, keepdims=True), approx=True)
        outs.append(jnp.dot(p.astype(MATMUL_DTYPE), vh,
                            preferred_element_type=jnp.float32))
    o_ref[...] = jnp.concatenate(outs, axis=-1)[None]


def pallas_self_attention(qkv, key_mask, causal, n_heads):
    """qkv: (B,T,3D) packed; key_mask: (B,1,T) float32 -> (B,T,D)."""
    # TODO(synk): switch to flash-style online softmax (Tk-tiled) for long sequences.
    B, T, D3 = qkv.shape
    D = D3 // 3
    scale = 1.0 / math.sqrt(D // n_heads)
    return pl.pallas_call(
        functools.partial(_attn_kernel, n_heads=n_heads, causal=causal,
                          scale=scale, fused_qkv=True),
        out_shape=jax.ShapeDtypeStruct((B, T, D), jnp.float32),
        grid=(B,),
        in_specs=[
            pl.BlockSpec((1, T, D3), lambda b: (b, 0, 0)),
            pl.BlockSpec((1, 1, T), lambda b: (b, 0, 0)),
        ],
        out_specs=pl.BlockSpec((1, T, D), lambda b: (b, 0, 0)),
        compiler_params=pltpu.CompilerParams(dimension_semantics=("parallel",)),
    )(qkv, key_mask)


def pallas_cross_attention(q, kv, key_mask, n_heads):
    """q: (B,Tq,D); kv: (B,Tk,2D) packed; key_mask: (B,1,Tk) -> (B,Tq,D)."""
    B, Tq, D = q.shape
    Tk = kv.shape[1]
    scale = 1.0 / math.sqrt(D // n_heads)
    return pl.pallas_call(
        functools.partial(_attn_kernel, n_heads=n_heads, causal=False,
                          scale=scale, fused_qkv=False),
        out_shape=jax.ShapeDtypeStruct((B, Tq, D), jnp.float32),
        grid=(B,),
        in_specs=[
            pl.BlockSpec((1, Tq, D), lambda b: (b, 0, 0)),
            pl.BlockSpec((1, Tk, 2 * D), lambda b: (b, 0, 0)),
            pl.BlockSpec((1, 1, Tk), lambda b: (b, 0, 0)),
        ],
        out_specs=pl.BlockSpec((1, Tq, D), lambda b: (b, 0, 0)),
        compiler_params=pltpu.CompilerParams(dimension_semantics=("parallel",)),
    )(q, kv, key_mask)


# ----------------------------------------------------------------------------
# Cross entropy (sum accumulated in a single (1,1) output block across the grid)
# ----------------------------------------------------------------------------
def _ce_kernel(z_ref, lbl_ref, out_ref):
    @pl.when(pl.program_id(0) == 0)
    def _():
        out_ref[...] = jnp.zeros_like(out_ref)
    z = z_ref[...]                         # (tr, V)
    lbl = lbl_ref[...]                     # (tr, 1) int32
    m = jnp.max(z, axis=-1, keepdims=True)
    lse = jnp.log(jnp.sum(jnp.exp(z - m), axis=-1, keepdims=True)) + m
    iota = jax.lax.broadcasted_iota(jnp.int32, z.shape, 1)
    picked = jnp.sum(jnp.where(iota == lbl, z, 0.0), axis=-1, keepdims=True)
    out_ref[...] += jnp.sum(lse - picked)


def pallas_cross_entropy(logits2d, labels1d):
    """logits2d: (N, V), labels1d: (N,) -> scalar mean CE loss (no ignore_index,
    matching torch.nn.CrossEntropyLoss() defaults)."""
    N, V = logits2d.shape
    tr = _pick_tile(N, 256, 8)
    # TODO(synk): tile the vocab axis with an online logsumexp for very large V.
    total = pl.pallas_call(
        _ce_kernel,
        out_shape=jax.ShapeDtypeStruct((1, 1), jnp.float32),
        grid=(N // tr,),
        in_specs=[
            pl.BlockSpec((tr, V), lambda i: (i, 0)),
            pl.BlockSpec((tr, 1), lambda i: (i, 0)),
        ],
        out_specs=pl.BlockSpec((1, 1), lambda i: (0, 0)),
        compiler_params=pltpu.CompilerParams(dimension_semantics=("arbitrary",)),
    )(logits2d, labels1d.reshape(N, 1).astype(jnp.int32))
    return total[0, 0] / N


# ----------------------------------------------------------------------------
# Model glue (plain JAX around the kernels)
# ----------------------------------------------------------------------------
def sinusoidal_pe(max_len, d):
    pos = jnp.arange(max_len, dtype=jnp.float32)[:, None]
    i = jnp.arange(d, dtype=jnp.float32)[None, :]
    angle = pos / jnp.power(10000.0, (2.0 * jnp.floor(i / 2.0)) / d)
    pe = jnp.where(jnp.mod(jnp.arange(d), 2) == 0, jnp.sin(angle), jnp.cos(angle))
    return pe  # (max_len, d)


def linear3d(x, w, b, relu=False, residual=None):
    B, T, D = x.shape
    res2d = None if residual is None else residual.reshape(-1, w.shape[1])
    out = pallas_linear(x.reshape(-1, D), w, b, relu=relu, residual=res2d)
    return out.reshape(B, T, w.shape[1])


def ln_linear3d(x, gamma, beta, w, b, relu=False, residual=None):
    B, T, D = x.shape
    res2d = None if residual is None else residual.reshape(-1, w.shape[1])
    out = pallas_ln_linear(x.reshape(-1, D), gamma, beta, w, b, relu=relu,
                           residual=res2d)
    return out.reshape(B, T, w.shape[1])


def ln_ffn3d(x, gamma, beta, p):
    B, T, D = x.shape
    out = pallas_ln_ffn(x.reshape(-1, D), gamma, beta,
                        p["w1"], p["b1"], p["w2"], p["b2"])
    return out.reshape(B, T, D)


def embed(emb_params, ids, d_model):
    tab = emb_params["table"]
    h = jnp.take(tab, ids, axis=0) * math.sqrt(d_model)
    pe = emb_params["pe"][: ids.shape[1]]
    return h + pe[None, :, :]


def self_attention(p, x, ln_g, ln_b, key_mask, causal, n_heads):
    """Fused LN+QKV projection, attention on packed QKV, out-proj fused w/ residual."""
    B, T, D = x.shape
    w_qkv = jnp.concatenate([p["wq"], p["wk"], p["wv"]], axis=1)   # (D, 3D)
    b_qkv = jnp.concatenate([p["bq"], p["bk"], p["bv"]], axis=0)   # (3D,)
    qkv = ln_linear3d(x, ln_g, ln_b, w_qkv, b_qkv)                 # (B, T, 3D)
    o = pallas_self_attention(qkv, key_mask, causal, n_heads)      # (B, T, D)
    return linear3d(o, p["wo"], p["bo"], residual=x)


def cross_attention(p, x, ln_g, ln_b, memory, key_mask, n_heads):
    B, Tq, D = x.shape
    w_kv = jnp.concatenate([p["wk"], p["wv"]], axis=1)             # (D, 2D)
    b_kv = jnp.concatenate([p["bk"], p["bv"]], axis=0)
    kv = linear3d(memory, w_kv, b_kv)                              # (B, Tk, 2D)
    q = ln_linear3d(x, ln_g, ln_b, p["wq"], p["bq"])               # (B, Tq, D)
    o = pallas_cross_attention(q, kv, key_mask, n_heads)
    return linear3d(o, p["wo"], p["bo"], residual=x)


def encoder_layer(p, x, e_kmask, n_heads):
    # SublayerConnection (pre-norm): x + sublayer(LN(x)); dropout = identity (eval)
    x = self_attention(p["self_attn"], x, p["ln0_g"], p["ln0_b"],
                       e_kmask, False, n_heads)
    x = ln_ffn3d(x, p["ln1_g"], p["ln1_b"], p["pff"])
    return x


def decoder_layer(p, x, memory, e_kmask, d_kmask, n_heads):
    x = self_attention(p["self_attn"], x, p["ln0_g"], p["ln0_b"],
                       d_kmask, True, n_heads)
    x = cross_attention(p["src_attn"], x, p["ln1_g"], p["ln1_b"],
                        memory, e_kmask, n_heads)
    x = ln_ffn3d(x, p["ln2_g"], p["ln2_b"], p["pff"])
    return x


def key_pad_mask(ids, pad_id):
    # (B, 1, T) float; 1.0 = real token, 0.0 = pad.  Causal part is built in-kernel.
    return (ids != pad_id).astype(jnp.float32)[:, None, :]


def scratch_model_forward(params, cfg, x_ids, y_ids):
    # shift_y
    y_in = y_ids[:, :-1]
    label = y_ids[:, 1:]
    e_kmask = key_pad_mask(x_ids, cfg["pad_id"])   # encoder / cross-attn key mask
    d_kmask = key_pad_mask(y_in, cfg["pad_id"])    # decoder self-attn key mask (+causal in kernel)

    # Encoder
    h = embed(params["enc_emb"], x_ids, cfg["hidden_dim"])
    for lp in params["enc_layers"]:
        h = encoder_layer(lp, h, e_kmask, cfg["n_heads"])
    memory = h

    # Decoder
    g = embed(params["dec_emb"], y_in, cfg["hidden_dim"])
    for lp in params["dec_layers"]:
        g = decoder_layer(lp, g, memory, e_kmask, d_kmask, cfg["n_heads"])

    # Generator + CE loss
    logit = linear3d(g, params["gen_w"], params["gen_b"])          # (B, T, V)
    loss = pallas_cross_entropy(
        logit.reshape(-1, cfg["vocab_size"]), label.reshape(-1))
    return logit, loss


# ----------------------------------------------------------------------------
# Deterministic parameter init
# ----------------------------------------------------------------------------
def init_params(cfg, key):
    D, F, V = cfg["hidden_dim"], cfg["ff_dim"], cfg["vocab_size"]

    def nxt():
        nonlocal key
        key, sub = jax.random.split(key)
        return sub

    def lin(din, dout):
        return (0.02 * jax.random.normal(nxt(), (din, dout), jnp.float32),
                jnp.zeros((dout,), jnp.float32))

    def mha_p():
        wq, bq = lin(D, D); wk, bk = lin(D, D); wv, bv = lin(D, D); wo, bo = lin(D, D)
        return dict(wq=wq, bq=bq, wk=wk, bk=bk, wv=wv, bv=bv, wo=wo, bo=bo)

    def pff_p():
        w1, b1 = lin(D, F); w2, b2 = lin(F, D)
        return dict(w1=w1, b1=b1, w2=w2, b2=b2)

    def enc_layer_p():
        return dict(self_attn=mha_p(), pff=pff_p(),
                    ln0_g=jnp.ones((D,)), ln0_b=jnp.zeros((D,)),
                    ln1_g=jnp.ones((D,)), ln1_b=jnp.zeros((D,)))

    def dec_layer_p():
        return dict(self_attn=mha_p(), src_attn=mha_p(), pff=pff_p(),
                    ln0_g=jnp.ones((D,)), ln0_b=jnp.zeros((D,)),
                    ln1_g=jnp.ones((D,)), ln1_b=jnp.zeros((D,)),
                    ln2_g=jnp.ones((D,)), ln2_b=jnp.zeros((D,)))

    pe = sinusoidal_pe(cfg["max_len"], D)
    gen_w, gen_b = lin(D, V)
    return dict(
        enc_emb=dict(table=0.02 * jax.random.normal(nxt(), (V, D), jnp.float32), pe=pe),
        dec_emb=dict(table=0.02 * jax.random.normal(nxt(), (V, D), jnp.float32), pe=pe),
        enc_layers=[enc_layer_p() for _ in range(cfg["n_layers"])],
        dec_layers=[dec_layer_p() for _ in range(cfg["n_layers"])],
        gen_w=gen_w, gen_b=gen_b,
    )


# ----------------------------------------------------------------------------
if __name__ == "__main__":
    cfg = dict(vocab_size=64, hidden_dim=32, n_heads=4, ff_dim=64,
               n_layers=2, pad_id=0, max_len=32)

    key = jax.random.PRNGKey(0)
    k_x, k_y, k_p = jax.random.split(key, 3)

    B, S_src, S_tgt = 2, 8, 9   # decoder sees S_tgt-1 = 8 after shift_y
    x_ids = jax.random.randint(k_x, (B, S_src), 1, cfg["vocab_size"], dtype=jnp.int32)
    y_ids = jax.random.randint(k_y, (B, S_tgt), 1, cfg["vocab_size"], dtype=jnp.int32)
    # sprinkle some padding to exercise the masks
    x_ids = x_ids.at[0, -2:].set(cfg["pad_id"])
    y_ids = y_ids.at[1, -1:].set(cfg["pad_id"])

    params = init_params(cfg, k_p)

    fwd = jax.jit(functools.partial(scratch_model_forward, params, cfg))
    logit, loss = fwd(x_ids, y_ids)
    jax.block_until_ready((logit, loss))

    assert logit.shape == (B, S_tgt - 1, cfg["vocab_size"])
    assert loss.shape == ()
    assert bool(jnp.isfinite(loss))
    print("KERNEL_OK")
</pallas_src>

<mosaic_0001>
module attributes {stable_mosaic.version = 11 : i64} {
  func.func @_linear_kernel(%arg0: i32, %arg1: i32, %arg2: i32, %arg3: memref<16x32xf32, #tpu.memory_space<vmem>>, %arg4: memref<32x32xf32, #tpu.memory_space<vmem>>, %arg5: memref<1x32xf32, #tpu.memory_space<vmem>>, %arg6: memref<16x32xf32, #tpu.memory_space<vmem>>, %arg7: memref<16x32xf32, #tpu.memory_space<vmem>>, %arg8: memref<16x32xf32, #tpu.memory_space<vmem>>) attributes {dimension_semantics = [#tpu.dimension_semantics<parallel>, #tpu.dimension_semantics<parallel>, #tpu.dimension_semantics<arbitrary>], iteration_bounds = array<i64: 1, 1, 1>, scalar_prefetch = 0 : i64, scratch_operands = 1 : i64, tpu.core_type = #tpu.core_type<tc>, window_params = [{transform_indices = @transform_0, window_bounds = array<i64: 16, 32>}, {transform_indices = @transform_1, window_bounds = array<i64: 32, 32>}, {transform_indices = @transform_2, window_bounds = array<i64: 1, 32>}, {transform_indices = @transform_3, window_bounds = array<i64: 16, 32>}, {transform_indices = @transform_4, window_bounds = array<i64: 16, 32>}]} {
    %c0_i32 = arith.constant 0 : i32
    %0 = arith.cmpi eq, %arg2, %c0_i32 : i32
    %1 = arith.extui %0 : i1 to i32
    %c0_i32_0 = arith.constant 0 : i32
    %2 = arith.cmpi ne, %1, %c0_i32_0 : i32
    scf.if %2 {
      %cst_10 = arith.constant 0.000000e+00 : f32
      %12 = vector.broadcast %cst_10 : f32 to vector<16x32xf32>
      %c0_11 = arith.constant 0 : index
      %c0_12 = arith.constant 0 : index
      %13 = vector.load %arg8[%c0_11, %c0_12] : memref<16x32xf32, #tpu.memory_space<vmem>>, vector<16x32xf32>
      tpu.vector_store %arg8[%c0_11, %c0_12], %12 {strides = array<i32>} : memref<16x32xf32, #tpu.memory_space<vmem>>, vector<16x32xf32>,
    } else {
    }
    %c0 = arith.constant 0 : index
    %c0_1 = arith.constant 0 : index
    %3 = vector.load %arg8[%c0, %c0_1] : memref<16x32xf32, #tpu.memory_space<vmem>>, vector<16x32xf32>
    %c0_2 = arith.constant 0 : index
    %c0_3 = arith.constant 0 : index
    %4 = vector.load %arg3[%c0_2, %c0_3] : memref<16x32xf32, #tpu.memory_space<vmem>>, vector<16x32xf32>
    %c0_4 = arith.constant 0 : index
    %c0_5 = arith.constant 0 : index
    %5 = vector.load %arg4[%c0_4, %c0_5] : memref<32x32xf32, #tpu.memory_space<vmem>>, vector<32x32xf32>
    %cst = arith.constant dense<0.000000e+00> : vector<16x32xf32>
    %6 = tpu.matmul %4, %5, %cst {dimension_numbers = #tpu.dot_dimension_numbers<[1], [0], [0], [1], [0, 0, 1, 1], [], []>} : vector<16x32xf32>, vector<32x32xf32>, vector<16x32xf32> -> vector<16x32xf32>
    %7 = arith.addf %3, %6 : vector<16x32xf32>
    %c0_6 = arith.constant 0 : index
    %c0_7 = arith.constant 0 : index
    %8 = vector.load %arg8[%c0_6, %c0_7] : memref<16x32xf32, #tpu.memory_space<vmem>>, vector<16x32xf32>
    tpu.vector_store %arg8[%c0_6, %c0_7], %7 {strides = array<i32>} : memref<16x32xf32, #tpu.memory_space<vmem>>, vector<16x32xf32>,
    %c0_i32_8 = arith.constant 0 : i32
    %9 = arith.cmpi eq, %arg2, %c0_i32_8 : i32
    %10 = arith.extui %9 : i1 to i32
    %c0_i32_9 = arith.constant 0 : i32
    %11 = arith.cmpi ne, %10, %c0_i32_9 : i32
    scf.if %11 {
      %c0_10 = arith.constant 0 : index
      %c0_11 = arith.constant 0 : index
      %12 = vector.load %arg8[%c0_10, %c0_11] : memref<16x32xf32, #tpu.memory_space<vmem>>, vector<16x32xf32>
      %c0_12 = arith.constant 0 : index
      %c0_13 = arith.constant 0 : index
      %13 = vector.load %arg5[%c0_12, %c0_13] : memref<1x32xf32, #tpu.memory_space<vmem>>, vector<1x32xf32>
      %14 = vector.broadcast %13 : vector<1x32xf32> to vector<16x32xf32>
      %15 = arith.addf %12, %14 : vector<16x32xf32>
      %c0_14 = arith.constant 0 : index
      %c0_15 = arith.constant 0 : index
      %16 = vector.load %arg6[%c0_14, %c0_15] : memref<16x32xf32, #tpu.memory_space<vmem>>, vector<16x32xf32>
      %17 = arith.addf %15, %16 : vector<16x32xf32>
      %c0_16 = arith.constant 0 : index
      %c0_17 = arith.constant 0 : index
      %18 = vector.load %arg7[%c0_16, %c0_17] : memref<16x32xf32, #tpu.memory_space<vmem>>, vector<16x32xf32>
      tpu.vector_store %arg7[%c0_16, %c0_17], %17 {strides = array<i32>} : memref<16x32xf32, #tpu.memory_space<vmem>>, vector<16x32xf32>,
    } else {
    }
    return
  }
  func.func @transform_0(%arg0: i32, %arg1: i32, %arg2: i32) -> (i32, i32) {
    %c0_i32 = arith.constant 0 : i32
    return %arg0, %arg2 : i32, i32
  }
  func.func @transform_1(%arg0: i32, %arg1: i32, %arg2: i32) -> (i32, i32) {
    %c0_i32 = arith.constant 0 : i32
    return %arg2, %arg1 : i32, i32
  }
  func.func @transform_2(%arg0: i32, %arg1: i32, %arg2: i32) -> (i32, i32) {
    %c0_i32 = arith.constant 0 : i32
    %c0_i32_0 = arith.constant 0 : i32
    return %c0_i32, %arg1 : i32, i32
  }
  func.func @transform_3(%arg0: i32, %arg1: i32, %arg2: i32) -> (i32, i32) {
    %c0_i32 = arith.constant 0 : i32
    return %arg0, %arg1 : i32, i32
  }
  func.func @transform_4(%arg0: i32, %arg1: i32, %arg2: i32) -> (i32, i32) {
    %c0_i32 = arith.constant 0 : i32
    return %arg0, %arg1 : i32, i32
  }
}

module attributes {stable_mosaic.version = 11 : i64} {
  func.func @_attn_kernel(%arg0: i32, %arg1: memref<1x8x96xf32, #tpu.memory_space<vmem>>, %arg2: memref<1x1x8xf32, #tpu.memory_space<vmem>>, %arg3: memref<1x8x32xf32, #tpu.memory_space<vmem>>) attributes {dimension_semantics = [#tpu.dimension_semantics<parallel>], iteration_bounds = array<i64: 2>, scalar_prefetch = 0 : i64, scratch_operands = 0 : i64, tpu.core_type = #tpu.core_type<tc>, window_params = [{transform_indices = @transform_0, window_bounds = array<i64: 1, 8, 96>}, {transform_indices = @transform_1, window_bounds = array<i64: 1, 1, 8>}, {transform_indices = @transform_2, window_bounds = array<i64: 1, 8, 32>}]} {
    %c0 = arith.constant 0 : index
    %c0_0 = arith.constant 0 : index
    %c0_1 = arith.constant 0 : index
    %0 = vector.load %arg1[%c0, %c0_0, %c0_1] : memref<1x8x96xf32, #tpu.memory_space<vmem>>, vector<1x8x96xf32>
    %1 = vector.shape_cast %0 : vector<1x8x96xf32> to vector<8x96xf32>
    %2 = vector.extract_strided_slice %1 {offsets = [0, 0], sizes = [8, 32], strides = [1, 1]} : vector<8x96xf32> to vector<8x32xf32>
    %3 = vector.extract_strided_slice %1 {offsets = [0, 32], sizes = [8, 32], strides = [1, 1]} : vector<8x96xf32> to vector<8x32xf32>
    %4 = vector.extract_strided_slice %1 {offsets = [0, 64], sizes = [8, 32], strides = [1, 1]} : vector<8x96xf32> to vector<8x32xf32>
    %c0_2 = arith.constant 0 : index
    %c0_3 = arith.constant 0 : index
    %c0_4 = arith.constant 0 : index
    %5 = vector.load %arg2[%c0_2, %c0_3, %c0_4] : memref<1x1x8xf32, #tpu.memory_space<vmem>>, vector<1x1x8xf32>
    %6 = vector.shape_cast %5 : vector<1x1x8xf32> to vector<1x8xf32>
    %cst = arith.constant 0.000000e+00 : f32
    %7 = vector.broadcast %cst : f32 to vector<1x8xf32>
    %8 = arith.cmpf ogt, %6, %7 : vector<1x8xf32>
    %9 = vector.extract_strided_slice %2 {offsets = [0, 0], sizes = [8, 8], strides = [1, 1]} : vector<8x32xf32> to vector<8x8xf32>
    %10 = vector.extract_strided_slice %3 {offsets = [0, 0], sizes = [8, 8], strides = [1, 1]} : vector<8x32xf32> to vector<8x8xf32>
    %11 = vector.extract_strided_slice %4 {offsets = [0, 0], sizes = [8, 8], strides = [1, 1]} : vector<8x32xf32> to vector<8x8xf32>
    %12 = tpu.transpose %10, [1, 0] : vector<8x8xf32> -> vector<8x8xf32>
    %cst_5 = arith.constant dense<0.000000e+00> : vector<8x8xf32>
    %13 = tpu.matmul %9, %12, %cst_5 {dimension_numbers = #tpu.dot_dimension_numbers<[1], [0], [0], [1], [0, 0, 1, 1], [], []>} : vector<8x8xf32>, vector<8x8xf32>, vector<8x8xf32> -> vector<8x8xf32>
    %cst_6 = arith.constant 0.353553385 : f32
    %14 = vector.broadcast %cst_6 : f32 to vector<8x8xf32>
    %15 = arith.mulf %13, %14 : vector<8x8xf32>
    %cst_7 = arith.constant -1.000000e+09 : f32
    %16 = vector.shape_cast %8 : vector<1x8xi1> to vector<1x8xi1>
    %17 = vector.broadcast %16 : vector<1x8xi1> to vector<8x8xi1>
    %18 = vector.broadcast %cst_7 : f32 to vector<8x8xf32>
    %19 = arith.select %17, %15, %18 : vector<8x8xi1>, vector<8x8xf32>
    %cst_8 = arith.constant dense<0xFF800000> : vector<8xf32>
    %20 = vector.multi_reduction <maximumf>, %19, %cst_8 [1] : vector<8x8xf32> to vector<8xf32>
    %21 = vector.shape_cast %20 : vector<8xf32> to vector<8x1xf32>
    %22 = vector.broadcast %21 : vector<8x1xf32> to vector<8x8xf32>
    %23 = arith.subf %19, %22 : vector<8x8xf32>
    %24 = math.exp %23 : vector<8x8xf32>
    %cst_9 = arith.constant dense<0.000000e+00> : vector<8xf32>
    %25 = vector.multi_reduction <add>, %24, %cst_9 [1] : vector<8x8xf32> to vector<8xf32>
    %26 = vector.shape_cast %25 : vector<8xf32> to vector<8x1xf32>
    %27 = tpu.reciprocal %26 {approx = true} : vector<8x1xf32> -> vector<8x1xf32>
    %28 = vector.broadcast %27 : vector<8x1xf32> to vector<8x8xf32>
    %29 = arith.mulf %24, %28 : vector<8x8xf32>
    %cst_10 = arith.constant dense<0.000000e+00> : vector<8x8xf32>
    %30 = tpu.matmul %29, %11, %cst_10 {dimension_numbers = #tpu.dot_dimension_numbers<[1], [0], [0], [1], [0, 0, 1, 1], [], []>} : vector<8x8xf32>, vector<8x8xf32>, vector<8x8xf32> -> vector<8x8xf32>
    %31 = vector.extract_strided_slice %2 {offsets = [0, 8], sizes = [8, 8], strides = [1, 1]} : vector<8x32xf32> to vector<8x8xf32>
    %32 = vector.extract_strided_slice %3 {offsets = [0, 8], sizes = [8, 8], strides = [1, 1]} : vector<8x32xf32> to vector<8x8xf32>
    %33 = vector.extract_strided_slice %4 {offsets = [0, 8], sizes = [8, 8], strides = [1, 1]} : vector<8x32xf32> to vector<8x8xf32>
    %34 = tpu.transpose %32, [1, 0] : vector<8x8xf32> -> vector<8x8xf32>
    %cst_11 = arith.constant dense<0.000000e+00> : vector<8x8xf32>
    %35 = tpu.matmul %31, %34, %cst_11 {dimension_numbers = #tpu.dot_dimension_numbers<[1], [0], [0], [1], [0, 0, 1, 1], [], []>} : vector<8x8xf32>, vector<8x8xf32>, vector<8x8xf32> -> vector<8x8xf32>
    %cst_12 = arith.constant 0.353553385 : f32
    %36 = vector.broadcast %cst_12 : f32 to vector<8x8xf32>
    %37 = arith.mulf %35, %36 : vector<8x8xf32>
    %cst_13 = arith.constant -1.000000e+09 : f32
    %38 = vector.shape_cast %8 : vector<1x8xi1> to vector<1x8xi1>
    %39 = vector.broadcast %38 : vector<1x8xi1> to vector<8x8xi1>
    %40 = vector.broadcast %cst_13 : f32 to vector<8x8xf32>
    %41 = arith.select %39, %37, %40 : vector<8x8xi1>, vector<8x8xf32>
    %cst_14 = arith.constant dense<0xFF800000> : vector<8xf32>
    %42 = vector.multi_reduction <maximumf>, %41, %cst_14 [1] : vector<8x8xf32> to vector<8xf32>
    %43 = vector.shape_cast %42 : vector<8xf32> to vector<8x1xf32>
    %44 = vector.broadcast %43 : vector<8x1xf32> to vector<8x8xf32>
    %45 = arith.subf %41, %44 : vector<8x8xf32>
    %46 = math.exp %45 : vector<8x8xf32>
    %cst_15 = arith.constant dense<0.000000e+00> : vector<8xf32>
    %47 = vector.multi_reduction <add>, %46, %cst_15 [1] : vector<8x8xf32> to vector<8xf32>
    %48 = vector.shape_cast %47 : vector<8xf32> to vector<8x1xf32>
    %49 = tpu.reciprocal %48 {approx = true} : vector<8x1xf32> -> vector<8x1xf32>
    %50 = vector.broadcast %49 : vector<8x1xf32> to vector<8x8xf32>
    %51 = arith.mulf %46, %50 : vector<8x8xf32>
    %cst_16 = arith.constant dense<0.000000e+00> : vector<8x8xf32>
    %52 = tpu.matmul %51, %33, %cst_16 {dimension_numbers = #tpu.dot_dimension_numbers<[1], [0], [0], [1], [0, 0, 1, 1], [], []>} : vector<8x8xf32>, vector<8x8xf32>, vector<8x8xf32> -> vector<8x8xf32>
    %53 = vector.extract_strided_slice %2 {offsets = [0, 16], sizes = [8, 8], strides = [1, 1]} : vector<8x32xf32> to vector<8x8xf32>
    %54 = vector.extract_strided_slice %3 {offsets = [0, 16], sizes = [8, 8], strides = [1, 1]} : vector<8x32xf32> to vector<8x8xf32>
    %55 = vector.extract_strided_slice %4 {offsets = [0, 16], sizes = [8, 8], strides = [1, 1]} : vector<8x32xf32> to vector<8x8xf32>
    %56 = tpu.transpose %54, [1, 0] : vector<8x8xf32> -> vector<8x8xf32>
    %cst_17 = arith.constant dense<0.000000e+00> : vector<8x8xf32>
    %57 = tpu.matmul %53, %56, %cst_17 {dimension_numbers = #tpu.dot_dimension_numbers<[1], [0], [0], [1], [0, 0, 1, 1], [], []>} : vector<8x8xf32>, vector<8x8xf32>, vector<8x8xf32> -> vector<8x8xf32>
    %cst_18 = arith.constant 0.353553385 : f32
    %58 = vector.broadcast %cst_18 : f32 to vector<8x8xf32>
    %59 = arith.mulf %57, %58 : vector<8x8xf32>
    %cst_19 = arith.constant -1.000000e+09 : f32
    %60 = vector.shape_cast %8 : vector<1x8xi1> to vector<1x8xi1>
    %61 = vector.broadcast %60 : vector<1x8xi1> to vector<8x8xi1>
    %62 = vector.broadcast %cst_19 : f32 to vector<8x8xf32>
    %63 = arith.select %61, %59, %62 : vector<8x8xi1>, vector<8x8xf32>
    %cst_20 = arith.constant dense<0xFF800000> : vector<8xf32>
    %64 = vector.multi_reduction <maximumf>, %63, %cst_20 [1] : vector<8x8xf32> to vector<8xf32>
    %65 = vector.shape_cast %64 : vector<8xf32> to vector<8x1xf32>
    %66 = vector.broadcast %65 : vector<8x1xf32> to vector<8x8xf32>
    %67 = arith.subf %63, %66 : vector<8x8xf32>
    %68 = math.exp %67 : vector<8x8xf32>
    %cst_21 = arith.constant dense<0.000000e+00> : vector<8xf32>
    %69 = vector.multi_reduction <add>, %68, %cst_21 [1] : vector<8x8xf32> to vector<8xf32>
    %70 = vector.shape_cast %69 : vector<8xf32> to vector<8x1xf32>
    %71 = tpu.reciprocal %70 {approx = true} : vector<8x1xf32> -> vector<8x1xf32>
    %72 = vector.broadcast %71 : vector<8x1xf32> to vector<8x8xf32>
    %73 = arith.mulf %68, %72 : vector<8x8xf32>
    %cst_22 = arith.constant dense<0.000000e+00> : vector<8x8xf32>
    %74 = tpu.matmul %73, %55, %cst_22 {dimension_numbers = #tpu.dot_dimension_numbers<[1], [0], [0], [1], [0, 0, 1, 1], [], []>} : vector<8x8xf32>, vector<8x8xf32>, vector<8x8xf32> -> vector<8x8xf32>
    %75 = vector.extract_strided_slice %2 {offsets = [0, 24], sizes = [8, 8], strides = [1, 1]} : vector<8x32xf32> to vector<8x8xf32>
    %76 = vector.extract_strided_slice %3 {offsets = [0, 24], sizes = [8, 8], strides = [1, 1]} : vector<8x32xf32> to vector<8x8xf32>
    %77 = vector.extract_strided_slice %4 {offsets = [0, 24], sizes = [8, 8], strides = [1, 1]} : vector<8x32xf32> to vector<8x8xf32>
    %78 = tpu.transpose %76, [1, 0] : vector<8x8xf32> -> vector<8x8xf32>
    %cst_23 = arith.constant dense<0.000000e+00> : vector<8x8xf32>
    %79 = tpu.matmul %75, %78, %cst_23 {dimension_numbers = #tpu.dot_dimension_numbers<[1], [0], [0], [1], [0, 0, 1, 1], [], []>} : vector<8x8xf32>, vector<8x8xf32>, vector<8x8xf32> -> vector<8x8xf32>
    %cst_24 = arith.constant 0.353553385 : f32
    %80 = vector.broadcast %cst_24 : f32 to vector<8x8xf32>
    %81 = arith.mulf %79, %80 : vector<8x8xf32>
    %cst_25 = arith.constant -1.000000e+09 : f32
    %82 = vector.shape_cast %8 : vector<1x8xi1> to vector<1x8xi1>
    %83 = vector.broadcast %82 : vector<1x8xi1> to vector<8x8xi1>
    %84 = vector.broadcast %cst_25 : f32 to vector<8x8xf32>
    %85 = arith.select %83, %81, %84 : vector<8x8xi1>, vector<8x8xf32>
    %cst_26 = arith.constant dense<0xFF800000> : vector<8xf32>
    %86 = vector.multi_reduction <maximumf>, %85, %cst_26 [1] : vector<8x8xf32> to vector<8xf32>
    %87 = vector.shape_cast %86 : vector<8xf32> to vector<8x1xf32>
    %88 = vector.broadcast %87 : vector<8x1xf32> to vector<8x8xf32>
    %89 = arith.subf %85, %88 : vector<8x8xf32>
    %90 = math.exp %89 : vector<8x8xf32>
    %cst_27 = arith.constant dense<0.000000e+00> : vector<8xf32>
    %91 = vector.multi_reduction <add>, %90, %cst_27 [1] : vector<8x8xf32> to vector<8xf32>
    %92 = vector.shape_cast %91 : vector<8xf32> to vector<8x1xf32>
    %93 = tpu.reciprocal %92 {approx = true} : vector<8x1xf32> -> vector<8x1xf32>
    %94 = vector.broadcast %93 : vector<8x1xf32> to vector<8x8xf32>
    %95 = arith.mulf %90, %94 : vector<8x8xf32>
    %cst_28 = arith.constant dense<0.000000e+00> : vector<8x8xf32>
    %96 = tpu.matmul %95, %77, %cst_28 {dimension_numbers = #tpu.dot_dimension_numbers<[1], [0], [0], [1], [0, 0, 1, 1], [], []>} : vector<8x8xf32>, vector<8x8xf32>, vector<8x8xf32> -> vector<8x8xf32>
    %97 = tpu.concatenate %30, %52, %74, %96 in 1 : vector<8x8xf32>, vector<8x8xf32>, vector<8x8xf32>, vector<8x8xf32> -> vector<8x32xf32>
    %98 = vector.shape_cast %97 : vector<8x32xf32> to vector<1x8x32xf32>
    %c0_29 = arith.constant 0 : index
    %c0_30 = arith.constant 0 : index
    %c0_31 = arith.constant 0 : index
    %99 = vector.load %arg3[%c0_29, %c0_30, %c0_31] : memref<1x8x32xf32, #tpu.memory_space<vmem>>, vector<1x8x32xf32>
    tpu.vector_store %arg3[%c0_29, %c0_30, %c0_31], %98 {strides = array<i32>} : memref<1x8x32xf32, #tpu.memory_space<vmem>>, vector<1x8x32xf32>,
    return
  }
  func.func @transform_0(%arg0: i32) -> (i32, i32, i32) {
    %c0_i32 = arith.constant 0 : i32
    %c0_i32_0 = arith.constant 0 : i32
    %c0_i32_1 = arith.constant 0 : i32
    return %arg0, %c0_i32, %c0_i32_0 : i32, i32, i32
  }
  func.func @transform_1(%arg0: i32) -> (i32, i32, i32) {
    %c0_i32 = arith.constant 0 : i32
    %c0_i32_0 = arith.constant 0 : i32
    %c0_i32_1 = arith.constant 0 : i32
    return %arg0, %c0_i32, %c0_i32_0 : i32, i32, i32
  }
  func.func @transform_2(%arg0: i32) -> (i32, i32, i32) {
    %c0_i32 = arith.constant 0 : i32
    %c0_i32_0 = arith.constant 0 : i32
    %c0_i32_1 = arith.constant 0 : i32
    return %arg0, %c0_i32, %c0_i32_0 : i32, i32, i32
  }
}

module attributes {stable_mosaic.version = 11 : i64} {
  func.func @_ln_linear_kernel(%arg0: i32, %arg1: i32, %arg2: memref<16x32xf32, #tpu.memory_space<vmem>>, %arg3: memref<1x32xf32, #tpu.memory_space<vmem>>, %arg4: memref<1x32xf32, #tpu.memory_space<vmem>>, %arg5: memref<32x96xf32, #tpu.memory_space<vmem>>, %arg6: memref<1x96xf32, #tpu.memory_space<vmem>>, %arg7: memref<16x96xf32, #tpu.memory_space<vmem>>) attributes {dimension_semantics = [#tpu.dimension_semantics<parallel>, #tpu.dimension_semantics<parallel>], iteration_bounds = array<i64: 1, 1>, scalar_prefetch = 0 : i64, scratch_operands = 0 : i64, tpu.core_type = #tpu.core_type<tc>, window_params = [{transform_indices = @transform_0, window_bounds = array<i64: 16, 32>}, {pipeline_mode = #tpu.pipeline_mode<synchronous>, transform_indices = @transform_1, window_bounds = array<i64: 1, 32>}, {pipeline_mode = #tpu.pipeline_mode<synchronous>, transform_indices = @transform_2, window_bounds = array<i64: 1, 32>}, {transform_indices = @transform_3, window_bounds = array<i64: 32, 96>}, {transform_indices = @transform_4, window_bounds = array<i64: 1, 96>}, {transform_indices = @transform_5, window_bounds = array<i64: 16, 96>}]} {
    %c0 = arith.constant 0 : index
    %c0_0 = arith.constant 0 : index
    %0 = vector.load %arg2[%c0, %c0_0] : memref<16x32xf32, #tpu.memory_space<vmem>>, vector<16x32xf32>
    %cst = arith.constant dense<0.000000e+00> : vector<16xf32>
    %1 = vector.multi_reduction <add>, %0, %cst [1] : vector<16x32xf32> to vector<16xf32>
    %2 = vector.shape_cast %1 : vector<16xf32> to vector<16x1xf32>
    %cst_1 = arith.constant 3.200000e+01 : f32
    %3 = vector.broadcast %cst_1 : f32 to vector<16x1xf32>
    %4 = arith.divf %2, %3 : vector<16x1xf32>
    %5 = vector.broadcast %4 : vector<16x1xf32> to vector<16x32xf32>
    %6 = arith.subf %0, %5 : vector<16x32xf32>
    %7 = vector.broadcast %4 : vector<16x1xf32> to vector<16x32xf32>
    %8 = arith.subf %0, %7 : vector<16x32xf32>
    %9 = arith.mulf %6, %8 : vector<16x32xf32>
    %cst_2 = arith.constant dense<0.000000e+00> : vector<16xf32>
    %10 = vector.multi_reduction <add>, %9, %cst_2 [1] : vector<16x32xf32> to vector<16xf32>
    %11 = vector.shape_cast %10 : vector<16xf32> to vector<16x1xf32>
    %cst_3 = arith.constant 3.200000e+01 : f32
    %12 = vector.broadcast %cst_3 : f32 to vector<16x1xf32>
    %13 = arith.divf %11, %12 : vector<16x1xf32>
    %14 = vector.broadcast %4 : vector<16x1xf32> to vector<16x32xf32>
    %15 = arith.subf %0, %14 : vector<16x32xf32>
    %cst_4 = arith.constant 9.99999997E-7 : f32
    %16 = vector.broadcast %cst_4 : f32 to vector<16x1xf32>
    %17 = arith.addf %13, %16 : vector<16x1xf32>
    %18 = math.rsqrt %17 : vector<16x1xf32>
    %19 = vector.broadcast %18 : vector<16x1xf32> to vector<16x32xf32>
    %20 = arith.mulf %15, %19 : vector<16x32xf32>
    %c0_5 = arith.constant 0 : index
    %c0_6 = arith.constant 0 : index
    %21 = vector.load %arg3[%c0_5, %c0_6] : memref<1x32xf32, #tpu.memory_space<vmem>>, vector<1x32xf32>
    %22 = vector.broadcast %21 : vector<1x32xf32> to vector<16x32xf32>
    %23 = arith.mulf %20, %22 : vector<16x32xf32>
    %c0_7 = arith.constant 0 : index
    %c0_8 = arith.constant 0 : index
    %24 = vector.load %arg4[%c0_7, %c0_8] : memref<1x32xf32, #tpu.memory_space<vmem>>, vector<1x32xf32>
    %25 = vector.broadcast %24 : vector<1x32xf32> to vector<16x32xf32>
    %26 = arith.addf %23, %25 : vector<16x32xf32>
    %c0_9 = arith.constant 0 : index
    %c0_10 = arith.constant 0 : index
    %27 = vector.load %arg5[%c0_9, %c0_10] : memref<32x96xf32, #tpu.memory_space<vmem>>, vector<32x96xf32>
    %cst_11 = arith.constant dense<0.000000e+00> : vector<16x96xf32>
    %28 = tpu.matmul %26, %27, %cst_11 {dimension_numbers = #tpu.dot_dimension_numbers<[1], [0], [0], [1], [0, 0, 1, 1], [], []>} : vector<16x32xf32>, vector<32x96xf32>, vector<16x96xf32> -> vector<16x96xf32>
    %c0_12 = arith.constant 0 : index
    %c0_13 = arith.constant 0 : index
    %29 = vector.load %arg6[%c0_12, %c0_13] : memref<1x96xf32, #tpu.memory_space<vmem>>, vector<1x96xf32>
    %30 = vector.broadcast %29 : vector<1x96xf32> to vector<16x96xf32>
    %31 = arith.addf %28, %30 : vector<16x96xf32>
    %c0_14 = arith.constant 0 : index
    %c0_15 = arith.constant 0 : index
    %32 = vector.load %arg7[%c0_14, %c0_15] : memref<16x96xf32, #tpu.memory_space<vmem>>, vector<16x96xf32>
    tpu.vector_store %arg7[%c0_14, %c0_15], %31 {strides = array<i32>} : memref<16x96xf32, #tpu.memory_space<vmem>>, vector<16x96xf32>,
    return
  }
  func.func @transform_0(%arg0: i32, %arg1: i32) -> (i32, i32) {
    %c0_i32 = arith.constant 0 : i32
    %c0_i32_0 = arith.constant 0 : i32
    return %arg0, %c0_i32 : i32, i32
  }
  func.func @transform_1(%arg0: i32, %arg1: i32) -> (i32, i32) {
    %c0_i32 = arith.constant 0 : i32
    %c0_i32_0 = arith.constant 0 : i32
    %c0_i32_1 = arith.constant 0 : i32
    return %c0_i32, %c0_i32_0 : i32, i32
  }
  func.func @transform_2(%arg0: i32, %arg1: i32) -> (i32, i32) {
    %c0_i32 = arith.constant 0 : i32
    %c0_i32_0 = arith.constant 0 : i32
    %c0_i32_1 = arith.constant 0 : i32
    return %c0_i32, %c0_i32_0 : i32, i32
  }
  func.func @transform_3(%arg0: i32, %arg1: i32) -> (i32, i32) {
    %c0_i32 = arith.constant 0 : i32
    %c0_i32_0 = arith.constant 0 : i32
    return %c0_i32, %arg1 : i32, i32
  }
  func.func @transform_4(%arg0: i32, %arg1: i32) -> (i32, i32) {
    %c0_i32 = arith.constant 0 : i32
    %c0_i32_0 = arith.constant 0 : i32
    return %c0_i32, %arg1 : i32, i32
  }
  func.func @transform_5(%arg0: i32, %arg1: i32) -> (i32, i32) {
    %c0_i32 = arith.constant 0 : i32
    return %arg0, %arg1 : i32, i32
  }
}

module attributes {stable_mosaic.version = 11 : i64} {
  func.func @_ln_ffn_kernel(%arg0: i32, %arg1: memref<16x32xf32, #tpu.memory_space<vmem>>, %arg2: memref<1x32xf32, #tpu.memory_space<vmem>>, %arg3: memref<1x32xf32, #tpu.memory_space<vmem>>, %arg4: memref<32x64xf32, #tpu.memory_space<vmem>>, %arg5: memref<1x64xf32, #tpu.memory_space<vmem>>, %arg6: memref<64x32xf32, #tpu.memory_space<vmem>>, %arg7: memref<1x32xf32, #tpu.memory_space<vmem>>, %arg8: memref<16x32xf32, #tpu.memory_space<vmem>>) attributes {dimension_semantics = [#tpu.dimension_semantics<parallel>], iteration_bounds = array<i64: 1>, scalar_prefetch = 0 : i64, scratch_operands = 0 : i64, tpu.core_type = #tpu.core_type<tc>, window_params = [{transform_indices = @transform_0, window_bounds = array<i64: 16, 32>}, {pipeline_mode = #tpu.pipeline_mode<synchronous>, transform_indices = @transform_1, window_bounds = array<i64: 1, 32>}, {pipeline_mode = #tpu.pipeline_mode<synchronous>, transform_indices = @transform_2, window_bounds = array<i64: 1, 32>}, {pipeline_mode = #tpu.pipeline_mode<synchronous>, transform_indices = @transform_3, window_bounds = array<i64: 32, 64>}, {pipeline_mode = #tpu.pipeline_mode<synchronous>, transform_indices = @transform_4, window_bounds = array<i64: 1, 64>}, {pipeline_mode = #tpu.pipeline_mode<synchronous>, transform_indices = @transform_5, window_bounds = array<i64: 64, 32>}, {pipeline_mode = #tpu.pipeline_mode<synchronous>, transform_indices = @transform_6, window_bounds = array<i64: 1, 32>}, {transform_indices = @transform_7, window_bounds = array<i64: 16, 32>}]} {
    %c0 = arith.constant 0 : index
    %c0_0 = arith.constant 0 : index
    %0 = vector.load %arg1[%c0, %c0_0] : memref<16x32xf32, #tpu.memory_space<vmem>>, vector<16x32xf32>
    %cst = arith.constant dense<0.000000e+00> : vector<16xf32>
    %1 = vector.multi_reduction <add>, %0, %cst [1] : vector<16x32xf32> to vector<16xf32>
    %2 = vector.shape_cast %1 : vector<16xf32> to vector<16x1xf32>
    %cst_1 = arith.constant 3.200000e+01 : f32
    %3 = vector.broadcast %cst_1 : f32 to vector<16x1xf32>
    %4 = arith.divf %2, %3 : vector<16x1xf32>
    %5 = vector.broadcast %4 : vector<16x1xf32> to vector<16x32xf32>
    %6 = arith.subf %0, %5 : vector<16x32xf32>
    %7 = vector.broadcast %4 : vector<16x1xf32> to vector<16x32xf32>
    %8 = arith.subf %0, %7 : vector<16x32xf32>
    %9 = arith.mulf %6, %8 : vector<16x32xf32>
    %cst_2 = arith.constant dense<0.000000e+00> : vector<16xf32>
    %10 = vector.multi_reduction <add>, %9, %cst_2 [1] : vector<16x32xf32> to vector<16xf32>
    %11 = vector.shape_cast %10 : vector<16xf32> to vector<16x1xf32>
    %cst_3 = arith.constant 3.200000e+01 : f32
    %12 = vector.broadcast %cst_3 : f32 to vector<16x1xf32>
    %13 = arith.divf %11, %12 : vector<16x1xf32>
    %14 = vector.broadcast %4 : vector<16x1xf32> to vector<16x32xf32>
    %15 = arith.subf %0, %14 : vector<16x32xf32>
    %cst_4 = arith.constant 9.99999997E-7 : f32
    %16 = vector.broadcast %cst_4 : f32 to vector<16x1xf32>
    %17 = arith.addf %13, %16 : vector<16x1xf32>
    %18 = math.rsqrt %17 : vector<16x1xf32>
    %19 = vector.broadcast %18 : vector<16x1xf32> to vector<16x32xf32>
    %20 = arith.mulf %15, %19 : vector<16x32xf32>
    %c0_5 = arith.constant 0 : index
    %c0_6 = arith.constant 0 : index
    %21 = vector.load %arg2[%c0_5, %c0_6] : memref<1x32xf32, #tpu.memory_space<vmem>>, vector<1x32xf32>
    %22 = vector.broadcast %21 : vector<1x32xf32> to vector<16x32xf32>
    %23 = arith.mulf %20, %22 : vector<16x32xf32>
    %c0_7 = arith.constant 0 : index
    %c0_8 = arith.constant 0 : index
    %24 = vector.load %arg3[%c0_7, %c0_8] : memref<1x32xf32, #tpu.memory_space<vmem>>, vector<1x32xf32>
    %25 = vector.broadcast %24 : vector<1x32xf32> to vector<16x32xf32>
    %26 = arith.addf %23, %25 : vector<16x32xf32>
    %c0_9 = arith.constant 0 : index
    %c0_10 = arith.constant 0 : index
    %27 = vector.load %arg4[%c0_9, %c0_10] : memref<32x64xf32, #tpu.memory_space<vmem>>, vector<32x64xf32>
    %cst_11 = arith.constant dense<0.000000e+00> : vector<16x64xf32>
    %28 = tpu.matmul %26, %27, %cst_11 {dimension_numbers = #tpu.dot_dimension_numbers<[1], [0], [0], [1], [0, 0, 1, 1], [], []>} : vector<16x32xf32>, vector<32x64xf32>, vector<16x64xf32> -> vector<16x64xf32>
    %c0_12 = arith.constant 0 : index
    %c0_13 = arith.constant 0 : index
    %29 = vector.load %arg5[%c0_12, %c0_13] : memref<1x64xf32, #tpu.memory_space<vmem>>, vector<1x64xf32>
    %30 = vector.broadcast %29 : vector<1x64xf32> to vector<16x64xf32>
    %31 = arith.addf %28, %30 : vector<16x64xf32>
    %cst_14 = arith.constant 0.000000e+00 : f32
    %32 = vector.broadcast %cst_14 : f32 to vector<16x64xf32>
    %33 = arith.maximumf %31, %32 : vector<16x64xf32>
    %c0_15 = arith.constant 0 : index
    %c0_16 = arith.constant 0 : index
    %34 = vector.load %arg6[%c0_15, %c0_16] : memref<64x32xf32, #tpu.memory_space<vmem>>, vector<64x32xf32>
    %cst_17 = arith.constant dense<0.000000e+00> : vector<16x32xf32>
    %35 = tpu.matmul %33, %34, %cst_17 {dimension_numbers = #tpu.dot_dimension_numbers<[1], [0], [0], [1], [0, 0, 1, 1], [], []>} : vector<16x64xf32>, vector<64x32xf32>, vector<16x32xf32> -> vector<16x32xf32>
    %c0_18 = arith.constant 0 : index
    %c0_19 = arith.constant 0 : index
    %36 = vector.load %arg7[%c0_18, %c0_19] : memref<1x32xf32, #tpu.memory_space<vmem>>, vector<1x32xf32>
    %37 = vector.broadcast %36 : vector<1x32xf32> to vector<16x32xf32>
    %38 = arith.addf %35, %37 : vector<16x32xf32>
    %39 = arith.addf %0, %38 : vector<16x32xf32>
    %c0_20 = arith.constant 0 : index
    %c0_21 = arith.constant 0 : index
    %40 = vector.load %arg8[%c0_20, %c0_21] : memref<16x32xf32, #tpu.memory_space<vmem>>, vector<16x32xf32>
    tpu.vector_store %arg8[%c0_20, %c0_21], %39 {strides = array<i32>} : memref<16x32xf32, #tpu.memory_space<vmem>>, vector<16x32xf32>,
    return
  }
  func.func @transform_0(%arg0: i32) -> (i32, i32) {
    %c0_i32 = arith.constant 0 : i32
    %c0_i32_0 = arith.constant 0 : i32
    return %arg0, %c0_i32 : i32, i32
  }
  func.func @transform_1(%arg0: i32) -> (i32, i32) {
    %c0_i32 = arith.constant 0 : i32
    %c0_i32_0 = arith.constant 0 : i32
    %c0_i32_1 = arith.constant 0 : i32
    return %c0_i32, %c0_i32_0 : i32, i32
  }
  func.func @transform_2(%arg0: i32) -> (i32, i32) {
    %c0_i32 = arith.constant 0 : i32
    %c0_i32_0 = arith.constant 0 : i32
    %c0_i32_1 = arith.constant 0 : i32
    return %c0_i32, %c0_i32_0 : i32, i32
  }
  func.func @transform_3(%arg0: i32) -> (i32, i32) {
    %c0_i32 = arith.constant 0 : i32
    %c0_i32_0 = arith.constant 0 : i32
    %c0_i32_1 = arith.constant 0 : i32
    return %c0_i32, %c0_i32_0 : i32, i32
  }
  func.func @transform_4(%arg0: i32) -> (i32, i32) {
    %c0_i32 = arith.constant 0 : i32
    %c0_i32_0 = arith.constant 0 : i32
    %c0_i32_1 = arith.constant 0 : i32
    return %c0_i32, %c0_i32_0 : i32, i32
  }
  func.func @transform_5(%arg0: i32) -> (i32, i32) {
    %c0_i32 = arith.constant 0 : i32
    %c0_i32_0 = arith.constant 0 : i32
    %c0_i32_1 = arith.constant 0 : i32
    return %c0_i32, %c0_i32_0 : i32, i32
  }
  func.func @transform_6(%arg0: i32) -> (i32, i32) {
    %c0_i32 = arith.constant 0 : i32
    %c0_i32_0 = arith.constant 0 : i32
    %c0_i32_1 = arith.constant 0 : i32
    return %c0_i32, %c0_i32_0 : i32, i32
  }
  func.func @transform_7(%arg0: i32) -> (i32, i32) {
    %c0_i32 = arith.constant 0 : i32
    %c0_i32_0 = arith.constant 0 : i32
    return %arg0, %c0_i32 : i32, i32
  }
}

module attributes {stable_mosaic.version = 11 : i64} {
  func.func @_ln_linear_kernel(%arg0: i32, %arg1: i32, %arg2: memref<16x32xf32, #tpu.memory_space<vmem>>, %arg3: memref<1x32xf32, #tpu.memory_space<vmem>>, %arg4: memref<1x32xf32, #tpu.memory_space<vmem>>, %arg5: memref<32x96xf32, #tpu.memory_space<vmem>>, %arg6: memref<1x96xf32, #tpu.memory_space<vmem>>, %arg7: memref<16x96xf32, #tpu.memory_space<vmem>>) attributes {dimension_semantics = [#tpu.dimension_semantics<parallel>, #tpu.dimension_semantics<parallel>], iteration_bounds = array<i64: 1, 1>, scalar_prefetch = 0 : i64, scratch_operands = 0 : i64, tpu.core_type = #tpu.core_type<tc>, window_params = [{transform_indices = @transform_0, window_bounds = array<i64: 16, 32>}, {pipeline_mode = #tpu.pipeline_mode<synchronous>, transform_indices = @transform_1, window_bounds = array<i64: 1, 32>}, {pipeline_mode = #tpu.pipeline_mode<synchronous>, transform_indices = @transform_2, window_bounds = array<i64: 1, 32>}, {transform_indices = @transform_3, window_bounds = array<i64: 32, 96>}, {transform_indices = @transform_4, window_bounds = array<i64: 1, 96>}, {transform_indices = @transform_5, window_bounds = array<i64: 16, 96>}]} {
    %c0 = arith.constant 0 : index
    %c0_0 = arith.constant 0 : index
    %0 = vector.load %arg2[%c0, %c0_0] : memref<16x32xf32, #tpu.memory_space<vmem>>, vector<16x32xf32>
    %cst = arith.constant dense<0.000000e+00> : vector<16xf32>
    %1 = vector.multi_reduction <add>, %0, %cst [1] : vector<16x32xf32> to vector<16xf32>
    %2 = vector.shape_cast %1 : vector<16xf32> to vector<16x1xf32>
    %cst_1 = arith.constant 3.200000e+01 : f32
    %3 = vector.broadcast %cst_1 : f32 to vector<16x1xf32>
    %4 = arith.divf %2, %3 : vector<16x1xf32>
    %5 = vector.broadcast %4 : vector<16x1xf32> to vector<16x32xf32>
    %6 = arith.subf %0, %5 : vector<16x32xf32>
    %7 = vector.broadcast %4 : vector<16x1xf32> to vector<16x32xf32>
    %8 = arith.subf %0, %7 : vector<16x32xf32>
    %9 = arith.mulf %6, %8 : vector<16x32xf32>
    %cst_2 = arith.constant dense<0.000000e+00> : vector<16xf32>
    %10 = vector.multi_reduction <add>, %9, %cst_2 [1] : vector<16x32xf32> to vector<16xf32>
    %11 = vector.shape_cast %10 : vector<16xf32> to vector<16x1xf32>
    %cst_3 = arith.constant 3.200000e+01 : f32
    %12 = vector.broadcast %cst_3 : f32 to vector<16x1xf32>
    %13 = arith.divf %11, %12 : vector<16x1xf32>
    %14 = vector.broadcast %4 : vector<16x1xf32> to vector<16x32xf32>
    %15 = arith.subf %0, %14 : vector<16x32xf32>
    %cst_4 = arith.constant 9.99999997E-7 : f32
    %16 = vector.broadcast %cst_4 : f32 to vector<16x1xf32>
    %17 = arith.addf %13, %16 : vector<16x1xf32>
    %18 = math.rsqrt %17 : vector<16x1xf32>
    %19 = vector.broadcast %18 : vector<16x1xf32> to vector<16x32xf32>
    %20 = arith.mulf %15, %19 : vector<16x32xf32>
    %c0_5 = arith.constant 0 : index
    %c0_6 = arith.constant 0 : index
    %21 = vector.load %arg3[%c0_5, %c0_6] : memref<1x32xf32, #tpu.memory_space<vmem>>, vector<1x32xf32>
    %22 = vector.broadcast %21 : vector<1x32xf32> to vector<16x32xf32>
    %23 = arith.mulf %20, %22 : vector<16x32xf32>
    %c0_7 = arith.constant 0 : index
    %c0_8 = arith.constant 0 : index
    %24 = vector.load %arg4[%c0_7, %c0_8] : memref<1x32xf32, #tpu.memory_space<vmem>>, vector<1x32xf32>
    %25 = vector.broadcast %24 : vector<1x32xf32> to vector<16x32xf32>
    %26 = arith.addf %23, %25 : vector<16x32xf32>
    %c0_9 = arith.constant 0 : index
    %c0_10 = arith.constant 0 : index
    %27 = vector.load %arg5[%c0_9, %c0_10] : memref<32x96xf32, #tpu.memory_space<vmem>>, vector<32x96xf32>
    %cst_11 = arith.constant dense<0.000000e+00> : vector<16x96xf32>
    %28 = tpu.matmul %26, %27, %cst_11 {dimension_numbers = #tpu.dot_dimension_numbers<[1], [0], [0], [1], [0, 0, 1, 1], [], []>} : vector<16x32xf32>, vector<32x96xf32>, vector<16x96xf32> -> vector<16x96xf32>
    %c0_12 = arith.constant 0 : index
    %c0_13 = arith.constant 0 : index
    %29 = vector.load %arg6[%c0_12, %c0_13] : memref<1x96xf32, #tpu.memory_space<vmem>>, vector<1x96xf32>
    %30 = vector.broadcast %29 : vector<1x96xf32> to vector<16x96xf32>
    %31 = arith.addf %28, %30 : vector<16x96xf32>
    %c0_14 = arith.constant 0 : index
    %c0_15 = arith.constant 0 : index
    %32 = vector.load %arg7[%c0_14, %c0_15] : memref<16x96xf32, #tpu.memory_space<vmem>>, vector<16x96xf32>
    tpu.vector_store %arg7[%c0_14, %c0_15], %31 {strides = array<i32>} : memref<16x96xf32, #tpu.memory_space<vmem>>, vector<16x96xf32>,
    return
  }
  func.func @transform_0(%arg0: i32, %arg1: i32) -> (i32, i32) {
    %c0_i32 = arith.constant 0 : i32
    %c0_i32_0 = arith.constant 0 : i32
    return %arg0, %c0_i32 : i32, i32
  }
  func.func @transform_1(%arg0: i32, %arg1: i32) -> (i32, i32) {
    %c0_i32 = arith.constant 0 : i32
    %c0_i32_0 = arith.constant 0 : i32
    %c0_i32_1 = arith.constant 0 : i32
    return %c0_i32, %c0_i32_0 : i32, i32
  }
  func.func @transform_2(%arg0: i32, %arg1: i32) -> (i32, i32) {
    %c0_i32 = arith.constant 0 : i32
    %c0_i32_0 = arith.constant 0 : i32
    %c0_i32_1 = arith.constant 0 : i32
    return %c0_i32, %c0_i32_0 : i32, i32
  }
  func.func @transform_3(%arg0: i32, %arg1: i32) -> (i32, i32) {
    %c0_i32 = arith.constant 0 : i32
    %c0_i32_0 = arith.constant 0 : i32
    return %c0_i32, %arg1 : i32, i32
  }
  func.func @transform_4(%arg0: i32, %arg1: i32) -> (i32, i32) {
    %c0_i32 = arith.constant 0 : i32
    %c0_i32_0 = arith.constant 0 : i32
    return %c0_i32, %arg1 : i32, i32
  }
  func.func @transform_5(%arg0: i32, %arg1: i32) -> (i32, i32) {
    %c0_i32 = arith.constant 0 : i32
    return %arg0, %arg1 : i32, i32
  }
}

module attributes {stable_mosaic.version = 11 : i64} {
  func.func @_linear_kernel(%arg0: i32, %arg1: i32, %arg2: i32, %arg3: memref<16x32xf32, #tpu.memory_space<vmem>>, %arg4: memref<32x64xf32, #tpu.memory_space<vmem>>, %arg5: memref<1x64xf32, #tpu.memory_space<vmem>>, %arg6: memref<16x64xf32, #tpu.memory_space<vmem>>, %arg7: memref<16x64xf32, #tpu.memory_space<vmem>>) attributes {dimension_semantics = [#tpu.dimension_semantics<parallel>, #tpu.dimension_semantics<parallel>, #tpu.dimension_semantics<arbitrary>], iteration_bounds = array<i64: 1, 1, 1>, scalar_prefetch = 0 : i64, scratch_operands = 1 : i64, tpu.core_type = #tpu.core_type<tc>, window_params = [{transform_indices = @transform_0, window_bounds = array<i64: 16, 32>}, {transform_indices = @transform_1, window_bounds = array<i64: 32, 64>}, {transform_indices = @transform_2, window_bounds = array<i64: 1, 64>}, {transform_indices = @transform_3, window_bounds = array<i64: 16, 64>}]} {
    %c0_i32 = arith.constant 0 : i32
    %0 = arith.cmpi eq, %arg2, %c0_i32 : i32
    %1 = arith.extui %0 : i1 to i32
    %c0_i32_0 = arith.constant 0 : i32
    %2 = arith.cmpi ne, %1, %c0_i32_0 : i32
    scf.if %2 {
      %cst_10 = arith.constant 0.000000e+00 : f32
      %12 = vector.broadcast %cst_10 : f32 to vector<16x64xf32>
      %c0_11 = arith.constant 0 : index
      %c0_12 = arith.constant 0 : index
      %13 = vector.load %arg7[%c0_11, %c0_12] : memref<16x64xf32, #tpu.memory_space<vmem>>, vector<16x64xf32>
      tpu.vector_store %arg7[%c0_11, %c0_12], %12 {strides = array<i32>} : memref<16x64xf32, #tpu.memory_space<vmem>>, vector<16x64xf32>,
    } else {
    }
    %c0 = arith.constant 0 : index
    %c0_1 = arith.constant 0 : index
    %3 = vector.load %arg7[%c0, %c0_1] : memref<16x64xf32, #tpu.memory_space<vmem>>, vector<16x64xf32>
    %c0_2 = arith.constant 0 : index
    %c0_3 = arith.constant 0 : index
    %4 = vector.load %arg3[%c0_2, %c0_3] : memref<16x32xf32, #tpu.memory_space<vmem>>, vector<16x32xf32>
    %c0_4 = arith.constant 0 : index
    %c0_5 = arith.constant 0 : index
    %5 = vector.load %arg4[%c0_4, %c0_5] : memref<32x64xf32, #tpu.memory_space<vmem>>, vector<32x64xf32>
    %cst = arith.constant dense<0.000000e+00> : vector<16x64xf32>
    %6 = tpu.matmul %4, %5, %cst {dimension_numbers = #tpu.dot_dimension_numbers<[1], [0], [0], [1], [0, 0, 1, 1], [], []>} : vector<16x32xf32>, vector<32x64xf32>, vector<16x64xf32> -> vector<16x64xf32>
    %7 = arith.addf %3, %6 : vector<16x64xf32>
    %c0_6 = arith.constant 0 : index
    %c0_7 = arith.constant 0 : index
    %8 = vector.load %arg7[%c0_6, %c0_7] : memref<16x64xf32, #tpu.memory_space<vmem>>, vector<16x64xf32>
    tpu.vector_store %arg7[%c0_6, %c0_7], %7 {strides = array<i32>} : memref<16x64xf32, #tpu.memory_space<vmem>>, vector<16x64xf32>,
    %c0_i32_8 = arith.constant 0 : i32
    %9 = arith.cmpi eq, %arg2, %c0_i32_8 : i32
    %10 = arith.extui %9 : i1 to i32
    %c0_i32_9 = arith.constant 0 : i32
    %11 = arith.cmpi ne, %10, %c0_i32_9 : i32
    scf.if %11 {
      %c0_10 = arith.constant 0 : index
      %c0_11 = arith.constant 0 : index
      %12 = vector.load %arg7[%c0_10, %c0_11] : memref<16x64xf32, #tpu.memory_space<vmem>>, vector<16x64xf32>
      %c0_12 = arith.constant 0 : index
      %c0_13 = arith.constant 0 : index
      %13 = vector.load %arg5[%c0_12, %c0_13] : memref<1x64xf32, #tpu.memory_space<vmem>>, vector<1x64xf32>
      %14 = vector.broadcast %13 : vector<1x64xf32> to vector<16x64xf32>
      %15 = arith.addf %12, %14 : vector<16x64xf32>
      %c0_14 = arith.constant 0 : index
      %c0_15 = arith.constant 0 : index
      %16 = vector.load %arg6[%c0_14, %c0_15] : memref<16x64xf32, #tpu.memory_space<vmem>>, vector<16x64xf32>
      tpu.vector_store %arg6[%c0_14, %c0_15], %15 {strides = array<i32>} : memref<16x64xf32, #tpu.memory_space<vmem>>, vector<16x64xf32>,
    } else {
    }
    return
  }
  func.func @transform_0(%arg0: i32, %arg1: i32, %arg2: i32) -> (i32, i32) {
    %c0_i32 = arith.constant 0 : i32
    return %arg0, %arg2 : i32, i32
  }
  func.func @transform_1(%arg0: i32, %arg1: i32, %arg2: i32) -> (i32, i32) {
    %c0_i32 = arith.constant 0 : i32
    return %arg2, %arg1 : i32, i32
  }
  func.func @transform_2(%arg0: i32, %arg1: i32, %arg2: i32) -> (i32, i32) {
    %c0_i32 = arith.constant 0 : i32
    %c0_i32_0 = arith.constant 0 : i32
    return %c0_i32, %arg1 : i32, i32
  }
  func.func @transform_3(%arg0: i32, %arg1: i32, %arg2: i32) -> (i32, i32) {
    %c0_i32 = arith.constant 0 : i32
    return %arg0, %arg1 : i32, i32
  }
}

module attributes {stable_mosaic.version = 11 : i64} {
  func.func @_attn_kernel(%arg0: i32, %arg1: memref<1x8x96xf32, #tpu.memory_space<vmem>>, %arg2: memref<1x1x8xf32, #tpu.memory_space<vmem>>, %arg3: memref<1x8x32xf32, #tpu.memory_space<vmem>>) attributes {dimension_semantics = [#tpu.dimension_semantics<parallel>], iteration_bounds = array<i64: 2>, scalar_prefetch = 0 : i64, scratch_operands = 0 : i64, tpu.core_type = #tpu.core_type<tc>, window_params = [{transform_indices = @transform_0, window_bounds = array<i64: 1, 8, 96>}, {transform_indices = @transform_1, window_bounds = array<i64: 1, 1, 8>}, {transform_indices = @transform_2, window_bounds = array<i64: 1, 8, 32>}]} {
    %c0 = arith.constant 0 : index
    %c0_0 = arith.constant 0 : index
    %c0_1 = arith.constant 0 : index
    %0 = vector.load %arg1[%c0, %c0_0, %c0_1] : memref<1x8x96xf32, #tpu.memory_space<vmem>>, vector<1x8x96xf32>
    %1 = vector.shape_cast %0 : vector<1x8x96xf32> to vector<8x96xf32>
    %2 = vector.extract_strided_slice %1 {offsets = [0, 0], sizes = [8, 32], strides = [1, 1]} : vector<8x96xf32> to vector<8x32xf32>
    %3 = vector.extract_strided_slice %1 {offsets = [0, 32], sizes = [8, 32], strides = [1, 1]} : vector<8x96xf32> to vector<8x32xf32>
    %4 = vector.extract_strided_slice %1 {offsets = [0, 64], sizes = [8, 32], strides = [1, 1]} : vector<8x96xf32> to vector<8x32xf32>
    %c0_2 = arith.constant 0 : index
    %c0_3 = arith.constant 0 : index
    %c0_4 = arith.constant 0 : index
    %5 = vector.load %arg2[%c0_2, %c0_3, %c0_4] : memref<1x1x8xf32, #tpu.memory_space<vmem>>, vector<1x1x8xf32>
    %6 = vector.shape_cast %5 : vector<1x1x8xf32> to vector<1x8xf32>
    %cst = arith.constant 0.000000e+00 : f32
    %7 = vector.broadcast %cst : f32 to vector<1x8xf32>
    %8 = arith.cmpf ogt, %6, %7 : vector<1x8xf32>
    %9 = tpu.iota {dimensions = array<i32: 0>} : vector<8x8xi32>
    %10 = tpu.iota {dimensions = array<i32: 1>} : vector<8x8xi32>
    %11 = arith.cmpi sle, %10, %9 : vector<8x8xi32>
    %12 = vector.broadcast %8 : vector<1x8xi1> to vector<8x8xi1>
    %13 = arith.andi %12, %11 : vector<8x8xi1>
    %14 = vector.extract_strided_slice %2 {offsets = [0, 0], sizes = [8, 8], strides = [1, 1]} : vector<8x32xf32> to vector<8x8xf32>
    %15 = vector.extract_strided_slice %3 {offsets = [0, 0], sizes = [8, 8], strides = [1, 1]} : vector<8x32xf32> to vector<8x8xf32>
    %16 = vector.extract_strided_slice %4 {offsets = [0, 0], sizes = [8, 8], strides = [1, 1]} : vector<8x32xf32> to vector<8x8xf32>
    %17 = tpu.transpose %15, [1, 0] : vector<8x8xf32> -> vector<8x8xf32>
    %cst_5 = arith.constant dense<0.000000e+00> : vector<8x8xf32>
    %18 = tpu.matmul %14, %17, %cst_5 {dimension_numbers = #tpu.dot_dimension_numbers<[1], [0], [0], [1], [0, 0, 1, 1], [], []>} : vector<8x8xf32>, vector<8x8xf32>, vector<8x8xf32> -> vector<8x8xf32>
    %cst_6 = arith.constant 0.353553385 : f32
    %19 = vector.broadcast %cst_6 : f32 to vector<8x8xf32>
    %20 = arith.mulf %18, %19 : vector<8x8xf32>
    %cst_7 = arith.constant -1.000000e+09 : f32
    %21 = vector.broadcast %cst_7 : f32 to vector<8x8xf32>
    %22 = arith.select %13, %20, %21 : vector<8x8xi1>, vector<8x8xf32>
    %cst_8 = arith.constant dense<0xFF800000> : vector<8xf32>
    %23 = vector.multi_reduction <maximumf>, %22, %cst_8 [1] : vector<8x8xf32> to vector<8xf32>
    %24 = vector.shape_cast %23 : vector<8xf32> to vector<8x1xf32>
    %25 = vector.broadcast %24 : vector<8x1xf32> to vector<8x8xf32>
    %26 = arith.subf %22, %25 : vector<8x8xf32>
    %27 = math.exp %26 : vector<8x8xf32>
    %cst_9 = arith.constant dense<0.000000e+00> : vector<8xf32>
    %28 = vector.multi_reduction <add>, %27, %cst_9 [1] : vector<8x8xf32> to vector<8xf32>
    %29 = vector.shape_cast %28 : vector<8xf32> to vector<8x1xf32>
    %30 = tpu.reciprocal %29 {approx = true} : vector<8x1xf32> -> vector<8x1xf32>
    %31 = vector.broadcast %30 : vector<8x1xf32> to vector<8x8xf32>
    %32 = arith.mulf %27, %31 : vector<8x8xf32>
    %cst_10 = arith.constant dense<0.000000e+00> : vector<8x8xf32>
    %33 = tpu.matmul %32, %16, %cst_10 {dimension_numbers = #tpu.dot_dimension_numbers<[1], [0], [0], [1], [0, 0, 1, 1], [], []>} : vector<8x8xf32>, vector<8x8xf32>, vector<8x8xf32> -> vector<8x8xf32>
    %34 = vector.extract_strided_slice %2 {offsets = [0, 8], sizes = [8, 8], strides = [1, 1]} : vector<8x32xf32> to vector<8x8xf32>
    %35 = vector.extract_strided_slice %3 {offsets = [0, 8], sizes = [8, 8], strides = [1, 1]} : vector<8x32xf32> to vector<8x8xf32>
    %36 = vector.extract_strided_slice %4 {offsets = [0, 8], sizes = [8, 8], strides = [1, 1]} : vector<8x32xf32> to vector<8x8xf32>
    %37 = tpu.transpose %35, [1, 0] : vector<8x8xf32> -> vector<8x8xf32>
    %cst_11 = arith.constant dense<0.000000e+00> : vector<8x8xf32>
    %38 = tpu.matmul %34, %37, %cst_11 {dimension_numbers = #tpu.dot_dimension_numbers<[1], [0], [0], [1], [0, 0, 1, 1], [], []>} : vector<8x8xf32>, vector<8x8xf32>, vector<8x8xf32> -> vector<8x8xf32>
    %cst_12 = arith.constant 0.353553385 : f32
    %39 = vector.broadcast %cst_12 : f32 to vector<8x8xf32>
    %40 = arith.mulf %38, %39 : vector<8x8xf32>
    %cst_13 = arith.constant -1.000000e+09 : f32
    %41 = vector.broadcast %cst_13 : f32 to vector<8x8xf32>
    %42 = arith.select %13, %40, %41 : vector<8x8xi1>, vector<8x8xf32>
    %cst_14 = arith.constant dense<0xFF800000> : vector<8xf32>
    %43 = vector.multi_reduction <maximumf>, %42, %cst_14 [1] : vector<8x8xf32> to vector<8xf32>
    %44 = vector.shape_cast %43 : vector<8xf32> to vector<8x1xf32>
    %45 = vector.broadcast %44 : vector<8x1xf32> to vector<8x8xf32>
    %46 = arith.subf %42, %45 : vector<8x8xf32>
    %47 = math.exp %46 : vector<8x8xf32>
    %cst_15 = arith.constant dense<0.000000e+00> : vector<8xf32>
    %48 = vector.multi_reduction <add>, %47, %cst_15 [1] : vector<8x8xf32> to vector<8xf32>
    %49 = vector.shape_cast %48 : vector<8xf32> to vector<8x1xf32>
    %50 = tpu.reciprocal %49 {approx = true} : vector<8x1xf32> -> vector<8x1xf32>
    %51 = vector.broadcast %50 : vector<8x1xf32> to vector<8x8xf32>
    %52 = arith.mulf %47, %51 : vector<8x8xf32>
    %cst_16 = arith.constant dense<0.000000e+00> : vector<8x8xf32>
    %53 = tpu.matmul %52, %36, %cst_16 {dimension_numbers = #tpu.dot_dimension_numbers<[1], [0], [0], [1], [0, 0, 1, 1], [], []>} : vector<8x8xf32>, vector<8x8xf32>, vector<8x8xf32> -> vector<8x8xf32>
    %54 = vector.extract_strided_slice %2 {offsets = [0, 16], sizes = [8, 8], strides = [1, 1]} : vector<8x32xf32> to vector<8x8xf32>
    %55 = vector.extract_strided_slice %3 {offsets = [0, 16], sizes = [8, 8], strides = [1, 1]} : vector<8x32xf32> to vector<8x8xf32>
    %56 = vector.extract_strided_slice %4 {offsets = [0, 16], sizes = [8, 8], strides = [1, 1]} : vector<8x32xf32> to vector<8x8xf32>
    %57 = tpu.transpose %55, [1, 0] : vector<8x8xf32> -> vector<8x8xf32>
    %cst_17 = arith.constant dense<0.000000e+00> : vector<8x8xf32>
    %58 = tpu.matmul %54, %57, %cst_17 {dimension_numbers = #tpu.dot_dimension_numbers<[1], [0], [0], [1], [0, 0, 1, 1], [], []>} : vector<8x8xf32>, vector<8x8xf32>, vector<8x8xf32> -> vector<8x8xf32>
    %cst_18 = arith.constant 0.353553385 : f32
    %59 = vector.broadcast %cst_18 : f32 to vector<8x8xf32>
    %60 = arith.mulf %58, %59 : vector<8x8xf32>
    %cst_19 = arith.constant -1.000000e+09 : f32
    %61 = vector.broadcast %cst_19 : f32 to vector<8x8xf32>
    %62 = arith.select %13, %60, %61 : vector<8x8xi1>, vector<8x8xf32>
    %cst_20 = arith.constant dense<0xFF800000> : vector<8xf32>
    %63 = vector.multi_reduction <maximumf>, %62, %cst_20 [1] : vector<8x8xf32> to vector<8xf32>
    %64 = vector.shape_cast %63 : vector<8xf32> to vector<8x1xf32>
    %65 = vector.broadcast %64 : vector<8x1xf32> to vector<8x8xf32>
    %66 = arith.subf %62, %65 : vector<8x8xf32>
    %67 = math.exp %66 : vector<8x8xf32>
    %cst_21 = arith.constant dense<0.000000e+00> : vector<8xf32>
    %68 = vector.multi_reduction <add>, %67, %cst_21 [1] : vector<8x8xf32> to vector<8xf32>
    %69 = vector.shape_cast %68 : vector<8xf32> to vector<8x1xf32>
    %70 = tpu.reciprocal %69 {approx = true} : vector<8x1xf32> -> vector<8x1xf32>
    %71 = vector.broadcast %70 : vector<8x1xf32> to vector<8x8xf32>
    %72 = arith.mulf %67, %71 : vector<8x8xf32>
    %cst_22 = arith.constant dense<0.000000e+00> : vector<8x8xf32>
    %73 = tpu.matmul %72, %56, %cst_22 {dimension_numbers = #tpu.dot_dimension_numbers<[1], [0], [0], [1], [0, 0, 1, 1], [], []>} : vector<8x8xf32>, vector<8x8xf32>, vector<8x8xf32> -> vector<8x8xf32>
    %74 = vector.extract_strided_slice %2 {offsets = [0, 24], sizes = [8, 8], strides = [1, 1]} : vector<8x32xf32> to vector<8x8xf32>
    %75 = vector.extract_strided_slice %3 {offsets = [0, 24], sizes = [8, 8], strides = [1, 1]} : vector<8x32xf32> to vector<8x8xf32>
    %76 = vector.extract_strided_slice %4 {offsets = [0, 24], sizes = [8, 8], strides = [1, 1]} : vector<8x32xf32> to vector<8x8xf32>
    %77 = tpu.transpose %75, [1, 0] : vector<8x8xf32> -> vector<8x8xf32>
    %cst_23 = arith.constant dense<0.000000e+00> : vector<8x8xf32>
    %78 = tpu.matmul %74, %77, %cst_23 {dimension_numbers = #tpu.dot_dimension_numbers<[1], [0], [0], [1], [0, 0, 1, 1], [], []>} : vector<8x8xf32>, vector<8x8xf32>, vector<8x8xf32> -> vector<8x8xf32>
    %cst_24 = arith.constant 0.353553385 : f32
    %79 = vector.broadcast %cst_24 : f32 to vector<8x8xf32>
    %80 = arith.mulf %78, %79 : vector<8x8xf32>
    %cst_25 = arith.constant -1.000000e+09 : f32
    %81 = vector.broadcast %cst_25 : f32 to vector<8x8xf32>
    %82 = arith.select %13, %80, %81 : vector<8x8xi1>, vector<8x8xf32>
    %cst_26 = arith.constant dense<0xFF800000> : vector<8xf32>
    %83 = vector.multi_reduction <maximumf>, %82, %cst_26 [1] : vector<8x8xf32> to vector<8xf32>
    %84 = vector.shape_cast %83 : vector<8xf32> to vector<8x1xf32>
    %85 = vector.broadcast %84 : vector<8x1xf32> to vector<8x8xf32>
    %86 = arith.subf %82, %85 : vector<8x8xf32>
    %87 = math.exp %86 : vector<8x8xf32>
    %cst_27 = arith.constant dense<0.000000e+00> : vector<8xf32>
    %88 = vector.multi_reduction <add>, %87, %cst_27 [1] : vector<8x8xf32> to vector<8xf32>
    %89 = vector.shape_cast %88 : vector<8xf32> to vector<8x1xf32>
    %90 = tpu.reciprocal %89 {approx = true} : vector<8x1xf32> -> vector<8x1xf32>
    %91 = vector.broadcast %90 : vector<8x1xf32> to vector<8x8xf32>
    %92 = arith.mulf %87, %91 : vector<8x8xf32>
    %cst_28 = arith.constant dense<0.000000e+00> : vector<8x8xf32>
    %93 = tpu.matmul %92, %76, %cst_28 {dimension_numbers = #tpu.dot_dimension_numbers<[1], [0], [0], [1], [0, 0, 1, 1], [], []>} : vector<8x8xf32>, vector<8x8xf32>, vector<8x8xf32> -> vector<8x8xf32>
    %94 = tpu.concatenate %33, %53, %73, %93 in 1 : vector<8x8xf32>, vector<8x8xf32>, vector<8x8xf32>, vector<8x8xf32> -> vector<8x32xf32>
    %95 = vector.shape_cast %94 : vector<8x32xf32> to vector<1x8x32xf32>
    %c0_29 = arith.constant 0 : index
    %c0_30 = arith.constant 0 : index
    %c0_31 = arith.constant 0 : index
    %96 = vector.load %arg3[%c0_29, %c0_30, %c0_31] : memref<1x8x32xf32, #tpu.memory_space<vmem>>, vector<1x8x32xf32>
    tpu.vector_store %arg3[%c0_29, %c0_30, %c0_31], %95 {strides = array<i32>} : memref<1x8x32xf32, #tpu.memory_space<vmem>>, vector<1x8x32xf32>,
    return
  }
  func.func @transform_0(%arg0: i32) -> (i32, i32, i32) {
    %c0_i32 = arith.constant 0 : i32
    %c0_i32_0 = arith.constant 0 : i32
    %c0_i32_1 = arith.constant 0 : i32
    return %arg0, %c0_i32, %c0_i32_0 : i32, i32, i32
  }
  func.func @transform_1(%arg0: i32) -> (i32, i32, i32) {
    %c0_i32 = arith.constant 0 : i32
    %c0_i32_0 = arith.constant 0 : i32
    %c0_i32_1 = arith.constant 0 : i32
    return %arg0, %c0_i32, %c0_i32_0 : i32, i32, i32
  }
  func.func @transform_2(%arg0: i32) -> (i32, i32, i32) {
    %c0_i32 = arith.constant 0 : i32
    %c0_i32_0 = arith.constant 0 : i32
    %c0_i32_1 = arith.constant 0 : i32
    return %arg0, %c0_i32, %c0_i32_0 : i32, i32, i32
  }
}

module attributes {stable_mosaic.version = 11 : i64} {
  func.func @_ln_linear_kernel(%arg0: i32, %arg1: i32, %arg2: memref<16x32xf32, #tpu.memory_space<vmem>>, %arg3: memref<1x32xf32, #tpu.memory_space<vmem>>, %arg4: memref<1x32xf32, #tpu.memory_space<vmem>>, %arg5: memref<32x32xf32, #tpu.memory_space<vmem>>, %arg6: memref<1x32xf32, #tpu.memory_space<vmem>>, %arg7: memref<16x32xf32, #tpu.memory_space<vmem>>) attributes {dimension_semantics = [#tpu.dimension_semantics<parallel>, #tpu.dimension_semantics<parallel>], iteration_bounds = array<i64: 1, 1>, scalar_prefetch = 0 : i64, scratch_operands = 0 : i64, tpu.core_type = #tpu.core_type<tc>, window_params = [{transform_indices = @transform_0, window_bounds = array<i64: 16, 32>}, {pipeline_mode = #tpu.pipeline_mode<synchronous>, transform_indices = @transform_1, window_bounds = array<i64: 1, 32>}, {pipeline_mode = #tpu.pipeline_mode<synchronous>, transform_indices = @transform_2, window_bounds = array<i64: 1, 32>}, {transform_indices = @transform_3, window_bounds = array<i64: 32, 32>}, {transform_indices = @transform_4, window_bounds = array<i64: 1, 32>}, {transform_indices = @transform_5, window_bounds = array<i64: 16, 32>}]} {
    %c0 = arith.constant 0 : index
    %c0_0 = arith.constant 0 : index
    %0 = vector.load %arg2[%c0, %c0_0] : memref<16x32xf32, #tpu.memory_space<vmem>>, vector<16x32xf32>
    %cst = arith.constant dense<0.000000e+00> : vector<16xf32>
    %1 = vector.multi_reduction <add>, %0, %cst [1] : vector<16x32xf32> to vector<16xf32>
    %2 = vector.shape_cast %1 : vector<16xf32> to vector<16x1xf32>
    %cst_1 = arith.constant 3.200000e+01 : f32
    %3 = vector.broadcast %cst_1 : f32 to vector<16x1xf32>
    %4 = arith.divf %2, %3 : vector<16x1xf32>
    %5 = vector.broadcast %4 : vector<16x1xf32> to vector<16x32xf32>
    %6 = arith.subf %0, %5 : vector<16x32xf32>
    %7 = vector.broadcast %4 : vector<16x1xf32> to vector<16x32xf32>
    %8 = arith.subf %0, %7 : vector<16x32xf32>
    %9 = arith.mulf %6, %8 : vector<16x32xf32>
    %cst_2 = arith.constant dense<0.000000e+00> : vector<16xf32>
    %10 = vector.multi_reduction <add>, %9, %cst_2 [1] : vector<16x32xf32> to vector<16xf32>
    %11 = vector.shape_cast %10 : vector<16xf32> to vector<16x1xf32>
    %cst_3 = arith.constant 3.200000e+01 : f32
    %12 = vector.broadcast %cst_3 : f32 to vector<16x1xf32>
    %13 = arith.divf %11, %12 : vector<16x1xf32>
    %14 = vector.broadcast %4 : vector<16x1xf32> to vector<16x32xf32>
    %15 = arith.subf %0, %14 : vector<16x32xf32>
    %cst_4 = arith.constant 9.99999997E-7 : f32
    %16 = vector.broadcast %cst_4 : f32 to vector<16x1xf32>
    %17 = arith.addf %13, %16 : vector<16x1xf32>
    %18 = math.rsqrt %17 : vector<16x1xf32>
    %19 = vector.broadcast %18 : vector<16x1xf32> to vector<16x32xf32>
    %20 = arith.mulf %15, %19 : vector<16x32xf32>
    %c0_5 = arith.constant 0 : index
    %c0_6 = arith.constant 0 : index
    %21 = vector.load %arg3[%c0_5, %c0_6] : memref<1x32xf32, #tpu.memory_space<vmem>>, vector<1x32xf32>
    %22 = vector.broadcast %21 : vector<1x32xf32> to vector<16x32xf32>
    %23 = arith.mulf %20, %22 : vector<16x32xf32>
    %c0_7 = arith.constant 0 : index
    %c0_8 = arith.constant 0 : index
    %24 = vector.load %arg4[%c0_7, %c0_8] : memref<1x32xf32, #tpu.memory_space<vmem>>, vector<1x32xf32>
    %25 = vector.broadcast %24 : vector<1x32xf32> to vector<16x32xf32>
    %26 = arith.addf %23, %25 : vector<16x32xf32>
    %c0_9 = arith.constant 0 : index
    %c0_10 = arith.constant 0 : index
    %27 = vector.load %arg5[%c0_9, %c0_10] : memref<32x32xf32, #tpu.memory_space<vmem>>, vector<32x32xf32>
    %cst_11 = arith.constant dense<0.000000e+00> : vector<16x32xf32>
    %28 = tpu.matmul %26, %27, %cst_11 {dimension_numbers = #tpu.dot_dimension_numbers<[1], [0], [0], [1], [0, 0, 1, 1], [], []>} : vector<16x32xf32>, vector<32x32xf32>, vector<16x32xf32> -> vector<16x32xf32>
    %c0_12 = arith.constant 0 : index
    %c0_13 = arith.constant 0 : index
    %29 = vector.load %arg6[%c0_12, %c0_13] : memref<1x32xf32, #tpu.memory_space<vmem>>, vector<1x32xf32>
    %30 = vector.broadcast %29 : vector<1x32xf32> to vector<16x32xf32>
    %31 = arith.addf %28, %30 : vector<16x32xf32>
    %c0_14 = arith.constant 0 : index
    %c0_15 = arith.constant 0 : index
    %32 = vector.load %arg7[%c0_14, %c0_15] : memref<16x32xf32, #tpu.memory_space<vmem>>, vector<16x32xf32>
    tpu.vector_store %arg7[%c0_14, %c0_15], %31 {strides = array<i32>} : memref<16x32xf32, #tpu.memory_space<vmem>>, vector<16x32xf32>,
    return
  }
  func.func @transform_0(%arg0: i32, %arg1: i32) -> (i32, i32) {
    %c0_i32 = arith.constant 0 : i32
    %c0_i32_0 = arith.constant 0 : i32
    return %arg0, %c0_i32 : i32, i32
  }
  func.func @transform_1(%arg0: i32, %arg1: i32) -> (i32, i32) {
    %c0_i32 = arith.constant 0 : i32
    %c0_i32_0 = arith.constant 0 : i32
    %c0_i32_1 = arith.constant 0 : i32
    return %c0_i32, %c0_i32_0 : i32, i32
  }
  func.func @transform_2(%arg0: i32, %arg1: i32) -> (i32, i32) {
    %c0_i32 = arith.constant 0 : i32
    %c0_i32_0 = arith.constant 0 : i32
    %c0_i32_1 = arith.constant 0 : i32
    return %c0_i32, %c0_i32_0 : i32, i32
  }
  func.func @transform_3(%arg0: i32, %arg1: i32) -> (i32, i32) {
    %c0_i32 = arith.constant 0 : i32
    %c0_i32_0 = arith.constant 0 : i32
    return %c0_i32, %arg1 : i32, i32
  }
  func.func @transform_4(%arg0: i32, %arg1: i32) -> (i32, i32) {
    %c0_i32 = arith.constant 0 : i32
    %c0_i32_0 = arith.constant 0 : i32
    return %c0_i32, %arg1 : i32, i32
  }
  func.func @transform_5(%arg0: i32, %arg1: i32) -> (i32, i32) {
    %c0_i32 = arith.constant 0 : i32
    return %arg0, %arg1 : i32, i32
  }
}

module attributes {stable_mosaic.version = 11 : i64} {
  func.func @_linear_kernel(%arg0: i32, %arg1: i32, %arg2: i32, %arg3: memref<16x32xf32, #tpu.memory_space<vmem>>, %arg4: memref<32x32xf32, #tpu.memory_space<vmem>>, %arg5: memref<1x32xf32, #tpu.memory_space<vmem>>, %arg6: memref<16x32xf32, #tpu.memory_space<vmem>>, %arg7: memref<16x32xf32, #tpu.memory_space<vmem>>, %arg8: memref<16x32xf32, #tpu.memory_space<vmem>>) attributes {dimension_semantics = [#tpu.dimension_semantics<parallel>, #tpu.dimension_semantics<parallel>, #tpu.dimension_semantics<arbitrary>], iteration_bounds = array<i64: 1, 1, 1>, scalar_prefetch = 0 : i64, scratch_operands = 1 : i64, tpu.core_type = #tpu.core_type<tc>, window_params = [{transform_indices = @transform_0, window_bounds = array<i64: 16, 32>}, {transform_indices = @transform_1, window_bounds = array<i64: 32, 32>}, {transform_indices = @transform_2, window_bounds = array<i64: 1, 32>}, {transform_indices = @transform_3, window_bounds = array<i64: 16, 32>}, {transform_indices = @transform_4, window_bounds = array<i64: 16, 32>}]} {
    %c0_i32 = arith.constant 0 : i32
    %0 = arith.cmpi eq, %arg2, %c0_i32 : i32
    %1 = arith.extui %0 : i1 to i32
    %c0_i32_0 = arith.constant 0 : i32
    %2 = arith.cmpi ne, %1, %c0_i32_0 : i32
    scf.if %2 {
      %cst_10 = arith.constant 0.000000e+00 : f32
      %12 = vector.broadcast %cst_10 : f32 to vector<16x32xf32>
      %c0_11 = arith.constant 0 : index
      %c0_12 = arith.constant 0 : index
      %13 = vector.load %arg8[%c0_11, %c0_12] : memref<16x32xf32, #tpu.memory_space<vmem>>, vector<16x32xf32>
      tpu.vector_store %arg8[%c0_11, %c0_12], %12 {strides = array<i32>} : memref<16x32xf32, #tpu.memory_space<vmem>>, vector<16x32xf32>,
    } else {
    }
    %c0 = arith.constant 0 : index
    %c0_1 = arith.constant 0 : index
    %3 = vector.load %arg8[%c0, %c0_1] : memref<16x32xf32, #tpu.memory_space<vmem>>, vector<16x32xf32>
    %c0_2 = arith.constant 0 : index
    %c0_3 = arith.constant 0 : index
    %4 = vector.load %arg3[%c0_2, %c0_3] : memref<16x32xf32, #tpu.memory_space<vmem>>, vector<16x32xf32>
    %c0_4 = arith.constant 0 : index
    %c0_5 = arith.constant 0 : index
    %5 = vector.load %arg4[%c0_4, %c0_5] : memref<32x32xf32, #tpu.memory_space<vmem>>, vector<32x32xf32>
    %cst = arith.constant dense<0.000000e+00> : vector<16x32xf32>
    %6 = tpu.matmul %4, %5, %cst {dimension_numbers = #tpu.dot_dimension_numbers<[1], [0], [0], [1], [0, 0, 1, 1], [], []>} : vector<16x32xf32>, vector<32x32xf32>, vector<16x32xf32> -> vector<16x32xf32>
    %7 = arith.addf %3, %6 : vector<16x32xf32>
    %c0_6 = arith.constant 0 : index
    %c0_7 = arith.constant 0 : index
    %8 = vector.load %arg8[%c0_6, %c0_7] : memref<16x32xf32, #tpu.memory_space<vmem>>, vector<16x32xf32>
    tpu.vector_store %arg8[%c0_6, %c0_7], %7 {strides = array<i32>} : memref<16x32xf32, #tpu.memory_space<vmem>>, vector<16x32xf32>,
    %c0_i32_8 = arith.constant 0 : i32
    %9 = arith.cmpi eq, %arg2, %c0_i32_8 : i32
    %10 = arith.extui %9 : i1 to i32
    %c0_i32_9 = arith.constant 0 : i32
    %11 = arith.cmpi ne, %10, %c0_i32_9 : i32
    scf.if %11 {
      %c0_10 = arith.constant 0 : index
      %c0_11 = arith.constant 0 : index
      %12 = vector.load %arg8[%c0_10, %c0_11] : memref<16x32xf32, #tpu.memory_space<vmem>>, vector<16x32xf32>
      %c0_12 = arith.constant 0 : index
      %c0_13 = arith.constant 0 : index
      %13 = vector.load %arg5[%c0_12, %c0_13] : memref<1x32xf32, #tpu.memory_space<vmem>>, vector<1x32xf32>
      %14 = vector.broadcast %13 : vector<1x32xf32> to vector<16x32xf32>
      %15 = arith.addf %12, %14 : vector<16x32xf32>
      %c0_14 = arith.constant 0 : index
      %c0_15 = arith.constant 0 : index
      %16 = vector.load %arg6[%c0_14, %c0_15] : memref<16x32xf32, #tpu.memory_space<vmem>>, vector<16x32xf32>
      %17 = arith.addf %15, %16 : vector<16x32xf32>
      %c0_16 = arith.constant 0 : index
      %c0_17 = arith.constant 0 : index
      %18 = vector.load %arg7[%c0_16, %c0_17] : memref<16x32xf32, #tpu.memory_space<vmem>>, vector<16x32xf32>
      tpu.vector_store %arg7[%c0_16, %c0_17], %17 {strides = array<i32>} : memref<16x32xf32, #tpu.memory_space<vmem>>, vector<16x32xf32>,
    } else {
    }
    return
  }
  func.func @transform_0(%arg0: i32, %arg1: i32, %arg2: i32) -> (i32, i32) {
    %c0_i32 = arith.constant 0 : i32
    return %arg0, %arg2 : i32, i32
  }
  func.func @transform_1(%arg0: i32, %arg1: i32, %arg2: i32) -> (i32, i32) {
    %c0_i32 = arith.constant 0 : i32
    return %arg2, %arg1 : i32, i32
  }
  func.func @transform_2(%arg0: i32, %arg1: i32, %arg2: i32) -> (i32, i32) {
    %c0_i32 = arith.constant 0 : i32
    %c0_i32_0 = arith.constant 0 : i32
    return %c0_i32, %arg1 : i32, i32
  }
  func.func @transform_3(%arg0: i32, %arg1: i32, %arg2: i32) -> (i32, i32) {
    %c0_i32 = arith.constant 0 : i32
    return %arg0, %arg1 : i32, i32
  }
  func.func @transform_4(%arg0: i32, %arg1: i32, %arg2: i32) -> (i32, i32) {
    %c0_i32 = arith.constant 0 : i32
    return %arg0, %arg1 : i32, i32
  }
}

module attributes {stable_mosaic.version = 11 : i64} {
  func.func @_attn_kernel(%arg0: i32, %arg1: memref<1x8x32xf32, #tpu.memory_space<vmem>>, %arg2: memref<1x8x64xf32, #tpu.memory_space<vmem>>, %arg3: memref<1x1x8xf32, #tpu.memory_space<vmem>>, %arg4: memref<1x8x32xf32, #tpu.memory_space<vmem>>) attributes {dimension_semantics = [#tpu.dimension_semantics<parallel>], iteration_bounds = array<i64: 2>, scalar_prefetch = 0 : i64, scratch_operands = 0 : i64, tpu.core_type = #tpu.core_type<tc>, window_params = [{transform_indices = @transform_0, window_bounds = array<i64: 1, 8, 32>}, {transform_indices = @transform_1, window_bounds = array<i64: 1, 8, 64>}, {transform_indices = @transform_2, window_bounds = array<i64: 1, 1, 8>}, {transform_indices = @transform_3, window_bounds = array<i64: 1, 8, 32>}]} {
    %c0 = arith.constant 0 : index
    %c0_0 = arith.constant 0 : index
    %c0_1 = arith.constant 0 : index
    %0 = vector.load %arg1[%c0, %c0_0, %c0_1] : memref<1x8x32xf32, #tpu.memory_space<vmem>>, vector<1x8x32xf32>
    %1 = vector.shape_cast %0 : vector<1x8x32xf32> to vector<8x32xf32>
    %c0_2 = arith.constant 0 : index
    %c0_3 = arith.constant 0 : index
    %c0_4 = arith.constant 0 : index
    %2 = vector.load %arg2[%c0_2, %c0_3, %c0_4] : memref<1x8x64xf32, #tpu.memory_space<vmem>>, vector<1x8x64xf32>
    %3 = vector.shape_cast %2 : vector<1x8x64xf32> to vector<8x64xf32>
    %4 = vector.extract_strided_slice %3 {offsets = [0, 0], sizes = [8, 32], strides = [1, 1]} : vector<8x64xf32> to vector<8x32xf32>
    %5 = vector.extract_strided_slice %3 {offsets = [0, 32], sizes = [8, 32], strides = [1, 1]} : vector<8x64xf32> to vector<8x32xf32>
    %c0_5 = arith.constant 0 : index
    %c0_6 = arith.constant 0 : index
    %c0_7 = arith.constant 0 : index
    %6 = vector.load %arg3[%c0_5, %c0_6, %c0_7] : memref<1x1x8xf32, #tpu.memory_space<vmem>>, vector<1x1x8xf32>
    %7 = vector.shape_cast %6 : vector<1x1x8xf32> to vector<1x8xf32>
    %cst = arith.constant 0.000000e+00 : f32
    %8 = vector.broadcast %cst : f32 to vector<1x8xf32>
    %9 = arith.cmpf ogt, %7, %8 : vector<1x8xf32>
    %10 = vector.extract_strided_slice %1 {offsets = [0, 0], sizes = [8, 8], strides = [1, 1]} : vector<8x32xf32> to vector<8x8xf32>
    %11 = vector.extract_strided_slice %4 {offsets = [0, 0], sizes = [8, 8], strides = [1, 1]} : vector<8x32xf32> to vector<8x8xf32>
    %12 = vector.extract_strided_slice %5 {offsets = [0, 0], sizes = [8, 8], strides = [1, 1]} : vector<8x32xf32> to vector<8x8xf32>
    %13 = tpu.transpose %11, [1, 0] : vector<8x8xf32> -> vector<8x8xf32>
    %cst_8 = arith.constant dense<0.000000e+00> : vector<8x8xf32>
    %14 = tpu.matmul %10, %13, %cst_8 {dimension_numbers = #tpu.dot_dimension_numbers<[1], [0], [0], [1], [0, 0, 1, 1], [], []>} : vector<8x8xf32>, vector<8x8xf32>, vector<8x8xf32> -> vector<8x8xf32>
    %cst_9 = arith.constant 0.353553385 : f32
    %15 = vector.broadcast %cst_9 : f32 to vector<8x8xf32>
    %16 = arith.mulf %14, %15 : vector<8x8xf32>
    %cst_10 = arith.constant -1.000000e+09 : f32
    %17 = vector.shape_cast %9 : vector<1x8xi1> to vector<1x8xi1>
    %18 = vector.broadcast %17 : vector<1x8xi1> to vector<8x8xi1>
    %19 = vector.broadcast %cst_10 : f32 to vector<8x8xf32>
    %20 = arith.select %18, %16, %19 : vector<8x8xi1>, vector<8x8xf32>
    %cst_11 = arith.constant dense<0xFF800000> : vector<8xf32>
    %21 = vector.multi_reduction <maximumf>, %20, %cst_11 [1] : vector<8x8xf32> to vector<8xf32>
    %22 = vector.shape_cast %21 : vector<8xf32> to vector<8x1xf32>
    %23 = vector.broadcast %22 : vector<8x1xf32> to vector<8x8xf32>
    %24 = arith.subf %20, %23 : vector<8x8xf32>
    %25 = math.exp %24 : vector<8x8xf32>
    %cst_12 = arith.constant dense<0.000000e+00> : vector<8xf32>
    %26 = vector.multi_reduction <add>, %25, %cst_12 [1] : vector<8x8xf32> to vector<8xf32>
    %27 = vector.shape_cast %26 : vector<8xf32> to vector<8x1xf32>
    %28 = tpu.reciprocal %27 {approx = true} : vector<8x1xf32> -> vector<8x1xf32>
    %29 = vector.broadcast %28 : vector<8x1xf32> to vector<8x8xf32>
    %30 = arith.mulf %25, %29 : vector<8x8xf32>
    %cst_13 = arith.constant dense<0.000000e+00> : vector<8x8xf32>
    %31 = tpu.matmul %30, %12, %cst_13 {dimension_numbers = #tpu.dot_dimension_numbers<[1], [0], [0], [1], [0, 0, 1, 1], [], []>} : vector<8x8xf32>, vector<8x8xf32>, vector<8x8xf32> -> vector<8x8xf32>
    %32 = vector.extract_strided_slice %1 {offsets = [0, 8], sizes = [8, 8], strides = [1, 1]} : vector<8x32xf32> to vector<8x8xf32>
    %33 = vector.extract_strided_slice %4 {offsets = [0, 8], sizes = [8, 8], strides = [1, 1]} : vector<8x32xf32> to vector<8x8xf32>
    %34 = vector.extract_strided_slice %5 {offsets = [0, 8], sizes = [8, 8], strides = [1, 1]} : vector<8x32xf32> to vector<8x8xf32>
    %35 = tpu.transpose %33, [1, 0] : vector<8x8xf32> -> vector<8x8xf32>
    %cst_14 = arith.constant dense<0.000000e+00> : vector<8x8xf32>
    %36 = tpu.matmul %32, %35, %cst_14 {dimension_numbers = #tpu.dot_dimension_numbers<[1], [0], [0], [1], [0, 0, 1, 1], [], []>} : vector<8x8xf32>, vector<8x8xf32>, vector<8x8xf32> -> vector<8x8xf32>
    %cst_15 = arith.constant 0.353553385 : f32
    %37 = vector.broadcast %cst_15 : f32 to vector<8x8xf32>
    %38 = arith.mulf %36, %37 : vector<8x8xf32>
    %cst_16 = arith.constant -1.000000e+09 : f32
    %39 = vector.shape_cast %9 : vector<1x8xi1> to vector<1x8xi1>
    %40 = vector.broadcast %39 : vector<1x8xi1> to vector<8x8xi1>
    %41 = vector.broadcast %cst_16 : f32 to vector<8x8xf32>
    %42 = arith.select %40, %38, %41 : vector<8x8xi1>, vector<8x8xf32>
    %cst_17 = arith.constant dense<0xFF800000> : vector<8xf32>
    %43 = vector.multi_reduction <maximumf>, %42, %cst_17 [1] : vector<8x8xf32> to vector<8xf32>
    %44 = vector.shape_cast %43 : vector<8xf32> to vector<8x1xf32>
    %45 = vector.broadcast %44 : vector<8x1xf32> to vector<8x8xf32>
    %46 = arith.subf %42, %45 : vector<8x8xf32>
    %47 = math.exp %46 : vector<8x8xf32>
    %cst_18 = arith.constant dense<0.000000e+00> : vector<8xf32>
    %48 = vector.multi_reduction <add>, %47, %cst_18 [1] : vector<8x8xf32> to vector<8xf32>
    %49 = vector.shape_cast %48 : vector<8xf32> to vector<8x1xf32>
    %50 = tpu.reciprocal %49 {approx = true} : vector<8x1xf32> -> vector<8x1xf32>
    %51 = vector.broadcast %50 : vector<8x1xf32> to vector<8x8xf32>
    %52 = arith.mulf %47, %51 : vector<8x8xf32>
    %cst_19 = arith.constant dense<0.000000e+00> : vector<8x8xf32>
    %53 = tpu.matmul %52, %34, %cst_19 {dimension_numbers = #tpu.dot_dimension_numbers<[1], [0], [0], [1], [0, 0, 1, 1], [], []>} : vector<8x8xf32>, vector<8x8xf32>, vector<8x8xf32> -> vector<8x8xf32>
    %54 = vector.extract_strided_slice %1 {offsets = [0, 16], sizes = [8, 8], strides = [1, 1]} : vector<8x32xf32> to vector<8x8xf32>
    %55 = vector.extract_strided_slice %4 {offsets = [0, 16], sizes = [8, 8], strides = [1, 1]} : vector<8x32xf32> to vector<8x8xf32>
    %56 = vector.extract_strided_slice %5 {offsets = [0, 16], sizes = [8, 8], strides = [1, 1]} : vector<8x32xf32> to vector<8x8xf32>
    %57 = tpu.transpose %55, [1, 0] : vector<8x8xf32> -> vector<8x8xf32>
    %cst_20 = arith.constant dense<0.000000e+00> : vector<8x8xf32>
    %58 = tpu.matmul %54, %57, %cst_20 {dimension_numbers = #tpu.dot_dimension_numbers<[1], [0], [0], [1], [0, 0, 1, 1], [], []>} : vector<8x8xf32>, vector<8x8xf32>, vector<8x8xf32> -> vector<8x8xf32>
    %cst_21 = arith.constant 0.353553385 : f32
    %59 = vector.broadcast %cst_21 : f32 to vector<8x8xf32>
    %60 = arith.mulf %58, %59 : vector<8x8xf32>
    %cst_22 = arith.constant -1.000000e+09 : f32
    %61 = vector.shape_cast %9 : vector<1x8xi1> to vector<1x8xi1>
    %62 = vector.broadcast %61 : vector<1x8xi1> to vector<8x8xi1>
    %63 = vector.broadcast %cst_22 : f32 to vector<8x8xf32>
    %64 = arith.select %62, %60, %63 : vector<8x8xi1>, vector<8x8xf32>
    %cst_23 = arith.constant dense<0xFF800000> : vector<8xf32>
    %65 = vector.multi_reduction <maximumf>, %64, %cst_23 [1] : vector<8x8xf32> to vector<8xf32>
    %66 = vector.shape_cast %65 : vector<8xf32> to vector<8x1xf32>
    %67 = vector.broadcast %66 : vector<8x1xf32> to vector<8x8xf32>
    %68 = arith.subf %64, %67 : vector<8x8xf32>
    %69 = math.exp %68 : vector<8x8xf32>
    %cst_24 = arith.constant dense<0.000000e+00> : vector<8xf32>
    %70 = vector.multi_reduction <add>, %69, %cst_24 [1] : vector<8x8xf32> to vector<8xf32>
    %71 = vector.shape_cast %70 : vector<8xf32> to vector<8x1xf32>
    %72 = tpu.reciprocal %71 {approx = true} : vector<8x1xf32> -> vector<8x1xf32>
    %73 = vector.broadcast %72 : vector<8x1xf32> to vector<8x8xf32>
    %74 = arith.mulf %69, %73 : vector<8x8xf32>
    %cst_25 = arith.constant dense<0.000000e+00> : vector<8x8xf32>
    %75 = tpu.matmul %74, %56, %cst_25 {dimension_numbers = #tpu.dot_dimension_numbers<[1], [0], [0], [1], [0, 0, 1, 1], [], []>} : vector<8x8xf32>, vector<8x8xf32>, vector<8x8xf32> -> vector<8x8xf32>
    %76 = vector.extract_strided_slice %1 {offsets = [0, 24], sizes = [8, 8], strides = [1, 1]} : vector<8x32xf32> to vector<8x8xf32>
    %77 = vector.extract_strided_slice %4 {offsets = [0, 24], sizes = [8, 8], strides = [1, 1]} : vector<8x32xf32> to vector<8x8xf32>
    %78 = vector.extract_strided_slice %5 {offsets = [0, 24], sizes = [8, 8], strides = [1, 1]} : vector<8x32xf32> to vector<8x8xf32>
    %79 = tpu.transpose %77, [1, 0] : vector<8x8xf32> -> vector<8x8xf32>
    %cst_26 = arith.constant dense<0.000000e+00> : vector<8x8xf32>
    %80 = tpu.matmul %76, %79, %cst_26 {dimension_numbers = #tpu.dot_dimension_numbers<[1], [0], [0], [1], [0, 0, 1, 1], [], []>} : vector<8x8xf32>, vector<8x8xf32>, vector<8x8xf32> -> vector<8x8xf32>
    %cst_27 = arith.constant 0.353553385 : f32
    %81 = vector.broadcast %cst_27 : f32 to vector<8x8xf32>
    %82 = arith.mulf %80, %81 : vector<8x8xf32>
    %cst_28 = arith.constant -1.000000e+09 : f32
    %83 = vector.shape_cast %9 : vector<1x8xi1> to vector<1x8xi1>
    %84 = vector.broadcast %83 : vector<1x8xi1> to vector<8x8xi1>
    %85 = vector.broadcast %cst_28 : f32 to vector<8x8xf32>
    %86 = arith.select %84, %82, %85 : vector<8x8xi1>, vector<8x8xf32>
    %cst_29 = arith.constant dense<0xFF800000> : vector<8xf32>
    %87 = vector.multi_reduction <maximumf>, %86, %cst_29 [1] : vector<8x8xf32> to vector<8xf32>
    %88 = vector.shape_cast %87 : vector<8xf32> to vector<8x1xf32>
    %89 = vector.broadcast %88 : vector<8x1xf32> to vector<8x8xf32>
    %90 = arith.subf %86, %89 : vector<8x8xf32>
    %91 = math.exp %90 : vector<8x8xf32>
    %cst_30 = arith.constant dense<0.000000e+00> : vector<8xf32>
    %92 = vector.multi_reduction <add>, %91, %cst_30 [1] : vector<8x8xf32> to vector<8xf32>
    %93 = vector.shape_cast %92 : vector<8xf32> to vector<8x1xf32>
    %94 = tpu.reciprocal %93 {approx = true} : vector<8x1xf32> -> vector<8x1xf32>
    %95 = vector.broadcast %94 : vector<8x1xf32> to vector<8x8xf32>
    %96 = arith.mulf %91, %95 : vector<8x8xf32>
    %cst_31 = arith.constant dense<0.000000e+00> : vector<8x8xf32>
    %97 = tpu.matmul %96, %78, %cst_31 {dimension_numbers = #tpu.dot_dimension_numbers<[1], [0], [0], [1], [0, 0, 1, 1], [], []>} : vector<8x8xf32>, vector<8x8xf32>, vector<8x8xf32> -> vector<8x8xf32>
    %98 = tpu.concatenate %31, %53, %75, %97 in 1 : vector<8x8xf32>, vector<8x8xf32>, vector<8x8xf32>, vector<8x8xf32> -> vector<8x32xf32>
    %99 = vector.shape_cast %98 : vector<8x32xf32> to vector<1x8x32xf32>
    %c0_32 = arith.constant 0 : index
    %c0_33 = arith.constant 0 : index
    %c0_34 = arith.constant 0 : index
    %100 = vector.load %arg4[%c0_32, %c0_33, %c0_34] : memref<1x8x32xf32, #tpu.memory_space<vmem>>, vector<1x8x32xf32>
    tpu.vector_store %arg4[%c0_32, %c0_33, %c0_34], %99 {strides = array<i32>} : memref<1x8x32xf32, #tpu.memory_space<vmem>>, vector<1x8x32xf32>,
    return
  }
  func.func @transform_0(%arg0: i32) -> (i32, i32, i32) {
    %c0_i32 = arith.constant 0 : i32
    %c0_i32_0 = arith.constant 0 : i32
    %c0_i32_1 = arith.constant 0 : i32
    return %arg0, %c0_i32, %c0_i32_0 : i32, i32, i32
  }
  func.func @transform_1(%arg0: i32) -> (i32, i32, i32) {
    %c0_i32 = arith.constant 0 : i32
    %c0_i32_0 = arith.constant 0 : i32
    %c0_i32_1 = arith.constant 0 : i32
    return %arg0, %c0_i32, %c0_i32_0 : i32, i32, i32
  }
  func.func @transform_2(%arg0: i32) -> (i32, i32, i32) {
    %c0_i32 = arith.constant 0 : i32
    %c0_i32_0 = arith.constant 0 : i32
    %c0_i32_1 = arith.constant 0 : i32
    return %arg0, %c0_i32, %c0_i32_0 : i32, i32, i32
  }
  func.func @transform_3(%arg0: i32) -> (i32, i32, i32) {
    %c0_i32 = arith.constant 0 : i32
    %c0_i32_0 = arith.constant 0 : i32
    %c0_i32_1 = arith.constant 0 : i32
    return %arg0, %c0_i32, %c0_i32_0 : i32, i32, i32
  }
}

module attributes {stable_mosaic.version = 11 : i64} {
  func.func @_ln_ffn_kernel(%arg0: i32, %arg1: memref<16x32xf32, #tpu.memory_space<vmem>>, %arg2: memref<1x32xf32, #tpu.memory_space<vmem>>, %arg3: memref<1x32xf32, #tpu.memory_space<vmem>>, %arg4: memref<32x64xf32, #tpu.memory_space<vmem>>, %arg5: memref<1x64xf32, #tpu.memory_space<vmem>>, %arg6: memref<64x32xf32, #tpu.memory_space<vmem>>, %arg7: memref<1x32xf32, #tpu.memory_space<vmem>>, %arg8: memref<16x32xf32, #tpu.memory_space<vmem>>) attributes {dimension_semantics = [#tpu.dimension_semantics<parallel>], iteration_bounds = array<i64: 1>, scalar_prefetch = 0 : i64, scratch_operands = 0 : i64, tpu.core_type = #tpu.core_type<tc>, window_params = [{transform_indices = @transform_0, window_bounds = array<i64: 16, 32>}, {pipeline_mode = #tpu.pipeline_mode<synchronous>, transform_indices = @transform_1, window_bounds = array<i64: 1, 32>}, {pipeline_mode = #tpu.pipeline_mode<synchronous>, transform_indices = @transform_2, window_bounds = array<i64: 1, 32>}, {pipeline_mode = #tpu.pipeline_mode<synchronous>, transform_indices = @transform_3, window_bounds = array<i64: 32, 64>}, {pipeline_mode = #tpu.pipeline_mode<synchronous>, transform_indices = @transform_4, window_bounds = array<i64: 1, 64>}, {pipeline_mode = #tpu.pipeline_mode<synchronous>, transform_indices = @transform_5, window_bounds = array<i64: 64, 32>}, {pipeline_mode = #tpu.pipeline_mode<synchronous>, transform_indices = @transform_6, window_bounds = array<i64: 1, 32>}, {transform_indices = @transform_7, window_bounds = array<i64: 16, 32>}]} {
    %c0 = arith.constant 0 : index
    %c0_0 = arith.constant 0 : index
    %0 = vector.load %arg1[%c0, %c0_0] : memref<16x32xf32, #tpu.memory_space<vmem>>, vector<16x32xf32>
    %cst = arith.constant dense<0.000000e+00> : vector<16xf32>
    %1 = vector.multi_reduction <add>, %0, %cst [1] : vector<16x32xf32> to vector<16xf32>
    %2 = vector.shape_cast %1 : vector<16xf32> to vector<16x1xf32>
    %cst_1 = arith.constant 3.200000e+01 : f32
    %3 = vector.broadcast %cst_1 : f32 to vector<16x1xf32>
    %4 = arith.divf %2, %3 : vector<16x1xf32>
    %5 = vector.broadcast %4 : vector<16x1xf32> to vector<16x32xf32>
    %6 = arith.subf %0, %5 : vector<16x32xf32>
    %7 = vector.broadcast %4 : vector<16x1xf32> to vector<16x32xf32>
    %8 = arith.subf %0, %7 : vector<16x32xf32>
    %9 = arith.mulf %6, %8 : vector<16x32xf32>
    %cst_2 = arith.constant dense<0.000000e+00> : vector<16xf32>
    %10 = vector.multi_reduction <add>, %9, %cst_2 [1] : vector<16x32xf32> to vector<16xf32>
    %11 = vector.shape_cast %10 : vector<16xf32> to vector<16x1xf32>
    %cst_3 = arith.constant 3.200000e+01 : f32
    %12 = vector.broadcast %cst_3 : f32 to vector<16x1xf32>
    %13 = arith.divf %11, %12 : vector<16x1xf32>
    %14 = vector.broadcast %4 : vector<16x1xf32> to vector<16x32xf32>
    %15 = arith.subf %0, %14 : vector<16x32xf32>
    %cst_4 = arith.constant 9.99999997E-7 : f32
    %16 = vector.broadcast %cst_4 : f32 to vector<16x1xf32>
    %17 = arith.addf %13, %16 : vector<16x1xf32>
    %18 = math.rsqrt %17 : vector<16x1xf32>
    %19 = vector.broadcast %18 : vector<16x1xf32> to vector<16x32xf32>
    %20 = arith.mulf %15, %19 : vector<16x32xf32>
    %c0_5 = arith.constant 0 : index
    %c0_6 = arith.constant 0 : index
    %21 = vector.load %arg2[%c0_5, %c0_6] : memref<1x32xf32, #tpu.memory_space<vmem>>, vector<1x32xf32>
    %22 = vector.broadcast %21 : vector<1x32xf32> to vector<16x32xf32>
    %23 = arith.mulf %20, %22 : vector<16x32xf32>
    %c0_7 = arith.constant 0 : index
    %c0_8 = arith.constant 0 : index
    %24 = vector.load %arg3[%c0_7, %c0_8] : memref<1x32xf32, #tpu.memory_space<vmem>>, vector<1x32xf32>
    %25 = vector.broadcast %24 : vector<1x32xf32> to vector<16x32xf32>
    %26 = arith.addf %23, %25 : vector<16x32xf32>
    %c0_9 = arith.constant 0 : index
    %c0_10 = arith.constant 0 : index
    %27 = vector.load %arg4[%c0_9, %c0_10] : memref<32x64xf32, #tpu.memory_space<vmem>>, vector<32x64xf32>
    %cst_11 = arith.constant dense<0.000000e+00> : vector<16x64xf32>
    %28 = tpu.matmul %26, %27, %cst_11 {dimension_numbers = #tpu.dot_dimension_numbers<[1], [0], [0], [1], [0, 0, 1, 1], [], []>} : vector<16x32xf32>, vector<32x64xf32>, vector<16x64xf32> -> vector<16x64xf32>
    %c0_12 = arith.constant 0 : index
    %c0_13 = arith.constant 0 : index
    %29 = vector.load %arg5[%c0_12, %c0_13] : memref<1x64xf32, #tpu.memory_space<vmem>>, vector<1x64xf32>
    %30 = vector.broadcast %29 : vector<1x64xf32> to vector<16x64xf32>
    %31 = arith.addf %28, %30 : vector<16x64xf32>
    %cst_14 = arith.constant 0.000000e+00 : f32
    %32 = vector.broadcast %cst_14 : f32 to vector<16x64xf32>
    %33 = arith.maximumf %31, %32 : vector<16x64xf32>
    %c0_15 = arith.constant 0 : index
    %c0_16 = arith.constant 0 : index
    %34 = vector.load %arg6[%c0_15, %c0_16] : memref<64x32xf32, #tpu.memory_space<vmem>>, vector<64x32xf32>
    %cst_17 = arith.constant dense<0.000000e+00> : vector<16x32xf32>
    %35 = tpu.matmul %33, %34, %cst_17 {dimension_numbers = #tpu.dot_dimension_numbers<[1], [0], [0], [1], [0, 0, 1, 1], [], []>} : vector<16x64xf32>, vector<64x32xf32>, vector<16x32xf32> -> vector<16x32xf32>
    %c0_18 = arith.constant 0 : index
    %c0_19 = arith.constant 0 : index
    %36 = vector.load %arg7[%c0_18, %c0_19] : memref<1x32xf32, #tpu.memory_space<vmem>>, vector<1x32xf32>
    %37 = vector.broadcast %36 : vector<1x32xf32> to vector<16x32xf32>
    %38 = arith.addf %35, %37 : vector<16x32xf32>
    %39 = arith.addf %0, %38 : vector<16x32xf32>
    %c0_20 = arith.constant 0 : index
    %c0_21 = arith.constant 0 : index
    %40 = vector.load %arg8[%c0_20, %c0_21] : memref<16x32xf32, #tpu.memory_space<vmem>>, vector<16x32xf32>
    tpu.vector_store %arg8[%c0_20, %c0_21], %39 {strides = array<i32>} : memref<16x32xf32, #tpu.memory_space<vmem>>, vector<16x32xf32>,
    return
  }
  func.func @transform_0(%arg0: i32) -> (i32, i32) {
    %c0_i32 = arith.constant 0 : i32
    %c0_i32_0 = arith.constant 0 : i32
    return %arg0, %c0_i32 : i32, i32
  }
  func.func @transform_1(%arg0: i32) -> (i32, i32) {
    %c0_i32 = arith.constant 0 : i32
    %c0_i32_0 = arith.constant 0 : i32
    %c0_i32_1 = arith.constant 0 : i32
    return %c0_i32, %c0_i32_0 : i32, i32
  }
  func.func @transform_2(%arg0: i32) -> (i32, i32) {
    %c0_i32 = arith.constant 0 : i32
    %c0_i32_0 = arith.constant 0 : i32
    %c0_i32_1 = arith.constant 0 : i32
    return %c0_i32, %c0_i32_0 : i32, i32
  }
  func.func @transform_3(%arg0: i32) -> (i32, i32) {
    %c0_i32 = arith.constant 0 : i32
    %c0_i32_0 = arith.constant 0 : i32
    %c0_i32_1 = arith.constant 0 : i32
    return %c0_i32, %c0_i32_0 : i32, i32
  }
  func.func @transform_4(%arg0: i32) -> (i32, i32) {
    %c0_i32 = arith.constant 0 : i32
    %c0_i32_0 = arith.constant 0 : i32
    %c0_i32_1 = arith.constant 0 : i32
    return %c0_i32, %c0_i32_0 : i32, i32
  }
  func.func @transform_5(%arg0: i32) -> (i32, i32) {
    %c0_i32 = arith.constant 0 : i32
    %c0_i32_0 = arith.constant 0 : i32
    %c0_i32_1 = arith.constant 0 : i32
    return %c0_i32, %c0_i32_0 : i32, i32
  }
  func.func @transform_6(%arg0: i32) -> (i32, i32) {
    %c0_i32 = arith.constant 0 : i32
    %c0_i32_0 = arith.constant 0 : i32
    %c0_i32_1 = arith.constant 0 : i32
    return %c0_i32, %c0_i32_0 : i32, i32
  }
  func.func @transform_7(%arg0: i32) -> (i32, i32) {
    %c0_i32 = arith.constant 0 : i32
    %c0_i32_0 = arith.constant 0 : i32
    return %arg0, %c0_i32 : i32, i32
  }
}

module attributes {stable_mosaic.version = 11 : i64} {
  func.func @_linear_kernel(%arg0: i32, %arg1: i32, %arg2: i32, %arg3: memref<16x32xf32, #tpu.memory_space<vmem>>, %arg4: memref<32x64xf32, #tpu.memory_space<vmem>>, %arg5: memref<1x64xf32, #tpu.memory_space<vmem>>, %arg6: memref<16x64xf32, #tpu.memory_space<vmem>>, %arg7: memref<16x64xf32, #tpu.memory_space<vmem>>) attributes {dimension_semantics = [#tpu.dimension_semantics<parallel>, #tpu.dimension_semantics<parallel>, #tpu.dimension_semantics<arbitrary>], iteration_bounds = array<i64: 1, 1, 1>, scalar_prefetch = 0 : i64, scratch_operands = 1 : i64, tpu.core_type = #tpu.core_type<tc>, window_params = [{transform_indices = @transform_0, window_bounds = array<i64: 16, 32>}, {transform_indices = @transform_1, window_bounds = array<i64: 32, 64>}, {transform_indices = @transform_2, window_bounds = array<i64: 1, 64>}, {transform_indices = @transform_3, window_bounds = array<i64: 16, 64>}]} {
    %c0_i32 = arith.constant 0 : i32
    %0 = arith.cmpi eq, %arg2, %c0_i32 : i32
    %1 = arith.extui %0 : i1 to i32
    %c0_i32_0 = arith.constant 0 : i32
    %2 = arith.cmpi ne, %1, %c0_i32_0 : i32
    scf.if %2 {
      %cst_10 = arith.constant 0.000000e+00 : f32
      %12 = vector.broadcast %cst_10 : f32 to vector<16x64xf32>
      %c0_11 = arith.constant 0 : index
      %c0_12 = arith.constant 0 : index
      %13 = vector.load %arg7[%c0_11, %c0_12] : memref<16x64xf32, #tpu.memory_space<vmem>>, vector<16x64xf32>
      tpu.vector_store %arg7[%c0_11, %c0_12], %12 {strides = array<i32>} : memref<16x64xf32, #tpu.memory_space<vmem>>, vector<16x64xf32>,
    } else {
    }
    %c0 = arith.constant 0 : index
    %c0_1 = arith.constant 0 : index
    %3 = vector.load %arg7[%c0, %c0_1] : memref<16x64xf32, #tpu.memory_space<vmem>>, vector<16x64xf32>
    %c0_2 = arith.constant 0 : index
    %c0_3 = arith.constant 0 : index
    %4 = vector.load %arg3[%c0_2, %c0_3] : memref<16x32xf32, #tpu.memory_space<vmem>>, vector<16x32xf32>
    %c0_4 = arith.constant 0 : index
    %c0_5 = arith.constant 0 : index
    %5 = vector.load %arg4[%c0_4, %c0_5] : memref<32x64xf32, #tpu.memory_space<vmem>>, vector<32x64xf32>
    %cst = arith.constant dense<0.000000e+00> : vector<16x64xf32>
    %6 = tpu.matmul %4, %5, %cst {dimension_numbers = #tpu.dot_dimension_numbers<[1], [0], [0], [1], [0, 0, 1, 1], [], []>} : vector<16x32xf32>, vector<32x64xf32>, vector<16x64xf32> -> vector<16x64xf32>
    %7 = arith.addf %3, %6 : vector<16x64xf32>
    %c0_6 = arith.constant 0 : index
    %c0_7 = arith.constant 0 : index
    %8 = vector.load %arg7[%c0_6, %c0_7] : memref<16x64xf32, #tpu.memory_space<vmem>>, vector<16x64xf32>
    tpu.vector_store %arg7[%c0_6, %c0_7], %7 {strides = array<i32>} : memref<16x64xf32, #tpu.memory_space<vmem>>, vector<16x64xf32>,
    %c0_i32_8 = arith.constant 0 : i32
    %9 = arith.cmpi eq, %arg2, %c0_i32_8 : i32
    %10 = arith.extui %9 : i1 to i32
    %c0_i32_9 = arith.constant 0 : i32
    %11 = arith.cmpi ne, %10, %c0_i32_9 : i32
    scf.if %11 {
      %c0_10 = arith.constant 0 : index
      %c0_11 = arith.constant 0 : index
      %12 = vector.load %arg7[%c0_10, %c0_11] : memref<16x64xf32, #tpu.memory_space<vmem>>, vector<16x64xf32>
      %c0_12 = arith.constant 0 : index
      %c0_13 = arith.constant 0 : index
      %13 = vector.load %arg5[%c0_12, %c0_13] : memref<1x64xf32, #tpu.memory_space<vmem>>, vector<1x64xf32>
      %14 = vector.broadcast %13 : vector<1x64xf32> to vector<16x64xf32>
      %15 = arith.addf %12, %14 : vector<16x64xf32>
      %c0_14 = arith.constant 0 : index
      %c0_15 = arith.constant 0 : index
      %16 = vector.load %arg6[%c0_14, %c0_15] : memref<16x64xf32, #tpu.memory_space<vmem>>, vector<16x64xf32>
      tpu.vector_store %arg6[%c0_14, %c0_15], %15 {strides = array<i32>} : memref<16x64xf32, #tpu.memory_space<vmem>>, vector<16x64xf32>,
    } else {
    }
    return
  }
  func.func @transform_0(%arg0: i32, %arg1: i32, %arg2: i32) -> (i32, i32) {
    %c0_i32 = arith.constant 0 : i32
    return %arg0, %arg2 : i32, i32
  }
  func.func @transform_1(%arg0: i32, %arg1: i32, %arg2: i32) -> (i32, i32) {
    %c0_i32 = arith.constant 0 : i32
    return %arg2, %arg1 : i32, i32
  }
  func.func @transform_2(%arg0: i32, %arg1: i32, %arg2: i32) -> (i32, i32) {
    %c0_i32 = arith.constant 0 : i32
    %c0_i32_0 = arith.constant 0 : i32
    return %c0_i32, %arg1 : i32, i32
  }
  func.func @transform_3(%arg0: i32, %arg1: i32, %arg2: i32) -> (i32, i32) {
    %c0_i32 = arith.constant 0 : i32
    return %arg0, %arg1 : i32, i32
  }
}

module attributes {stable_mosaic.version = 11 : i64} {
  func.func @_ce_kernel(%arg0: i32, %arg1: memref<16x64xf32, #tpu.memory_space<vmem>>, %arg2: memref<16x1xi32, #tpu.memory_space<vmem>>, %arg3: memref<1x1xf32, #tpu.memory_space<vmem>>) attributes {dimension_semantics = [#tpu.dimension_semantics<arbitrary>], iteration_bounds = array<i64: 1>, scalar_prefetch = 0 : i64, scratch_operands = 0 : i64, tpu.core_type = #tpu.core_type<tc>, window_params = [{transform_indices = @transform_0, window_bounds = array<i64: 16, 64>}, {transform_indices = @transform_1, window_bounds = array<i64: 16, 1>}, {pipeline_mode = #tpu.pipeline_mode<synchronous>, transform_indices = @transform_2, window_bounds = array<i64: 1, 1>}]} {
    %c0_i32 = arith.constant 0 : i32
    %0 = arith.cmpi eq, %arg0, %c0_i32 : i32
    %1 = arith.extui %0 : i1 to i32
    %c0_i32_0 = arith.constant 0 : i32
    %2 = arith.cmpi ne, %1, %c0_i32_0 : i32
    scf.if %2 {
      %cst_12 = arith.constant 0.000000e+00 : f32
      %30 = vector.broadcast %cst_12 : f32 to vector<1x1xf32>
      %c0_13 = arith.constant 0 : index
      %c0_14 = arith.constant 0 : index
      %31 = vector.load %arg3[%c0_13, %c0_14] : memref<1x1xf32, #tpu.memory_space<vmem>>, vector<1x1xf32>
      tpu.vector_store %arg3[%c0_13, %c0_14], %30 {strides = array<i32>} : memref<1x1xf32, #tpu.memory_space<vmem>>, vector<1x1xf32>,
    } else {
    }
    %c0 = arith.constant 0 : index
    %c0_1 = arith.constant 0 : index
    %3 = vector.load %arg1[%c0, %c0_1] : memref<16x64xf32, #tpu.memory_space<vmem>>, vector<16x64xf32>
    %c0_2 = arith.constant 0 : index
    %c0_3 = arith.constant 0 : index
    %4 = vector.load %arg2[%c0_2, %c0_3] : memref<16x1xi32, #tpu.memory_space<vmem>>, vector<16x1xi32>
    %cst = arith.constant dense<0xFF800000> : vector<16xf32>
    %5 = vector.multi_reduction <maximumf>, %3, %cst [1] : vector<16x64xf32> to vector<16xf32>
    %6 = vector.shape_cast %5 : vector<16xf32> to vector<16x1xf32>
    %7 = vector.broadcast %6 : vector<16x1xf32> to vector<16x64xf32>
    %8 = arith.subf %3, %7 : vector<16x64xf32>
    %9 = math.exp %8 : vector<16x64xf32>
    %cst_4 = arith.constant dense<0.000000e+00> : vector<16xf32>
    %10 = vector.multi_reduction <add>, %9, %cst_4 [1] : vector<16x64xf32> to vector<16xf32>
    %11 = vector.shape_cast %10 : vector<16xf32> to vector<16x1xf32>
    %12 = math.log %11 : vector<16x1xf32>
    %13 = arith.addf %12, %6 : vector<16x1xf32>
    %14 = tpu.iota {dimensions = array<i32: 1>} : vector<16x64xi32>
    %15 = vector.broadcast %4 : vector<16x1xi32> to vector<16x64xi32>
    %16 = arith.cmpi eq, %14, %15 : vector<16x64xi32>
    %cst_5 = arith.constant 0.000000e+00 : f32
    %17 = vector.broadcast %cst_5 : f32 to vector<16x64xf32>
    %18 = arith.select %16, %3, %17 : vector<16x64xi1>, vector<16x64xf32>
    %cst_6 = arith.constant dense<0.000000e+00> : vector<16xf32>
    %19 = vector.multi_reduction <add>, %18, %cst_6 [1] : vector<16x64xf32> to vector<16xf32>
    %20 = vector.shape_cast %19 : vector<16xf32> to vector<16x1xf32>
    %c0_7 = arith.constant 0 : index
    %c0_8 = arith.constant 0 : index
    %21 = vector.load %arg3[%c0_7, %c0_8] : memref<1x1xf32, #tpu.memory_space<vmem>>, vector<1x1xf32>
    %22 = arith.subf %13, %20 : vector<16x1xf32>
    %23 = vector.shape_cast %22 : vector<16x1xf32> to vector<1x16x1xf32>
    %cst_9 = arith.constant dense<0.000000e+00> : vector<1xf32>
    %24 = vector.multi_reduction <add>, %23, %cst_9 [1, 2] : vector<1x16x1xf32> to vector<1xf32>
    %25 = vector.shape_cast %24 : vector<1xf32> to vector<1x1x1xf32>
    %26 = vector.extract %25[0, 0, 0] : f32 from vector<1x1x1xf32>
    %27 = vector.broadcast %26 : f32 to vector<1x1xf32>
    %28 = arith.addf %21, %27 : vector<1x1xf32>
    %c0_10 = arith.constant 0 : index
    %c0_11 = arith.constant 0 : index
    %29 = vector.load %arg3[%c0_10, %c0_11] : memref<1x1xf32, #tpu.memory_space<vmem>>, vector<1x1xf32>
    tpu.vector_store %arg3[%c0_10, %c0_11], %28 {strides = array<i32>} : memref<1x1xf32, #tpu.memory_space<vmem>>, vector<1x1xf32>,
    return
  }
  func.func @transform_0(%arg0: i32) -> (i32, i32) {
    %c0_i32 = arith.constant 0 : i32
    %c0_i32_0 = arith.constant 0 : i32
    return %arg0, %c0_i32 : i32, i32
  }
  func.func @transform_1(%arg0: i32) -> (i32, i32) {
    %c0_i32 = arith.constant 0 : i32
    %c0_i32_0 = arith.constant 0 : i32
    return %arg0, %c0_i32 : i32, i32
  }
  func.func @transform_2(%arg0: i32) -> (i32, i32) {
    %c0_i32 = arith.constant 0 : i32
    %c0_i32_0 = arith.constant 0 : i32
    %c0_i32_1 = arith.constant 0 : i32
    return %c0_i32, %c0_i32_0 : i32, i32
  }
}

</mosaic_0001>

<bundles_post_ra>
// kernel: scratch_model_forward.28
= control target key start
LH: loop header
LB: loop body
LE: loop exit
PB: predicated region body
PF: predicated region fallthrough
CT: control target
= control target key end

     0   :  { %9 = vsyncpa [#allocation4], 0  ;;  %s141_s18 = smov [#allocation3]   ;;  %s142_s20 = smov 128   ;;  %s202_s0 = inlined_call_operand.vmem [shape: f32[16,32], index: 0, kind: input, shape index: {}]   ;;  %s203_s1 = inlined_call_operand.hbm [shape: f32[32,32], index: 1, kind: input, shape index: {}]   ;;  %s204_s2 = inlined_call_operand.vmem [shape: f32[1,32], index: 2, kind: input, shape index: {}]   ;;  %s205_s3 = inlined_call_operand.vmem [shape: f32[16,32], index: 3, kind: input, shape index: {}]   ;;  %s206_s4 = inlined_call_operand.vmem [shape: f32[16,32], index: 4, kind: output, shape index: {}]  }
   0x1   :  { %s16_s17 = sshll.u32 %s203_s1, 4  ;;  %s18_s19 = sshll.u32 %s141_s18, 4  ;;  %s17_s17 = int_to_ptr.hbm [resolvable:$true] %s16_s17  ;;  %s19_s19 = int_to_ptr.vmem [resolvable:$true] %s18_s19 }
   0x2   :  { %s143_s21 = smov 8  }
   0x3   :  { %24 = dma.hbm_to_vmem [thread:$0]  %s17_s17, 512, %s19_s19, [#allocation4], %s142_s20, %s142_s20, %s143_s21  }
   0x4   :  { %139 = dma.done.wait [#allocation4], 512  }
   0x5   :  { %140 = vsyncadd [#allocation4], 4294966784  ;;  %vm37_vm0 = vcmask 261120   ;;  %v144_v0 = vmov 0.0   ;;  %v47_v1 = vld [vmem:[#allocation3 + $0x18] sm:$0xff]  ;;  %v46_v2 = vld [vmem:[#allocation3 + $0x10] sm:$0xff] }
   0x6   :  { %38 = vst.msk [vmem:[#allocation2] sm:$0xff] %vm37_vm0, %v144_v0  ;;  %67 = vmatpush.msra.mxu0 %v47_v1  ;;  %106 = vmatpush.msra.mxu1 %v47_v1  ;;  %v45_v3 = vld [vmem:[#allocation3 + $0x8] sm:$0xff]  ;;  %v44_v4 = vld [vmem:[#allocation3] sm:$0xff]  ;;  %v42_v5 = vld [vmem:[%s202_s0] sm:$0xff] }
   0x7   :  { %39 = vst.msk [vmem:[#allocation2 + $0x8] sm:$0xff] %vm37_vm0, %v144_v0  ;;  %v43_v6 = vld [vmem:[%s202_s0 + $0x8] sm:$0xff]  ;;  %v114_v13 = vld [vmem:[%s204_s2] ss:$0 sm:$0xff] }
   0x8   :  { %68 = vmatpush.msra.mxu0 %v46_v2  ;;  %107 = vmatpush.msra.mxu1 %v46_v2  ;;  %v93_v15 = vld [vmem:[%s205_s3] sm:$0xff]  ;;  %v94_v18 = vld [vmem:[%s205_s3 + $0x8] sm:$0xff] }
   0xa   :  { %69 = vmatpush.msra.mxu0 %v45_v3  ;;  %108 = vmatpush.msra.mxu1 %v45_v3 }
   0xc   :  { %70 = vmatpush.msra.mxu0 %v44_v4  ;;  %109 = vmatpush.msra.mxu1 %v44_v4 }
   0xd   :  { %104 = vmatmul.msk.f32.vlgmr.msra.gmra.mxu0 %vm37_vm0, %v42_v5  ;;  %105 = vmatmul.msk.f32.vlgmr.msra.gmra.mxu1 %vm37_vm0, %v43_v6  ;;  %v40_v7 = vld [vmem:[#allocation2] sm:$0xff] }
   0xe   :  { %v41_v8 = vld [vmem:[#allocation2 + $0x8] sm:$0xff] }
  0x8a   :  { %v72_v9 = vpop.f32.mrf.mxu0  ;;  %v75_v10 = vpop.f32.mrf.mxu1 }
  0x8b   :  { %v78_v11 = vadd.f32 %v72_v9, %v40_v7  ;;  %v79_v12 = vadd.f32 %v75_v10, %v41_v8 }
  0x8d   :  { %80 = vst.msk [vmem:[#allocation2] sm:$0xff] %vm37_vm0, %v78_v11 }
  0x8e   :  { %81 = vst.msk [vmem:[#allocation2 + $0x8] sm:$0xff] %vm37_vm0, %v79_v12 }
  0x94   :  { %v85_v14 = vld [vmem:[#allocation2] sm:$0xff] }
  0x95   :  { %v91_v16 = vadd.f32 %v114_v13, %v85_v14  ;;  %v86_v17 = vld [vmem:[#allocation2 + $0x8] sm:$0xff] }
  0x96   :  { %v92_v19 = vadd.f32 %v114_v13, %v86_v17 }
  0x97   :  { %v95_v20 = vadd.f32 %v93_v15, %v91_v16 }
  0x98   :  { %v96_v21 = vadd.f32 %v94_v18, %v92_v19 }
  0x99   :  { %97 = vst.msk [vmem:[%s206_s4] sm:$0xff] %vm37_vm0, %v95_v20 }
  0x9a   :  { %98 = vst.msk [vmem:[%s206_s4 + $0x8] sm:$0xff] %vm37_vm0, %v96_v21 }
  0x9b   :  { %103 = vsyncpa [#allocation4], 1 }

// kernel: scratch_model_forward.26
= control target key start
LH: loop header
LB: loop body
LE: loop exit
PB: predicated region body
PF: predicated region fallthrough
CT: control target
= control target key end

     0   :  { %vm22_vm0 = vcmask 261120   ;;  %v146_v4 = vmov 32.0   ;;  %vm123_vm8 = vcmask 785408   ;;  %s216_s0 = inlined_call_operand.vmem [shape: f32[16,32], index: 0, kind: input, shape index: {}]   ;;  %s217_s1 = inlined_call_operand.vmem [shape: f32[1,32], index: 1, kind: input, shape index: {}]   ;;  %s218_s2 = inlined_call_operand.vmem [shape: f32[1,32], index: 2, kind: input, shape index: {}]   ;;  %s219_s4 = inlined_call_operand.vmem [shape: f32[1,96], index: 4, kind: input, shape index: {}]   ;;  %s220_s3 = inlined_call_operand.vmem [shape: f32[32,96], index: 3, kind: input, shape index: {}]   ;;  %s221_s5 = inlined_call_operand.vmem [shape: f32[16,96], index: 5, kind: output, shape index: {}]  }
   0x1   :  { %v20_v0 = vld [vmem:[%s216_s0] sm:$0xff]  ;;  %v21_v2 = vld [vmem:[%s216_s0 + $0x8] sm:$0xff]  ;;  %140 = vrcp.f32 %v146_v4  ;;  %v89_v21 = vld [vmem:[%s220_s3 + $0x18] sm:$0xff] }
   0x2   :  { %v23_v1 = vsel %vm22_vm0, %v20_v0, 0.0  ;;  %v26_v3 = vsel %vm22_vm0, %v21_v2, 0.0  ;;  %112 = vmatpush.msra.mxu0 %v89_v21  ;;  %132 = vmatpush.msra.mxu1 %v89_v21  ;;  %v88_v22 = vld [vmem:[%s220_s3 + $0x10] sm:$0xff]  ;;  %v87_v23 = vld [vmem:[%s220_s3 + $0x8] sm:$0xff]  ;;  %v86_v24 = vld [vmem:[%s220_s3] sm:$0xff] }
   0x3   :  { %24 = vadd.xlane.f32.xlu0 %v23_v1  ;;  %v137_v39 = vld [vmem:[%s217_s1] ss:$0 sm:$0xff] }
   0x4   :  { %113 = vmatpush.msra.mxu0 %v88_v22  ;;  %133 = vmatpush.msra.mxu1 %v88_v22  ;;  %v138_v43 = vld [vmem:[%s218_s2] ss:$0 sm:$0xff] }
   0x5   :  { %v139_v53 = vld [vmem:[%s219_s4] ss:$0 sm:$0xff] }
   0x6   :  { %114 = vmatpush.msra.mxu0 %v87_v23  ;;  %134 = vmatpush.msra.mxu1 %v87_v23 }
   0x7   :  { %v141_v5 = vpop.eup %140 }
   0x8   :  { %v30_v6 = vmul.f32 32.0, %v141_v5  ;;  %vm34_vm1 = vweird.f32 %v141_v5  ;;  %115 = vmatpush.msra.mxu0 %v86_v24  ;;  %135 = vmatpush.msra.mxu1 %v86_v24 }
   0xa   :  { %v31_v7 = vsub.f32 1.0, %v30_v6 }
   0xb   :  { %27 = vadd.xlane.f32.xlu0 %v26_v3 }
   0xc   :  { %v32_v8 = vmul.f32 %v141_v5, %v31_v7 }
   0xe   :  { %v33_v9 = vadd.f32 %v141_v5, %v32_v8 }
  0x10   :  { %v35_v10 = vsel %vm34_vm1, %v141_v5, %v33_v9 }
  0x76   :  { %v25_v11 = vpop.xlane.xlu0 %24 }
  0x77   :  { %v36_v12 = vmul.f32 %v35_v10, %v25_v11 }
  0x79   :  { %v38_v13 = vsub.f32 %v20_v0, %v36_v12 }
  0x7b   :  { %v40_v14 = vmul.f32 %v38_v13, %v38_v13 }
  0x7d   :  { %v42_v15 = vsel %vm22_vm0, %v40_v14, 0.0 }
  0x7e   :  { %43 = vadd.xlane.f32.xlu1 %v42_v15  ;;  %v28_v16 = vpop.xlane.xlu0 %27 }
  0x7f   :  { %v37_v17 = vmul.f32 %v35_v10, %v28_v16 }
  0x81   :  { %v39_v18 = vsub.f32 %v21_v2, %v37_v17 }
  0x83   :  { %v41_v19 = vmul.f32 %v39_v18, %v39_v18 }
  0x85   :  { %v45_v20 = vsel %vm22_vm0, %v41_v19, 0.0 }
  0x86   :  { %46 = vadd.xlane.f32.xlu1 %v45_v20 }
  0xf1   :  { %v44_v25 = vpop.xlane.xlu1 %43 }
  0xf2   :  { %v48_v26 = vmul.f32 %v44_v25, %v35_v10 }
  0xf4   :  { %v50_v27 = vadd.f32 1e-06, %v48_v26 }
  0xf6   :  { %142 = vrsqrt.f32 %v50_v27  ;;  %vm58_vm3 = vweird.f32 %v50_v27 }
  0xf9   :  { %v47_v28 = vpop.xlane.xlu1 %46 }
  0xfa   :  { %v49_v29 = vmul.f32 %v47_v28, %v35_v10 }
  0xfc   :  { %v143_v30 = vpop.eup %142  ;;  %v51_v31 = vadd.f32 1e-06, %v49_v29 }
  0xfd   :  { %v53_v32 = vmul.f32 %v143_v30, %v50_v27  ;;  %vm59_vm2 = vweird.f32 %v143_v30 }
  0xfe   :  { %144 = vrsqrt.f32 %v51_v31  ;;  %vm60_vm4 = vmor %vm58_vm3, %vm59_vm2  ;;  %vm68_vm6 = vweird.f32 %v51_v31 }
  0xff   :  { %v54_v33 = vmul.f32 %v143_v30, %v53_v32 }
 0x101   :  { %v55_v34 = vmul.f32 0.5, %v54_v33 }
 0x103   :  { %v56_v35 = vsub.f32 1.5, %v55_v34 }
 0x104   :  { %v145_v36 = vpop.eup %144 }
 0x105   :  { %v57_v37 = vmul.f32 %v143_v30, %v56_v35  ;;  %v63_v38 = vmul.f32 %v145_v36, %v51_v31  ;;  %vm69_vm5 = vweird.f32 %v145_v36 }
 0x106   :  { %vm70_vm7 = vmor %vm68_vm6, %vm69_vm5 }
 0x107   :  { %v61_v40 = vsel %vm60_vm4, %v143_v30, %v57_v37  ;;  %v64_v41 = vmul.f32 %v145_v36, %v63_v38 }
 0x108   :  { %v72_v42 = vmul.f32 %v61_v40, %v38_v13 }
 0x109   :  { %v65_v44 = vmul.f32 0.5, %v64_v41 }
 0x10a   :  { %v78_v45 = vmul.f32 %v137_v39, %v72_v42 }
 0x10b   :  { %v66_v46 = vsub.f32 1.5, %v65_v44 }
 0x10c   :  { %v84_v47 = vadd.f32 %v138_v43, %v78_v45 }
 0x10d   :  { %v67_v48 = vmul.f32 %v145_v36, %v66_v46 }
 0x10e   :  { %130 = vmatmul.msk.f32.vlgmr.msra.gmra.mxu0 %vm22_vm0, %v84_v47 }
 0x10f   :  { %v71_v49 = vsel %vm70_vm7, %v145_v36, %v67_v48 }
 0x110   :  { %v73_v50 = vmul.f32 %v71_v49, %v39_v18 }
 0x112   :  { %v79_v51 = vmul.f32 %v137_v39, %v73_v50 }
 0x114   :  { %v85_v52 = vadd.f32 %v138_v43, %v79_v51 }
 0x116   :  { %131 = vmatmul.msk.f32.vlgmr.msra.gmra.mxu1 %vm22_vm0, %v85_v52 }
 0x18b   :  { %v117_v54 = vpop.f32.mrf.mxu0 }
 0x18c   :  { %v118_v55 = vadd.f32 %v139_v53, %v117_v54 }
 0x18e   :  { %124 = vst.msk [vmem:[%s221_s5] sm:$0xff] %vm123_vm8, %v118_v55 }
 0x193   :  { %v120_v56 = vpop.f32.mrf.mxu1 }
 0x194   :  { %v121_v57 = vadd.f32 %v139_v53, %v120_v56 }
 0x196   :  { %125 = vst.msk [vmem:[%s221_s5 + $0x8] sm:$0xff] %vm123_vm8, %v121_v57 }

// kernel: scratch_model_forward.27
= control target key start
LH: loop header
LB: loop body
LE: loop exit
PB: predicated region body
PF: predicated region fallthrough
CT: control target
= control target key end

     0   :  { %s606_s9 = smov 0   ;;  %s684_s0 = inlined_call_operand.vmem [shape: f32[2,8,96], index: 0, kind: input, shape index: {}]   ;;  %s685_s1 = inlined_call_operand.vmem [shape: f32[2,1,8], index: 1, kind: input, shape index: {}]   ;;  %s686_s2 = inlined_call_operand.vmem [shape: f32[2,8,32], index: 2, kind: output, shape index: {}]  }
   0x1 LB: > { %s508_s10 = sadd.s32 4294967295, %s574_s9   ;;  %p512_p0 = scmp.ge.s32.totalorder %s574_s9, 1  ;;  %s574_s9 = sphi %s606_s9, %s12_s9  }
   0x2   : > { %p119_p1 = scmp.lt.s32.totalorder %s574_s9, 3 }
   0x4   : > { %p120_p2 = pnand %p512_p0, %p119_p1 }
   0x5   : > { %p142_p3 = scmp.lt.s32.totalorder (!%p120_p2), %s508_s10, 1  ;;  %s576_s15 = smov (!%p120_p2), 96  }
   0x6   : > { %123 = sbr.rel (%p120_p2) target bundleno = 1176 (0x498), region = 28  ;;  %s577_s16 = smov (!%p120_p2), 88  }
   0x7   : > { %s578_s17 = smov (!%p120_p2), 120   ;;  %s580_s21 = smov (!%p120_p2), 64  }
   0x8   : > { %s581_s22 = smov (!%p120_p2), 80   ;;  %s582_s23 = smov (!%p120_p2), 72  }
   0x9   : > { %s583_s24 = smov (!%p120_p2), 112   ;;  %s584_s25 = smov (!%p120_p2), 104  }
   0xa   : > { %s585_s26 = smov (!%p120_p2), 48   ;;  %s586_s27 = smov (!%p120_p2), 56  }
   0xb   : > { %s690_s10 = smov (!%p142_p3, %s508_s10), 1  ;;  %vm159_vm0 = vcmask 64512   ;;  %v579_v5 = vmov 0   ;;  %s587_s28 = smov 40   ;;  %vm440_vm3 = vcmask 130048   ;;  %vm442_vm4 = vcmask 195584  }
   0xc   : > { %s513_s11 = sshll.u32 %s690_s10, 3  ;;  %s148_s20 = scalar_lea.vmem %s685_s1, %s690_s10  ;;  %vm444_vm5 = vcmask 261120  }
   0xd   : > { %s145_s14 = scalar_lea.vmem %s684_s0, %s513_s11  ;;  %v154_v4 = vld [vmem:[%s148_s20] sm:$0x1]  ;;  %s588_s29 = smov 24  }
   0xe   : > { %v622_v0 = vld [vmem:[%s145_s14] sm:$0xff]  ;;  %vm155_vm1 = vcmp.gt.f32.partialorder %v154_v4, 0.0  ;;  %s589_s30 = smov 8   ;;  %s590_s3 = smov 16  }
   0xf   : > { %157 = vrot.lane.b32.xlu0 %v622_v0, %s576_s15  ;;  %228 = vrot.lane.b32.xlu1 %v622_v0, %s577_s16  ;;  %v185_v6 = vsel %vm155_vm1, 1, %v579_v5  ;;  %s152_s6 = scalar_lea.vmem %s686_s2, %s513_s11 }
  0x10   : > { %226 = vrot.lane.b32.xlu2 %v622_v0, %s578_s17  ;;  %v186_v7 = vperm.slane %v185_v6, 0 }
  0x12   : > { %vm636_vm2 = vcmp.eq.s32.totalorder %v186_v7, 1 }
  0x18   : > { %200 = vrot.lane.b32.xlu2 %v622_v0, %s580_s21 }
  0x20   : > { %295 = vrot.lane.b32.xlu2 %v622_v0, %s581_s22 }
  0x28   : > { %362 = vrot.lane.b32.xlu2 %v622_v0, %s582_s23 }
  0x30   : > { %293 = vrot.lane.b32.xlu2 %v622_v0, %s583_s24 }
  0x6a   : > { %v227_v3 = vpop.permute.xlu2 %226 }
  0x72   : > { %v201_v16 = vpop.permute.xlu2 %200 }
  0x73   : > { %221 = vmatpush.msra.mxu1 %v201_v16 }
  0x7a   : > { %v296_v21 = vpop.permute.xlu2 %295 }
  0x7b   : > { %521 = vmatpush.xpose.msk.msrb.mxu1 %vm159_vm0, %v296_v21 }
  0x81   : > { %v158_v1 = vpop.permute.xlu0 %157  ;;  %v229_v2 = vpop.permute.xlu1 %228 }
  0x82   : > { %515 = vmatpush.xpose.msk.msra.mxu0 %vm159_vm0, %v158_v1  ;;  %518 = vmatpush.xpose.msk.msra.mxu2 %vm159_vm0, %v229_v2  ;;  %v363_v24 = vpop.permute.xlu2 %362 }
  0x85   : > { %516 = vmatmul.msk.f32.vlgmr.msra.gmra.mxu0 %vm159_vm0, %v622_v0  ;;  %519 = vmatmul.msk.f32.vlgmr.msra.gmra.mxu2 %vm159_vm0, %v227_v3 }
  0x86   : > { %524 = vmatpush.xpose.msk.msrb.mxu0 %vm159_vm0, %v363_v24 }
  0x8a   : > { %v294_v28 = vpop.permute.xlu2 %293 }
 0x102   : > { %v181_v8 = vpop.f32.mrf.mxu0 }
 0x103   : > { %v184_v10 = vmul.f32 0.35355338, %v181_v8 }
 0x105   : > { %v188_v11 = vsel %vm636_vm2, %v184_v10, -1e+09 }
 0x106   : > { %v189_v12 = vsel %vm159_vm0, %v188_v11, -inf }
 0x107   : > { %190 = vmax.xlane.f32.xlu0 %v189_v12 }
 0x108   : > { %v251_v19 = vpop.f32.mrf.mxu2 }
 0x109   : > { %v254_v20 = vmul.f32 0.35355338, %v251_v19 }
 0x10b   : > { %v255_v22 = vsel %vm636_vm2, %v254_v20, -1e+09 }
 0x10c   : > { %v256_v23 = vsel %vm159_vm0, %v255_v22, -inf }
 0x10d   : > { %257 = vmax.xlane.f32.xlu2 %v256_v23 }
 0x17a   : > { %v191_v13 = vpop.xlane.xlu0 %190 }
 0x17b   : > { %v192_v14 = vsub.f32 %v188_v11, %v191_v13 }
 0x17d   : > { %v193_v15 = vmul.f32 1.442695, %v192_v14 }
 0x17f   : > { %552 = vpow2.f32 %v193_v15 }
 0x180   : > { %v258_v31 = vpop.xlane.xlu2 %257 }
 0x181   : > { %v259_v34 = vsub.f32 %v255_v22, %v258_v31 }
 0x183   : > { %v260_v37 = vmul.f32 1.442695, %v259_v34 }
 0x185   : > { %v553_v17 = vpop.eup %552 }
 0x186   : > { %v195_v18 = vsel %vm159_vm0, %v553_v17, 0.0 }
 0x187   : > { %196 = vadd.xlane.f32.xlu1 %v195_v18 }
 0x1a0   : > { %360 = vrot.lane.b32.xlu1 %v622_v0, %s584_s25 }
 0x1fa   : > { %v197_v25 = vpop.xlane.xlu1 %196 }
 0x1fb   : > { %554 = vrcp.f32 %v197_v25 }
 0x1fc   : > { %556 = vpow2.f32 %v260_v37 }
 0x201   : > { %v555_v26 = vpop.eup %554 }
 0x202   : > { %v199_v27 = vmul.f32 %v555_v26, %v553_v17  ;;  %v557_v42 = vpop.eup %556 }
 0x203   : > { %v262_v43 = vsel %vm159_vm0, %v557_v42, 0.0 }
 0x204   : > { %517 = vmatmul.msk.f32.vlgmr.msra.gmra.mxu1 %vm159_vm0, %v199_v27 }
 0x20c   : > { %522 = vmatmul.msk.f32.vlgmr.msrb.gmra.mxu1 %vm159_vm0, %v294_v28 }
 0x212   : > { %v361_v29 = vpop.permute.xlu1 %360 }
 0x213   : > { %525 = vmatmul.msk.f32.vlgmr.msrb.gmra.mxu0 %vm159_vm0, %v361_v29 }
 0x281   : > { %v657_v30 = vpop.f32.mrf.mxu1 }
 0x289   : > { %v318_v32 = vpop.f32.mrf.mxu1 }
 0x28a   : > { %v321_v33 = vmul.f32 0.35355338, %v318_v32 }
 0x28c   : > { %v322_v35 = vsel %vm636_vm2, %v321_v33, -1e+09 }
 0x28d   : > { %v323_v36 = vsel %vm159_vm0, %v322_v35, -inf }
 0x28e   : > { %324 = vmax.xlane.f32.xlu1 %v323_v36 }
 0x290   : > { %v385_v38 = vpop.f32.mrf.mxu0 }
 0x291   : > { %v388_v39 = vmul.f32 0.35355338, %v385_v38 }
 0x293   : > { %v389_v40 = vsel %vm636_vm2, %v388_v39, -1e+09 }
 0x294   : > { %v390_v41 = vsel %vm159_vm0, %v389_v40, -inf }
 0x295   : > { %391 = vmax.xlane.f32.xlu0 %v390_v41 }
 0x29d   : > { %263 = vadd.xlane.f32.xlu0 %v262_v43 }
 0x2a7   : > { %334 = vrot.lane.b32.xlu1 %v622_v0, %s585_s26 }
 0x301   : > { %v325_v44 = vpop.xlane.xlu1 %324 }
 0x302   : > { %v326_v45 = vsub.f32 %v322_v35, %v325_v44 }
 0x304   : > { %v327_v46 = vmul.f32 1.442695, %v326_v45 }
 0x306   : > { %558 = vpow2.f32 %v327_v46 }
 0x308   : > { %v392_v47 = vpop.xlane.xlu0 %391 }
 0x309   : > { %v393_v48 = vsub.f32 %v389_v40, %v392_v47 }
 0x30b   : > { %v394_v49 = vmul.f32 1.442695, %v393_v48 }
 0x30c   : > { %v559_v50 = vpop.eup %558 }
 0x30d   : > { %560 = vpow2.f32 %v394_v49  ;;  %v329_v51 = vsel %vm159_vm0, %v559_v50, 0.0 }
 0x30e   : > { %330 = vadd.xlane.f32.xlu0 %v329_v51 }
 0x310   : > { %v264_v54 = vpop.xlane.xlu0 %263 }
 0x313   : > { %v561_v52 = vpop.eup %560 }
 0x314   : > { %v396_v53 = vsel %vm159_vm0, %v561_v52, 0.0 }
 0x315   : > { %397 = vadd.xlane.f32.xlu2 %v396_v53 }
 0x319   : > { %v335_v62 = vpop.permute.xlu1 %334 }
 0x322   : > { %267 = vrot.lane.b32.xlu0 %v622_v0, %s586_s27 }
 0x32d   : > { %401 = vrot.lane.b32.xlu2 %v622_v0, %s587_s28 }
 0x381   : > { %v331_v56 = vpop.xlane.xlu0 %330 }
 0x388   : > { %v398_v55 = vpop.xlane.xlu2 %397 }
 0x389   : > { %562 = vrcp.f32 %v398_v55 }
 0x38a   : > { %564 = vrcp.f32 %v264_v54 }
 0x38b   : > { %566 = vrcp.f32 %v331_v56 }
 0x38f   : > { %v563_v57 = vpop.eup %562 }
 0x390   : > { %v402_v58 = vpop.permute.xlu2 %401  ;;  %v400_v59 = vmul.f32 %v563_v57, %v561_v52  ;;  %v565_v60 = vpop.eup %564 }
 0x391   : > { %422 = vmatpush.msrb.mxu2 %v402_v58  ;;  %v266_v63 = vmul.f32 %v565_v60, %v557_v42  ;;  %v567_v0 = vpop.eup %566 }
 0x392   : > { %526 = vmatmul.msk.f32.vlgmr.msrb.gmra.mxu2 %vm159_vm0, %v400_v59  ;;  %v333_v1 = vmul.f32 %v567_v0, %v559_v50 }
 0x394   : > { %v268_v61 = vpop.permute.xlu0 %267 }
 0x395   : > { %288 = vmatpush.msra.mxu3 %v268_v61 }
 0x396   : > { %520 = vmatmul.msk.f32.vlgmr.msra.gmra.mxu3 %vm159_vm0, %v266_v63 }
 0x397   : > { %355 = vmatpush.msrb.mxu3 %v335_v62 }
 0x39e   : > { %523 = vmatmul.msk.f32.vlgmr.msrb.gmra.mxu3 %vm159_vm0, %v333_v1 }
 0x415   : > { %v424_v2 = vpop.f32.mrf.mxu2 }
 0x416   : > { %436 = vrot.lane.b32.xlu1 %v424_v2, %s588_s29 }
 0x419   : > { %v290_v3 = vpop.f32.mrf.mxu3 }
 0x41a   : > { %428 = vrot.lane.b32.xlu0 %v290_v3, %s589_s30 }
 0x421   : > { %v357_v4 = vpop.f32.mrf.mxu3 }
 0x422   : > { %432 = vrot.lane.b32.xlu0 %v357_v4, %s590_s3 }
 0x488   : > { %v437_v8 = vpop.permute.xlu1 %436 }
 0x48c   : > { %v429_v5 = vpop.permute.xlu0 %428 }
 0x48d   : > { %v439_v6 = vsel %vm159_vm0, %v657_v30, %v429_v5 }
 0x494   : > { %v433_v7 = vpop.permute.xlu0 %432 }
 0x495   : > { %v441_v9 = vsel %vm440_vm3, %v439_v6, %v433_v7 }
 0x496   : > { %v443_v10 = vsel %vm442_vm4, %v441_v9, %v437_v8 }
 0x497   : > { %445 = vst.msk [vmem:[%s152_s6] sm:$0xff] %vm444_vm5, %v443_v10 }
 0x498 PF: > { %s12_s9 = sadd.s32 1, %s574_s9  }
 0x499   : > { %p9_p4 = scmp.ge.s32.totalorder %s12_s9, 4  }
 0x49b   :  { %11 = sbr.rel (!%p9_p4) target bundleno = 1 (0x1), region = 61 }

// kernel: scratch_model_forward.29
= control target key start
LH: loop header
LB: loop body
LE: loop exit
PB: predicated region body
PF: predicated region fallthrough
CT: control target
= control target key end

     0   :  { %12 = vsyncpa [#allocation3], 0  ;;  %s254_s27 = smov [#allocation2]   ;;  %s255_s29 = smov 128   ;;  %s372_s0 = inlined_call_operand.vmem [shape: f32[16,32], index: 0, kind: input, shape index: {}]   ;;  %s373_s1 = inlined_call_operand.vmem [shape: f32[1,32], index: 1, kind: input, shape index: {}]   ;;  %s374_s2 = inlined_call_operand.vmem [shape: f32[1,32], index: 2, kind: input, shape index: {}, may-alias: {2,6}]   ;;  %s375_s3 = inlined_call_operand.hbm [shape: f32[32,64], index: 3, kind: input, shape index: {}]   ;;  %s376_s4 = inlined_call_operand.vmem [shape: f32[1,64], index: 4, kind: input, shape index: {}]   ;;  %s377_s5 = inlined_call_operand.vmem [shape: f32[64,32], index: 5, kind: input, shape index: {}]   ;;  %s378_s6 = inlined_call_operand.vmem [shape: f32[1,32], index: 6, kind: input, shape index: {}, may-alias: {2,6}]   ;;  %s379_s7 = inlined_call_operand.vmem [shape: f32[16,32], index: 7, kind: output, shape index: {}]  }
   0x1   :  { %s23_s26 = sshll.u32 %s375_s3, 4  ;;  %s25_s28 = sshll.u32 %s254_s27, 4  ;;  %s24_s26 = int_to_ptr.hbm [resolvable:$true] %s23_s26  ;;  %s26_s28 = int_to_ptr.vmem [resolvable:$true] %s25_s28 }
   0x2   :  { %s256_s30 = smov 8  }
   0x3   :  { %31 = dma.hbm_to_vmem [thread:$0]  %s24_s26, 512, %s26_s28, [#allocation3], %s255_s29, %s255_s29, %s256_s30  }
   0x4   :  { %252 = dma.done.wait [#allocation3], 512  }
   0x5   :  { %253 = vsyncadd [#allocation3], 4294966784  ;;  %vm44_vm0 = vcmask 261120   ;;  %v304_v0 = vld [vmem:[%s372_s0 + $0x8] sm:$0xff]  ;;  %v311_v2 = vld [vmem:[%s372_s0] sm:$0xff]  ;;  %v257_v4 = vmov 32.0  }
   0x6   :  { %v48_v1 = vsel %vm44_vm0, %v304_v0, 0.0  ;;  %v45_v3 = vsel %vm44_vm0, %v311_v2, 0.0  ;;  %222 = vrcp.f32 %v257_v4  ;;  %v111_v21 = vld [vmem:[#allocation2 + $0x18] sm:$0xff]  ;;  %v110_v22 = vld [vmem:[#allocation2 + $0x10] sm:$0xff]  ;;  %v109_v23 = vld [vmem:[#allocation2 + $0x8] sm:$0xff]  ;;  %vm159_vm8 = vcmask 523264  }
   0x7   :  { %49 = vadd.xlane.f32.xlu0 %v48_v1  ;;  %202 = vmatpush.msra.mxu3 %v111_v21  ;;  %v108_v24 = vld [vmem:[#allocation2] sm:$0xff]  ;;  %v154_v28 = vld [vmem:[%s377_s5 + $0x38] sm:$0xff]  ;;  %v153_v29 = vld [vmem:[%s377_s5 + $0x30] sm:$0xff] }
   0x8   :  { %134 = vmatpush.msra.mxu0 %v111_v21  ;;  %206 = vmatpush.msra.mxu2 %v154_v28  ;;  %v152_v30 = vld [vmem:[%s377_s5 + $0x28] sm:$0xff]  ;;  %v151_v33 = vld [vmem:[%s377_s5 + $0x20] sm:$0xff]  ;;  %v150_v36 = vld [vmem:[%s377_s5 + $0x18] sm:$0xff] }
   0x9   :  { %203 = vmatpush.msra.mxu3 %v110_v22  ;;  %174 = vmatpush.msra.mxu1 %v154_v28  ;;  %v218_v44 = vld [vmem:[%s373_s1] ss:$0 sm:$0xff]  ;;  %v149_v58 = vld [vmem:[%s377_s5 + $0x10] sm:$0xff]  ;;  %v148_v59 = vld [vmem:[%s377_s5 + $0x8] sm:$0xff] }
   0xa   :  { %135 = vmatpush.msra.mxu0 %v110_v22  ;;  %207 = vmatpush.msra.mxu2 %v153_v29  ;;  %v219_v48 = vld [vmem:[%s374_s2] ss:$0 sm:$0xff] }
   0xb   :  { %204 = vmatpush.msra.mxu3 %v109_v23  ;;  %175 = vmatpush.msra.mxu1 %v153_v29  ;;  %v147_v60 = vld [vmem:[%s377_s5] sm:$0xff] }
   0xc   :  { %v223_v5 = vpop.eup %222  ;;  %136 = vmatpush.msra.mxu0 %v109_v23  ;;  %208 = vmatpush.msra.mxu2 %v152_v30  ;;  %v220_v61 = vld [vmem:[%s376_s4] ss:$0 sm:$0xff] }
   0xd   :  { %v52_v6 = vmul.f32 32.0, %v223_v5  ;;  %vm56_vm1 = vweird.f32 %v223_v5  ;;  %205 = vmatpush.msra.mxu3 %v108_v24  ;;  %176 = vmatpush.msra.mxu1 %v152_v30 }
   0xe   :  { %137 = vmatpush.msra.mxu0 %v108_v24  ;;  %209 = vmatpush.msra.mxu2 %v151_v33 }
   0xf   :  { %46 = vadd.xlane.f32.xlu0 %v45_v3  ;;  %v53_v7 = vsub.f32 1.0, %v52_v6  ;;  %177 = vmatpush.msra.mxu1 %v151_v33  ;;  %v221_v6 = vld [vmem:[%s378_s6] ss:$0 sm:$0xff] }
  0x10   :  { %210 = vmatpush.msra.mxu2 %v150_v36 }
  0x11   :  { %v54_v8 = vmul.f32 %v223_v5, %v53_v7  ;;  %178 = vmatpush.msra.mxu1 %v150_v36 }
  0x12   :  { %211 = vmatpush.msra.mxu2 %v149_v58 }
  0x13   :  { %v55_v9 = vadd.f32 %v223_v5, %v54_v8  ;;  %179 = vmatpush.msra.mxu1 %v149_v58 }
  0x14   :  { %212 = vmatpush.msra.mxu2 %v148_v59 }
  0x15   :  { %v57_v10 = vsel %vm56_vm1, %v223_v5, %v55_v9  ;;  %180 = vmatpush.msra.mxu1 %v148_v59 }
  0x16   :  { %213 = vmatpush.msra.mxu2 %v147_v60 }
  0x17   :  { %181 = vmatpush.msra.mxu1 %v147_v60 }
  0x7a   :  { %v50_v11 = vpop.xlane.xlu0 %49 }
  0x7b   :  { %v59_v12 = vmul.f32 %v57_v10, %v50_v11 }
  0x7d   :  { %v61_v13 = vsub.f32 %v304_v0, %v59_v12 }
  0x7f   :  { %v63_v14 = vmul.f32 %v61_v13, %v61_v13 }
  0x81   :  { %v67_v15 = vsel %vm44_vm0, %v63_v14, 0.0 }
  0x82   :  { %68 = vadd.xlane.f32.xlu1 %v67_v15  ;;  %v47_v16 = vpop.xlane.xlu0 %46 }
  0x83   :  { %v58_v17 = vmul.f32 %v57_v10, %v47_v16 }
  0x85   :  { %v318_v18 = vsub.f32 %v311_v2, %v58_v17 }
  0x87   :  { %v62_v19 = vmul.f32 %v318_v18, %v318_v18 }
  0x89   :  { %v64_v20 = vsel %vm44_vm0, %v62_v19, 0.0 }
  0x8a   :  { %65 = vadd.xlane.f32.xlu1 %v64_v20 }
  0xf5   :  { %v69_v25 = vpop.xlane.xlu1 %68 }
  0xf6   :  { %v71_v26 = vmul.f32 %v69_v25, %v57_v10 }
  0xf8   :  { %v73_v27 = vadd.f32 1e-06, %v71_v26 }
  0xfa   :  { %224 = vrsqrt.f32 %v73_v27  ;;  %vm90_vm3 = vweird.f32 %v73_v27 }
  0xfd   :  { %v66_v31 = vpop.xlane.xlu1 %65 }
  0xfe   :  { %v70_v32 = vmul.f32 %v66_v31, %v57_v10 }
 0x100   :  { %v225_v34 = vpop.eup %224  ;;  %v72_v35 = vadd.f32 1e-06, %v70_v32 }
 0x101   :  { %v85_v37 = vmul.f32 %v225_v34, %v73_v27  ;;  %vm91_vm2 = vweird.f32 %v225_v34 }
 0x102   :  { %226 = vrsqrt.f32 %v72_v35  ;;  %vm92_vm4 = vmor %vm90_vm3, %vm91_vm2  ;;  %vm80_vm6 = vweird.f32 %v72_v35 }
 0x103   :  { %v86_v38 = vmul.f32 %v225_v34, %v85_v37 }
 0x105   :  { %v87_v39 = vmul.f32 0.5, %v86_v38 }
 0x107   :  { %v88_v40 = vsub.f32 1.5, %v87_v39 }
 0x108   :  { %v227_v41 = vpop.eup %226 }
 0x109   :  { %v89_v42 = vmul.f32 %v225_v34, %v88_v40  ;;  %v75_v43 = vmul.f32 %v227_v41, %v72_v35  ;;  %vm81_vm5 = vweird.f32 %v227_v41 }
 0x10a   :  { %vm82_vm7 = vmor %vm80_vm6, %vm81_vm5 }
 0x10b   :  { %v93_v45 = vsel %vm92_vm4, %v225_v34, %v89_v42  ;;  %v76_v46 = vmul.f32 %v227_v41, %v75_v43 }
 0x10c   :  { %v95_v47 = vmul.f32 %v93_v45, %v61_v13 }
 0x10d   :  { %v77_v49 = vmul.f32 0.5, %v76_v46 }
 0x10e   :  { %v101_v50 = vmul.f32 %v218_v44, %v95_v47 }
 0x10f   :  { %v78_v51 = vsub.f32 1.5, %v77_v49 }
 0x110   :  { %v107_v52 = vadd.f32 %v219_v48, %v101_v50 }
 0x111   :  { %v79_v53 = vmul.f32 %v227_v41, %v78_v51 }
 0x112   :  { %199 = vmatmul.msk.f32.vlgmr.msra.gmra.mxu3 %vm44_vm0, %v107_v52 }
 0x113   :  { %v83_v54 = vsel %vm82_vm7, %v227_v41, %v79_v53 }
 0x114   :  { %v94_v55 = vmul.f32 %v83_v54, %v318_v18 }
 0x116   :  { %v100_v56 = vmul.f32 %v218_v44, %v94_v55 }
 0x118   :  { %v106_v57 = vadd.f32 %v219_v48, %v100_v56 }
 0x11a   :  { %198 = vmatmul.msk.f32.vlgmr.msra.gmra.mxu0 %vm44_vm0, %v106_v57 }
 0x195   :  { %v142_v62 = vpop.f32.mrf.mxu3 }
 0x196   :  { %v143_v63 = vadd.f32 %v220_v61, %v142_v62 }
 0x197   :  { %v139_v1 = vpop.f32.mrf.mxu0 }
 0x198   :  { %v146_v3 = vmax.f32 %v143_v63, 0.0  ;;  %v140_v4 = vadd.f32 %v220_v61, %v139_v1 }
 0x19a   :  { %v145_v5 = vmax.f32 %v140_v4, 0.0  ;;  %201 = vmatmul.msk.f32.vlgmr.msra.gmra.mxu2 %vm159_vm8, %v146_v3 }
 0x19c   :  { %200 = vmatmul.msk.f32.vlgmr.msra.gmra.mxu1 %vm159_vm8, %v145_v5 }
 0x219   :  { %v183_v7 = vpop.f32.mrf.mxu1 }
 0x21a   :  { %v184_v8 = vadd.f32 %v221_v6, %v183_v7 }
 0x21c   :  { %v189_v9 = vadd.f32 %v184_v8, %v311_v2 }
 0x21d   :  { %v186_v10 = vpop.f32.mrf.mxu2 }
 0x21e   :  { %191 = vst.msk [vmem:[%s379_s7] sm:$0xff] %vm44_vm0, %v189_v9  ;;  %v187_v11 = vadd.f32 %v221_v6, %v186_v10 }
 0x220   :  { %v190_v12 = vadd.f32 %v187_v11, %v304_v0 }
 0x222   :  { %192 = vst.msk [vmem:[%s379_s7 + $0x8] sm:$0xff] %vm44_vm0, %v190_v12 }
 0x223   :  { %197 = vsyncpa [#allocation3], 1 }

// kernel: scratch_model_forward.30
= control target key start
LH: loop header
LB: loop body
LE: loop exit
PB: predicated region body
PF: predicated region fallthrough
CT: control target
= control target key end

     0   :  { %10 = vsyncpa [#allocation3], 0  ;;  %s192_s21 = smov [#allocation2]   ;;  %s193_s23 = smov 128   ;;  %s256_s0 = inlined_call_operand.vmem [shape: f32[16,32], index: 0, kind: input, shape index: {}]   ;;  %s257_s1 = inlined_call_operand.vmem [shape: f32[1,32], index: 1, kind: input, shape index: {}]   ;;  %s258_s2 = inlined_call_operand.vmem [shape: f32[1,32], index: 2, kind: input, shape index: {}]   ;;  %s259_s3 = inlined_call_operand.hbm [shape: f32[32,96], index: 3, kind: input, shape index: {}]   ;;  %s260_s4 = inlined_call_operand.vmem [shape: f32[1,96], index: 4, kind: input, shape index: {}]   ;;  %s261_s5 = inlined_call_operand.vmem [shape: f32[16,96], index: 5, kind: output, shape index: {}]  }
   0x1   :  { %s21_s20 = sshll.u32 %s259_s3, 4  ;;  %s23_s22 = sshll.u32 %s192_s21, 4  ;;  %s22_s20 = int_to_ptr.hbm [resolvable:$true] %s21_s20  ;;  %s24_s22 = int_to_ptr.vmem [resolvable:$true] %s23_s22 }
   0x2   :  { %s194_s24 = smov 8  }
   0x3   :  { %29 = dma.hbm_to_vmem [thread:$0]  %s22_s20, 512, %s24_s22, [#allocation3], %s193_s23, %s193_s23, %s194_s24  }
   0x4   :  { %190 = dma.done.wait [#allocation3], 512  }
   0x5   :  { %191 = vsyncadd [#allocation3], 4294966784  ;;  %vm38_vm0 = vcmask 261120   ;;  %v36_v0 = vld [vmem:[%s256_s0] sm:$0xff]  ;;  %v37_v2 = vld [vmem:[%s256_s0 + $0x8] sm:$0xff]  ;;  %v195_v4 = vmov 32.0  }
   0x6   :  { %v39_v1 = vsel %vm38_vm0, %v36_v0, 0.0  ;;  %v42_v3 = vsel %vm38_vm0, %v37_v2, 0.0  ;;  %160 = vrcp.f32 %v195_v4  ;;  %v105_v21 = vld [vmem:[#allocation2 + $0x18] sm:$0xff]  ;;  %v104_v22 = vld [vmem:[#allocation2 + $0x10] sm:$0xff]  ;;  %v103_v23 = vld [vmem:[#allocation2 + $0x8] sm:$0xff]  ;;  %vm139_vm8 = vcmask 785408  }
   0x7   :  { %40 = vadd.xlane.f32.xlu0 %v39_v1  ;;  %128 = vmatpush.msra.mxu0 %v105_v21  ;;  %v102_v24 = vld [vmem:[#allocation2] sm:$0xff] }
   0x8   :  { %149 = vmatpush.msra.mxu1 %v105_v21  ;;  %v157_v39 = vld [vmem:[%s257_s1] ss:$0 sm:$0xff] }
   0x9   :  { %129 = vmatpush.msra.mxu0 %v104_v22  ;;  %v158_v43 = vld [vmem:[%s258_s2] ss:$0 sm:$0xff] }
   0xa   :  { %150 = vmatpush.msra.mxu1 %v104_v22  ;;  %v159_v53 = vld [vmem:[%s260_s4] ss:$0 sm:$0xff] }
   0xb   :  { %130 = vmatpush.msra.mxu0 %v103_v23 }
   0xc   :  { %v161_v5 = vpop.eup %160  ;;  %151 = vmatpush.msra.mxu1 %v103_v23 }
   0xd   :  { %v46_v6 = vmul.f32 32.0, %v161_v5  ;;  %vm50_vm1 = vweird.f32 %v161_v5  ;;  %131 = vmatpush.msra.mxu0 %v102_v24 }
   0xe   :  { %152 = vmatpush.msra.mxu1 %v102_v24 }
   0xf   :  { %43 = vadd.xlane.f32.xlu0 %v42_v3  ;;  %v47_v7 = vsub.f32 1.0, %v46_v6 }
  0x11   :  { %v48_v8 = vmul.f32 %v161_v5, %v47_v7 }
  0x13   :  { %v49_v9 = vadd.f32 %v161_v5, %v48_v8 }
  0x15   :  { %v51_v10 = vsel %vm50_vm1, %v161_v5, %v49_v9 }
  0x7a   :  { %v41_v11 = vpop.xlane.xlu0 %40 }
  0x7b   :  { %v52_v12 = vmul.f32 %v51_v10, %v41_v11 }
  0x7d   :  { %v54_v13 = vsub.f32 %v36_v0, %v52_v12 }
  0x7f   :  { %v56_v14 = vmul.f32 %v54_v13, %v54_v13 }
  0x81   :  { %v58_v15 = vsel %vm38_vm0, %v56_v14, 0.0 }
  0x82   :  { %59 = vadd.xlane.f32.xlu1 %v58_v15  ;;  %v44_v16 = vpop.xlane.xlu0 %43 }
  0x83   :  { %v53_v17 = vmul.f32 %v51_v10, %v44_v16 }
  0x85   :  { %v55_v18 = vsub.f32 %v37_v2, %v53_v17 }
  0x87   :  { %v57_v19 = vmul.f32 %v55_v18, %v55_v18 }
  0x89   :  { %v61_v20 = vsel %vm38_vm0, %v57_v19, 0.0 }
  0x8a   :  { %62 = vadd.xlane.f32.xlu1 %v61_v20 }
  0xf5   :  { %v60_v25 = vpop.xlane.xlu1 %59 }
  0xf6   :  { %v64_v26 = vmul.f32 %v60_v25, %v51_v10 }
  0xf8   :  { %v66_v27 = vadd.f32 1e-06, %v64_v26 }
  0xfa   :  { %162 = vrsqrt.f32 %v66_v27  ;;  %vm74_vm3 = vweird.f32 %v66_v27 }
  0xfd   :  { %v63_v28 = vpop.xlane.xlu1 %62 }
  0xfe   :  { %v65_v29 = vmul.f32 %v63_v28, %v51_v10 }
 0x100   :  { %v163_v30 = vpop.eup %162  ;;  %v67_v31 = vadd.f32 1e-06, %v65_v29 }
 0x101   :  { %v69_v32 = vmul.f32 %v163_v30, %v66_v27  ;;  %vm75_vm2 = vweird.f32 %v163_v30 }
 0x102   :  { %164 = vrsqrt.f32 %v67_v31  ;;  %vm76_vm4 = vmor %vm74_vm3, %vm75_vm2  ;;  %vm84_vm6 = vweird.f32 %v67_v31 }
 0x103   :  { %v70_v33 = vmul.f32 %v163_v30, %v69_v32 }
 0x105   :  { %v71_v34 = vmul.f32 0.5, %v70_v33 }
 0x107   :  { %v72_v35 = vsub.f32 1.5, %v71_v34 }
 0x108   :  { %v165_v36 = vpop.eup %164 }
 0x109   :  { %v73_v37 = vmul.f32 %v163_v30, %v72_v35  ;;  %v79_v38 = vmul.f32 %v165_v36, %v67_v31  ;;  %vm85_vm5 = vweird.f32 %v165_v36 }
 0x10a   :  { %vm86_vm7 = vmor %vm84_vm6, %vm85_vm5 }
 0x10b   :  { %v77_v40 = vsel %vm76_vm4, %v163_v30, %v73_v37  ;;  %v80_v41 = vmul.f32 %v165_v36, %v79_v38 }
 0x10c   :  { %v88_v42 = vmul.f32 %v77_v40, %v54_v13 }
 0x10d   :  { %v81_v44 = vmul.f32 0.5, %v80_v41 }
 0x10e   :  { %v94_v45 = vmul.f32 %v157_v39, %v88_v42 }
 0x10f   :  { %v82_v46 = vsub.f32 1.5, %v81_v44 }
 0x110   :  { %v100_v47 = vadd.f32 %v158_v43, %v94_v45 }
 0x111   :  { %v83_v48 = vmul.f32 %v165_v36, %v82_v46 }
 0x112   :  { %147 = vmatmul.msk.f32.vlgmr.msra.gmra.mxu0 %vm38_vm0, %v100_v47 }
 0x113   :  { %v87_v49 = vsel %vm86_vm7, %v165_v36, %v83_v48 }
 0x114   :  { %v89_v50 = vmul.f32 %v87_v49, %v55_v18 }
 0x116   :  { %v95_v51 = vmul.f32 %v157_v39, %v89_v50 }
 0x118   :  { %v101_v52 = vadd.f32 %v158_v43, %v95_v51 }
 0x11a   :  { %148 = vmatmul.msk.f32.vlgmr.msra.gmra.mxu1 %vm38_vm0, %v101_v52 }
 0x18f   :  { %v133_v54 = vpop.f32.mrf.mxu0 }
 0x190   :  { %v134_v55 = vadd.f32 %v159_v53, %v133_v54 }
 0x192   :  { %140 = vst.msk [vmem:[%s261_s5] sm:$0xff] %vm139_vm8, %v134_v55 }
 0x197   :  { %v136_v56 = vpop.f32.mrf.mxu1 }
 0x198   :  { %v137_v57 = vadd.f32 %v159_v53, %v136_v56 }
 0x19a   :  { %141 = vst.msk [vmem:[%s261_s5 + $0x8] sm:$0xff] %vm139_vm8, %v137_v57 }
 0x19b   :  { %146 = vsyncpa [#allocation3], 1 }

// kernel: scratch_model_forward.37
= control target key start
LH: loop header
LB: loop body
LE: loop exit
PB: predicated region body
PF: predicated region fallthrough
CT: control target
= control target key end

     0   :  { %8 = vsyncpa [#allocation4], 0  ;;  %s135_s15 = smov [#allocation3]   ;;  %s136_s17 = smov 128   ;;  %s183_s0 = inlined_call_operand.vmem [shape: f32[16,32], index: 0, kind: input, shape index: {}]   ;;  %s184_s1 = inlined_call_operand.hbm [shape: f32[32,64], index: 1, kind: input, shape index: {}]   ;;  %s185_s2 = inlined_call_operand.vmem [shape: f32[1,64], index: 2, kind: input, shape index: {}]   ;;  %s186_s3 = inlined_call_operand.vmem [shape: f32[16,64], index: 3, kind: output, shape index: {}]  }
   0x1   :  { %s15_s14 = sshll.u32 %s184_s1, 4  ;;  %s17_s16 = sshll.u32 %s135_s15, 4  ;;  %s16_s14 = int_to_ptr.hbm [resolvable:$true] %s15_s14  ;;  %s18_s16 = int_to_ptr.vmem [resolvable:$true] %s17_s16 }
   0x2   :  { %s137_s18 = smov 8  }
   0x3   :  { %23 = dma.hbm_to_vmem [thread:$0]  %s16_s14, 512, %s18_s16, [#allocation4], %s136_s17, %s136_s17, %s137_s18  }
   0x4   :  { %133 = dma.done.wait [#allocation4], 512  }
   0x5   :  { %134 = vsyncadd [#allocation4], 4294966784  ;;  %vm34_vm0 = vcmask 523264   ;;  %v138_v0 = vmov 0.0   ;;  %v44_v1 = vld [vmem:[#allocation3 + $0x18] sm:$0xff]  ;;  %v43_v2 = vld [vmem:[#allocation3 + $0x10] sm:$0xff] }
   0x6   :  { %35 = vst.msk [vmem:[#allocation2] sm:$0xff] %vm34_vm0, %v138_v0  ;;  %64 = vmatpush.msra.mxu0 %v44_v1  ;;  %100 = vmatpush.msra.mxu1 %v44_v1  ;;  %v42_v3 = vld [vmem:[#allocation3 + $0x8] sm:$0xff]  ;;  %v41_v4 = vld [vmem:[#allocation3] sm:$0xff]  ;;  %v39_v5 = vld [vmem:[%s183_s0] sm:$0xff]  ;;  %vm45_vm1 = vcmask 261120  }
   0x7   :  { %36 = vst.msk [vmem:[#allocation2 + $0x8] sm:$0xff] %vm34_vm0, %v138_v0  ;;  %v40_v6 = vld [vmem:[%s183_s0 + $0x8] sm:$0xff]  ;;  %v108_v13 = vld [vmem:[%s185_s2] ss:$0 sm:$0xff] }
   0x8   :  { %65 = vmatpush.msra.mxu0 %v43_v2  ;;  %101 = vmatpush.msra.mxu1 %v43_v2 }
   0xa   :  { %66 = vmatpush.msra.mxu0 %v42_v3  ;;  %102 = vmatpush.msra.mxu1 %v42_v3 }
   0xc   :  { %67 = vmatpush.msra.mxu0 %v41_v4  ;;  %103 = vmatpush.msra.mxu1 %v41_v4 }
   0xd   :  { %98 = vmatmul.msk.f32.vlgmr.msra.gmra.mxu0 %vm45_vm1, %v39_v5  ;;  %99 = vmatmul.msk.f32.vlgmr.msra.gmra.mxu1 %vm45_vm1, %v40_v6  ;;  %v37_v7 = vld [vmem:[#allocation2] sm:$0xff] }
   0xe   :  { %v38_v8 = vld [vmem:[#allocation2 + $0x8] sm:$0xff] }
  0x8a   :  { %v69_v9 = vpop.f32.mrf.mxu0  ;;  %v72_v10 = vpop.f32.mrf.mxu1 }
  0x8b   :  { %v75_v11 = vadd.f32 %v69_v9, %v37_v7  ;;  %v76_v12 = vadd.f32 %v72_v10, %v38_v8 }
  0x8d   :  { %78 = vst.msk [vmem:[#allocation2] sm:$0xff] %vm34_vm0, %v75_v11 }
  0x8e   :  { %79 = vst.msk [vmem:[#allocation2 + $0x8] sm:$0xff] %vm34_vm0, %v76_v12 }
  0x94   :  { %v83_v14 = vld [vmem:[#allocation2] sm:$0xff] }
  0x95   :  { %v89_v15 = vadd.f32 %v108_v13, %v83_v14  ;;  %v84_v16 = vld [vmem:[#allocation2 + $0x8] sm:$0xff] }
  0x96   :  { %v90_v17 = vadd.f32 %v108_v13, %v84_v16 }
  0x97   :  { %91 = vst.msk [vmem:[%s186_s3] sm:$0xff] %vm34_vm0, %v89_v15 }
  0x98   :  { %92 = vst.msk [vmem:[%s186_s3 + $0x8] sm:$0xff] %vm34_vm0, %v90_v17 }
  0x99   :  { %97 = vsyncpa [#allocation4], 1 }

// kernel: scratch_model_forward.38
= control target key start
LH: loop header
LB: loop body
LE: loop exit
PB: predicated region body
PF: predicated region fallthrough
CT: control target
= control target key end

     0   :  { %10 = vsyncpa [#allocation3], 0  ;;  %s191_s21 = smov [#allocation2]   ;;  %s192_s23 = smov 128   ;;  %s257_s0 = inlined_call_operand.vmem [shape: f32[16,32], index: 0, kind: input, shape index: {}]   ;;  %s258_s1 = inlined_call_operand.vmem [shape: f32[1,32], index: 1, kind: input, shape index: {}]   ;;  %s259_s2 = inlined_call_operand.vmem [shape: f32[1,32], index: 2, kind: input, shape index: {}, may-alias: {2,4}]   ;;  %s260_s3 = inlined_call_operand.hbm [shape: f32[32,32], index: 3, kind: input, shape index: {}]   ;;  %s261_s4 = inlined_call_operand.vmem [shape: f32[1,32], index: 4, kind: input, shape index: {}, may-alias: {2,4}]   ;;  %s262_s5 = inlined_call_operand.vmem [shape: f32[16,32], index: 5, kind: output, shape index: {}]  }
   0x1   :  { %s21_s20 = sshll.u32 %s260_s3, 4  ;;  %s23_s22 = sshll.u32 %s191_s21, 4  ;;  %s22_s20 = int_to_ptr.hbm [resolvable:$true] %s21_s20  ;;  %s24_s22 = int_to_ptr.vmem [resolvable:$true] %s23_s22 }
   0x2   :  { %s193_s24 = smov 8  }
   0x3   :  { %29 = dma.hbm_to_vmem [thread:$0]  %s22_s20, 512, %s24_s22, [#allocation3], %s192_s23, %s192_s23, %s193_s24  }
   0x4   :  { %189 = dma.done.wait [#allocation3], 512  }
   0x5   :  { %190 = vsyncadd [#allocation3], 4294966784  ;;  %vm38_vm0 = vcmask 261120   ;;  %v36_v0 = vld [vmem:[%s257_s0] sm:$0xff]  ;;  %v37_v2 = vld [vmem:[%s257_s0 + $0x8] sm:$0xff]  ;;  %v194_v4 = vmov 32.0  }
   0x6   :  { %v39_v1 = vsel %vm38_vm0, %v36_v0, 0.0  ;;  %v42_v3 = vsel %vm38_vm0, %v37_v2, 0.0  ;;  %159 = vrcp.f32 %v194_v4  ;;  %v105_v21 = vld [vmem:[#allocation2 + $0x18] sm:$0xff]  ;;  %v104_v22 = vld [vmem:[#allocation2 + $0x10] sm:$0xff]  ;;  %v103_v23 = vld [vmem:[#allocation2 + $0x8] sm:$0xff] }
   0x7   :  { %40 = vadd.xlane.f32.xlu0 %v39_v1  ;;  %128 = vmatpush.msra.mxu0 %v105_v21  ;;  %v102_v24 = vld [vmem:[#allocation2] sm:$0xff] }
   0x8   :  { %148 = vmatpush.msra.mxu1 %v105_v21  ;;  %v156_v39 = vld [vmem:[%s258_s1] ss:$0 sm:$0xff] }
   0x9   :  { %129 = vmatpush.msra.mxu0 %v104_v22  ;;  %v157_v43 = vld [vmem:[%s259_s2] ss:$0 sm:$0xff] }
   0xa   :  { %149 = vmatpush.msra.mxu1 %v104_v22  ;;  %v158_v53 = vld [vmem:[%s261_s4] ss:$0 sm:$0xff] }
   0xb   :  { %130 = vmatpush.msra.mxu0 %v103_v23 }
   0xc   :  { %v160_v5 = vpop.eup %159  ;;  %150 = vmatpush.msra.mxu1 %v103_v23 }
   0xd   :  { %v46_v6 = vmul.f32 32.0, %v160_v5  ;;  %vm50_vm1 = vweird.f32 %v160_v5  ;;  %131 = vmatpush.msra.mxu0 %v102_v24 }
   0xe   :  { %151 = vmatpush.msra.mxu1 %v102_v24 }
   0xf   :  { %43 = vadd.xlane.f32.xlu0 %v42_v3  ;;  %v47_v7 = vsub.f32 1.0, %v46_v6 }
  0x11   :  { %v48_v8 = vmul.f32 %v160_v5, %v47_v7 }
  0x13   :  { %v49_v9 = vadd.f32 %v160_v5, %v48_v8 }
  0x15   :  { %v51_v10 = vsel %vm50_vm1, %v160_v5, %v49_v9 }
  0x7a   :  { %v41_v11 = vpop.xlane.xlu0 %40 }
  0x7b   :  { %v52_v12 = vmul.f32 %v51_v10, %v41_v11 }
  0x7d   :  { %v54_v13 = vsub.f32 %v36_v0, %v52_v12 }
  0x7f   :  { %v56_v14 = vmul.f32 %v54_v13, %v54_v13 }
  0x81   :  { %v58_v15 = vsel %vm38_vm0, %v56_v14, 0.0 }
  0x82   :  { %59 = vadd.xlane.f32.xlu1 %v58_v15  ;;  %v44_v16 = vpop.xlane.xlu0 %43 }
  0x83   :  { %v53_v17 = vmul.f32 %v51_v10, %v44_v16 }
  0x85   :  { %v55_v18 = vsub.f32 %v37_v2, %v53_v17 }
  0x87   :  { %v57_v19 = vmul.f32 %v55_v18, %v55_v18 }
  0x89   :  { %v61_v20 = vsel %vm38_vm0, %v57_v19, 0.0 }
  0x8a   :  { %62 = vadd.xlane.f32.xlu1 %v61_v20 }
  0xf5   :  { %v60_v25 = vpop.xlane.xlu1 %59 }
  0xf6   :  { %v64_v26 = vmul.f32 %v60_v25, %v51_v10 }
  0xf8   :  { %v66_v27 = vadd.f32 1e-06, %v64_v26 }
  0xfa   :  { %161 = vrsqrt.f32 %v66_v27  ;;  %vm74_vm3 = vweird.f32 %v66_v27 }
  0xfd   :  { %v63_v28 = vpop.xlane.xlu1 %62 }
  0xfe   :  { %v65_v29 = vmul.f32 %v63_v28, %v51_v10 }
 0x100   :  { %v162_v30 = vpop.eup %161  ;;  %v67_v31 = vadd.f32 1e-06, %v65_v29 }
 0x101   :  { %v69_v32 = vmul.f32 %v162_v30, %v66_v27  ;;  %vm75_vm2 = vweird.f32 %v162_v30 }
 0x102   :  { %163 = vrsqrt.f32 %v67_v31  ;;  %vm76_vm4 = vmor %vm74_vm3, %vm75_vm2  ;;  %vm84_vm6 = vweird.f32 %v67_v31 }
 0x103   :  { %v70_v33 = vmul.f32 %v162_v30, %v69_v32 }
 0x105   :  { %v71_v34 = vmul.f32 0.5, %v70_v33 }
 0x107   :  { %v72_v35 = vsub.f32 1.5, %v71_v34 }
 0x108   :  { %v164_v36 = vpop.eup %163 }
 0x109   :  { %v73_v37 = vmul.f32 %v162_v30, %v72_v35  ;;  %v79_v38 = vmul.f32 %v164_v36, %v67_v31  ;;  %vm85_vm5 = vweird.f32 %v164_v36 }
 0x10a   :  { %vm86_vm7 = vmor %vm84_vm6, %vm85_vm5 }
 0x10b   :  { %v77_v40 = vsel %vm76_vm4, %v162_v30, %v73_v37  ;;  %v80_v41 = vmul.f32 %v164_v36, %v79_v38 }
 0x10c   :  { %v88_v42 = vmul.f32 %v77_v40, %v54_v13 }
 0x10d   :  { %v81_v44 = vmul.f32 0.5, %v80_v41 }
 0x10e   :  { %v94_v45 = vmul.f32 %v156_v39, %v88_v42 }
 0x10f   :  { %v82_v46 = vsub.f32 1.5, %v81_v44 }
 0x110   :  { %v100_v47 = vadd.f32 %v157_v43, %v94_v45 }
 0x111   :  { %v83_v48 = vmul.f32 %v164_v36, %v82_v46 }
 0x112   :  { %146 = vmatmul.msk.f32.vlgmr.msra.gmra.mxu0 %vm38_vm0, %v100_v47 }
 0x113   :  { %v87_v49 = vsel %vm86_vm7, %v164_v36, %v83_v48 }
 0x114   :  { %v89_v50 = vmul.f32 %v87_v49, %v55_v18 }
 0x116   :  { %v95_v51 = vmul.f32 %v156_v39, %v89_v50 }
 0x118   :  { %v101_v52 = vadd.f32 %v157_v43, %v95_v51 }
 0x11a   :  { %147 = vmatmul.msk.f32.vlgmr.msra.gmra.mxu1 %vm38_vm0, %v101_v52 }
 0x18f   :  { %v133_v54 = vpop.f32.mrf.mxu0 }
 0x190   :  { %v134_v55 = vadd.f32 %v158_v53, %v133_v54 }
 0x192   :  { %139 = vst.msk [vmem:[%s262_s5] sm:$0xff] %vm38_vm0, %v134_v55 }
 0x197   :  { %v136_v56 = vpop.f32.mrf.mxu1 }
 0x198   :  { %v137_v57 = vadd.f32 %v158_v53, %v136_v56 }
 0x19a   :  { %140 = vst.msk [vmem:[%s262_s5 + $0x8] sm:$0xff] %vm38_vm0, %v137_v57 }
 0x19b   :  { %145 = vsyncpa [#allocation3], 1 }

// kernel: scratch_model_forward.35
= control target key start
LH: loop header
LB: loop body
LE: loop exit
PB: predicated region body
PF: predicated region fallthrough
CT: control target
= control target key end

     0   :  { %s612_s9 = smov 0   ;;  %s690_s0 = inlined_call_operand.vmem [shape: f32[2,8,96], index: 0, kind: input, shape index: {}]   ;;  %s691_s1 = inlined_call_operand.vmem [shape: f32[2,1,8], index: 1, kind: input, shape index: {}]   ;;  %s692_s2 = inlined_call_operand.vmem [shape: f32[2,8,32], index: 2, kind: output, shape index: {}]  }
   0x1 LB: > { %s514_s10 = sadd.s32 4294967295, %s580_s9   ;;  %p518_p0 = scmp.ge.s32.totalorder %s580_s9, 1  ;;  %s580_s9 = sphi %s612_s9, %s12_s9  }
   0x2   : > { %p119_p1 = scmp.lt.s32.totalorder %s580_s9, 3 }
   0x4   : > { %p120_p2 = pnand %p518_p0, %p119_p1 }
   0x5   : > { %p142_p3 = scmp.lt.s32.totalorder (!%p120_p2), %s514_s10, 1  ;;  %s582_s15 = smov (!%p120_p2), 96  }
   0x6   : > { %123 = sbr.rel (%p120_p2) target bundleno = 1176 (0x498), region = 28  ;;  %s583_s16 = smov (!%p120_p2), 88  }
   0x7   : > { %s584_s17 = smov (!%p120_p2), 120   ;;  %s586_s21 = smov (!%p120_p2), 64  }
   0x8   : > { %s587_s22 = smov (!%p120_p2), 80   ;;  %s588_s23 = smov (!%p120_p2), 72  }
   0x9   : > { %s589_s24 = smov (!%p120_p2), 112   ;;  %s590_s25 = smov (!%p120_p2), 104  }
   0xa   : > { %s591_s26 = smov (!%p120_p2), 48   ;;  %s592_s27 = smov (!%p120_p2), 56  }
   0xb   : > { %s696_s10 = smov (!%p142_p3, %s514_s10), 1  ;;  %vm168_vm0 = vcmask 64512   ;;  %v156_v5 = vlaneseq  ;;  %v585_v6 = vmov 0   ;;  %s593_s28 = smov 40   ;;  %vm446_vm5 = vcmask 130048  }
   0xc   : > { %s519_s11 = sshll.u32 %s696_s10, 3  ;;  %s148_s20 = scalar_lea.vmem %s691_s1, %s696_s10  ;;  %vm448_vm6 = vcmask 195584   ;;  %vm450_vm7 = vcmask 261120  }
   0xd   : > { %s145_s14 = scalar_lea.vmem %s690_s0, %s519_s11  ;;  %v154_v4 = vld [vmem:[%s148_s20] sm:$0x1]  ;;  %v157_v8 = vshrl.u32 %v156_v5, 7  ;;  %v159_v9 = vand.u32 127, %v156_v5  ;;  %s594_s29 = smov 24  }
   0xe   : > { %v628_v0 = vld [vmem:[%s145_s14] sm:$0xff]  ;;  %vm155_vm1 = vcmp.gt.f32.partialorder %v154_v4, 0.0  ;;  %s595_s30 = smov 8   ;;  %s596_s3 = smov 16  }
   0xf   : > { %166 = vrot.lane.b32.xlu0 %v628_v0, %s582_s15  ;;  %234 = vrot.lane.b32.xlu1 %v628_v0, %s583_s16  ;;  %v161_v7 = vsel %vm155_vm1, 1, %v585_v6  ;;  %vm160_vm2 = vcmp.le.s32.totalorder %v159_v9, %v157_v8  ;;  %s152_s6 = scalar_lea.vmem %s692_s2, %s519_s11 }
  0x10   : > { %232 = vrot.lane.b32.xlu2 %v628_v0, %s584_s17  ;;  %v162_v10 = vperm.slane %v161_v7, 0 }
  0x12   : > { %vm163_vm3 = vcmp.eq.s32.totalorder %v162_v10, 1 }
  0x13   : > { %vm642_vm4 = vmand %vm163_vm3, %vm160_vm2 }
  0x18   : > { %206 = vrot.lane.b32.xlu2 %v628_v0, %s586_s21 }
  0x20   : > { %301 = vrot.lane.b32.xlu2 %v628_v0, %s587_s22 }
  0x28   : > { %368 = vrot.lane.b32.xlu2 %v628_v0, %s588_s23 }
  0x30   : > { %299 = vrot.lane.b32.xlu2 %v628_v0, %s589_s24 }
  0x6a   : > { %v233_v3 = vpop.permute.xlu2 %232 }
  0x72   : > { %v207_v19 = vpop.permute.xlu2 %206 }
  0x73   : > { %227 = vmatpush.msra.mxu1 %v207_v19 }
  0x7a   : > { %v302_v24 = vpop.permute.xlu2 %301 }
  0x7b   : > { %527 = vmatpush.xpose.msk.msrb.mxu1 %vm168_vm0, %v302_v24 }
  0x81   : > { %v167_v1 = vpop.permute.xlu0 %166  ;;  %v235_v2 = vpop.permute.xlu1 %234 }
  0x82   : > { %521 = vmatpush.xpose.msk.msra.mxu0 %vm168_vm0, %v167_v1  ;;  %524 = vmatpush.xpose.msk.msra.mxu2 %vm168_vm0, %v235_v2  ;;  %v369_v27 = vpop.permute.xlu2 %368 }
  0x85   : > { %522 = vmatmul.msk.f32.vlgmr.msra.gmra.mxu0 %vm168_vm0, %v628_v0  ;;  %525 = vmatmul.msk.f32.vlgmr.msra.gmra.mxu2 %vm168_vm0, %v233_v3 }
  0x86   : > { %530 = vmatpush.xpose.msk.msrb.mxu0 %vm168_vm0, %v369_v27 }
  0x8a   : > { %v300_v31 = vpop.permute.xlu2 %299 }
 0x102   : > { %v190_v11 = vpop.f32.mrf.mxu0 }
 0x103   : > { %v193_v13 = vmul.f32 0.35355338, %v190_v11 }
 0x105   : > { %v194_v14 = vsel %vm642_vm4, %v193_v13, -1e+09 }
 0x106   : > { %v195_v15 = vsel %vm168_vm0, %v194_v14, -inf }
 0x107   : > { %196 = vmax.xlane.f32.xlu0 %v195_v15 }
 0x108   : > { %v257_v22 = vpop.f32.mrf.mxu2 }
 0x109   : > { %v260_v23 = vmul.f32 0.35355338, %v257_v22 }
 0x10b   : > { %v261_v25 = vsel %vm642_vm4, %v260_v23, -1e+09 }
 0x10c   : > { %v262_v26 = vsel %vm168_vm0, %v261_v25, -inf }
 0x10d   : > { %263 = vmax.xlane.f32.xlu2 %v262_v26 }
 0x17a   : > { %v197_v16 = vpop.xlane.xlu0 %196 }
 0x17b   : > { %v198_v17 = vsub.f32 %v194_v14, %v197_v16 }
 0x17d   : > { %v199_v18 = vmul.f32 1.442695, %v198_v17 }
 0x17f   : > { %558 = vpow2.f32 %v199_v18 }
 0x180   : > { %v264_v34 = vpop.xlane.xlu2 %263 }
 0x181   : > { %v265_v37 = vsub.f32 %v261_v25, %v264_v34 }
 0x183   : > { %v266_v40 = vmul.f32 1.442695, %v265_v37 }
 0x185   : > { %v559_v20 = vpop.eup %558 }
 0x186   : > { %v201_v21 = vsel %vm168_vm0, %v559_v20, 0.0 }
 0x187   : > { %202 = vadd.xlane.f32.xlu1 %v201_v21 }
 0x1a0   : > { %366 = vrot.lane.b32.xlu1 %v628_v0, %s590_s25 }
 0x1fa   : > { %v203_v28 = vpop.xlane.xlu1 %202 }
 0x1fb   : > { %560 = vrcp.f32 %v203_v28 }
 0x1fc   : > { %562 = vpow2.f32 %v266_v40 }
 0x201   : > { %v561_v29 = vpop.eup %560 }
 0x202   : > { %v205_v30 = vmul.f32 %v561_v29, %v559_v20  ;;  %v563_v45 = vpop.eup %562 }
 0x203   : > { %v268_v46 = vsel %vm168_vm0, %v563_v45, 0.0 }
 0x204   : > { %523 = vmatmul.msk.f32.vlgmr.msra.gmra.mxu1 %vm168_vm0, %v205_v30 }
 0x20c   : > { %528 = vmatmul.msk.f32.vlgmr.msrb.gmra.mxu1 %vm168_vm0, %v300_v31 }
 0x212   : > { %v367_v32 = vpop.permute.xlu1 %366 }
 0x213   : > { %531 = vmatmul.msk.f32.vlgmr.msrb.gmra.mxu0 %vm168_vm0, %v367_v32 }
 0x281   : > { %v663_v33 = vpop.f32.mrf.mxu1 }
 0x289   : > { %v324_v35 = vpop.f32.mrf.mxu1 }
 0x28a   : > { %v327_v36 = vmul.f32 0.35355338, %v324_v35 }
 0x28c   : > { %v328_v38 = vsel %vm642_vm4, %v327_v36, -1e+09 }
 0x28d   : > { %v329_v39 = vsel %vm168_vm0, %v328_v38, -inf }
 0x28e   : > { %330 = vmax.xlane.f32.xlu1 %v329_v39 }
 0x290   : > { %v391_v41 = vpop.f32.mrf.mxu0 }
 0x291   : > { %v394_v42 = vmul.f32 0.35355338, %v391_v41 }
 0x293   : > { %v395_v43 = vsel %vm642_vm4, %v394_v42, -1e+09 }
 0x294   : > { %v396_v44 = vsel %vm168_vm0, %v395_v43, -inf }
 0x295   : > { %397 = vmax.xlane.f32.xlu0 %v396_v44 }
 0x29d   : > { %269 = vadd.xlane.f32.xlu0 %v268_v46 }
 0x2a7   : > { %340 = vrot.lane.b32.xlu1 %v628_v0, %s591_s26 }
 0x301   : > { %v331_v47 = vpop.xlane.xlu1 %330 }
 0x302   : > { %v332_v48 = vsub.f32 %v328_v38, %v331_v47 }
 0x304   : > { %v333_v49 = vmul.f32 1.442695, %v332_v48 }
 0x306   : > { %564 = vpow2.f32 %v333_v49 }
 0x308   : > { %v398_v50 = vpop.xlane.xlu0 %397 }
 0x309   : > { %v399_v51 = vsub.f32 %v395_v43, %v398_v50 }
 0x30b   : > { %v400_v52 = vmul.f32 1.442695, %v399_v51 }
 0x30c   : > { %v565_v53 = vpop.eup %564 }
 0x30d   : > { %566 = vpow2.f32 %v400_v52  ;;  %v335_v54 = vsel %vm168_vm0, %v565_v53, 0.0 }
 0x30e   : > { %336 = vadd.xlane.f32.xlu0 %v335_v54 }
 0x310   : > { %v270_v57 = vpop.xlane.xlu0 %269 }
 0x313   : > { %v567_v55 = vpop.eup %566 }
 0x314   : > { %v402_v56 = vsel %vm168_vm0, %v567_v55, 0.0 }
 0x315   : > { %403 = vadd.xlane.f32.xlu2 %v402_v56 }
 0x319   : > { %v341_v2 = vpop.permute.xlu1 %340 }
 0x322   : > { %273 = vrot.lane.b32.xlu0 %v628_v0, %s592_s27 }
 0x32d   : > { %407 = vrot.lane.b32.xlu2 %v628_v0, %s593_s28 }
 0x381   : > { %v337_v59 = vpop.xlane.xlu0 %336 }
 0x388   : > { %v404_v58 = vpop.xlane.xlu2 %403 }
 0x389   : > { %568 = vrcp.f32 %v404_v58 }
 0x38a   : > { %570 = vrcp.f32 %v270_v57 }
 0x38b   : > { %572 = vrcp.f32 %v337_v59 }
 0x38f   : > { %v569_v60 = vpop.eup %568 }
 0x390   : > { %v408_v61 = vpop.permute.xlu2 %407  ;;  %v406_v62 = vmul.f32 %v569_v60, %v567_v55  ;;  %v571_v63 = vpop.eup %570 }
 0x391   : > { %428 = vmatpush.msrb.mxu2 %v408_v61  ;;  %v272_v3 = vmul.f32 %v571_v63, %v563_v45  ;;  %v573_v0 = vpop.eup %572 }
 0x392   : > { %532 = vmatmul.msk.f32.vlgmr.msrb.gmra.mxu2 %vm168_vm0, %v406_v62  ;;  %v339_v4 = vmul.f32 %v573_v0, %v565_v53 }
 0x394   : > { %v274_v1 = vpop.permute.xlu0 %273 }
 0x395   : > { %294 = vmatpush.msra.mxu3 %v274_v1 }
 0x396   : > { %526 = vmatmul.msk.f32.vlgmr.msra.gmra.mxu3 %vm168_vm0, %v272_v3 }
 0x397   : > { %361 = vmatpush.msrb.mxu3 %v341_v2 }
 0x39e   : > { %529 = vmatmul.msk.f32.vlgmr.msrb.gmra.mxu3 %vm168_vm0, %v339_v4 }
 0x415   : > { %v430_v5 = vpop.f32.mrf.mxu2 }
 0x416   : > { %442 = vrot.lane.b32.xlu1 %v430_v5, %s594_s29 }
 0x419   : > { %v296_v6 = vpop.f32.mrf.mxu3 }
 0x41a   : > { %434 = vrot.lane.b32.xlu0 %v296_v6, %s595_s30 }
 0x421   : > { %v363_v7 = vpop.f32.mrf.mxu3 }
 0x422   : > { %438 = vrot.lane.b32.xlu0 %v363_v7, %s596_s3 }
 0x488   : > { %v443_v11 = vpop.permute.xlu1 %442 }
 0x48c   : > { %v435_v8 = vpop.permute.xlu0 %434 }
 0x48d   : > { %v445_v9 = vsel %vm168_vm0, %v663_v33, %v435_v8 }
 0x494   : > { %v439_v10 = vpop.permute.xlu0 %438 }
 0x495   : > { %v447_v12 = vsel %vm446_vm5, %v445_v9, %v439_v10 }
 0x496   : > { %v449_v13 = vsel %vm448_vm6, %v447_v12, %v443_v11 }
 0x497   : > { %451 = vst.msk [vmem:[%s152_s6] sm:$0xff] %vm450_vm7, %v449_v13 }
 0x498 PF: > { %s12_s9 = sadd.s32 1, %s580_s9  }
 0x499   : > { %p9_p4 = scmp.ge.s32.totalorder %s12_s9, 4  }
 0x49b   :  { %11 = sbr.rel (!%p9_p4) target bundleno = 1 (0x1), region = 61 }

// kernel: scratch_model_forward.48
= control target key start
LH: loop header
LB: loop body
LE: loop exit
PB: predicated region body
PF: predicated region fallthrough
CT: control target
= control target key end

     0   :  { %vm21_vm0 = vcmask 261120   ;;  %v95_v2 = vmov 0.0   ;;  %s162_s1 = inlined_call_operand.vmem [shape: f32[32,32], index: 1, kind: input, shape index: {}]   ;;  %s163_s2 = inlined_call_operand.vmem [shape: f32[1,32], index: 2, kind: input, shape index: {}]   ;;  %s164_s0 = inlined_call_operand.vmem [shape: f32[16,32], index: 0, kind: input, shape index: {}]   ;;  %s165_s3 = inlined_call_operand.vmem [shape: f32[16,32], index: 3, kind: input, shape index: {}]   ;;  %s166_s4 = inlined_call_operand.vmem [shape: f32[16,32], index: 4, kind: output, shape index: {}]  }
   0x1   :  { %v31_v0 = vld [vmem:[%s162_s1 + $0x18] sm:$0xff]  ;;  %v30_v1 = vld [vmem:[%s162_s1 + $0x10] sm:$0xff]  ;;  %22 = vst.msk [vmem:[#allocation2] sm:$0xff] %vm21_vm0, %v95_v2  ;;  %v29_v3 = vld [vmem:[%s162_s1 + $0x8] sm:$0xff] }
   0x2   :  { %51 = vmatpush.msra.mxu0 %v31_v0  ;;  %89 = vmatpush.msra.mxu1 %v31_v0  ;;  %23 = vst.msk [vmem:[#allocation2 + $0x8] sm:$0xff] %vm21_vm0, %v95_v2  ;;  %v28_v4 = vld [vmem:[%s162_s1] sm:$0xff]  ;;  %v27_v6 = vld [vmem:[%s164_s0 + $0x8] sm:$0xff] }
   0x3   :  { %v26_v5 = vld [vmem:[%s164_s0] sm:$0xff]  ;;  %v78_v18 = vld [vmem:[%s165_s3 + $0x8] sm:$0xff] }
   0x4   :  { %52 = vmatpush.msra.mxu0 %v30_v1  ;;  %90 = vmatpush.msra.mxu1 %v30_v1  ;;  %v94_v13 = vld [vmem:[%s163_s2] ss:$0 sm:$0xff] }
   0x5   :  { %v77_v15 = vld [vmem:[%s165_s3] sm:$0xff] }
   0x6   :  { %53 = vmatpush.msra.mxu0 %v29_v3  ;;  %91 = vmatpush.msra.mxu1 %v29_v3 }
   0x8   :  { %54 = vmatpush.msra.mxu0 %v28_v4  ;;  %92 = vmatpush.msra.mxu1 %v28_v4  ;;  %v24_v7 = vld [vmem:[#allocation2] sm:$0xff] }
   0x9   :  { %87 = vmatmul.msk.f32.vlgmr.msra.gmra.mxu0 %vm21_vm0, %v26_v5  ;;  %88 = vmatmul.msk.f32.vlgmr.msra.gmra.mxu1 %vm21_vm0, %v27_v6  ;;  %v25_v8 = vld [vmem:[#allocation2 + $0x8] sm:$0xff] }
  0x86   :  { %v56_v9 = vpop.f32.mrf.mxu0  ;;  %v59_v10 = vpop.f32.mrf.mxu1 }
  0x87   :  { %v62_v11 = vadd.f32 %v56_v9, %v24_v7  ;;  %v63_v12 = vadd.f32 %v59_v10, %v25_v8 }
  0x89   :  { %64 = vst.msk [vmem:[#allocation2] sm:$0xff] %vm21_vm0, %v62_v11 }
  0x8a   :  { %65 = vst.msk [vmem:[#allocation2 + $0x8] sm:$0xff] %vm21_vm0, %v63_v12 }
  0x90   :  { %v69_v14 = vld [vmem:[#allocation2] sm:$0xff] }
  0x91   :  { %v75_v16 = vadd.f32 %v94_v13, %v69_v14  ;;  %v70_v17 = vld [vmem:[#allocation2 + $0x8] sm:$0xff] }
  0x92   :  { %v76_v19 = vadd.f32 %v94_v13, %v70_v17 }
  0x93   :  { %v79_v20 = vadd.f32 %v77_v15, %v75_v16 }
  0x94   :  { %v80_v21 = vadd.f32 %v78_v18, %v76_v19 }
  0x95   :  { %81 = vst.msk [vmem:[%s166_s4] sm:$0xff] %vm21_vm0, %v79_v20 }
  0x96   :  { %82 = vst.msk [vmem:[%s166_s4 + $0x8] sm:$0xff] %vm21_vm0, %v80_v21 }

// kernel: scratch_model_forward.39
= control target key start
LH: loop header
LB: loop body
LE: loop exit
PB: predicated region body
PF: predicated region fallthrough
CT: control target
= control target key end

     0   :  { %s660_s12 = smov 0   ;;  %s734_s0 = inlined_call_operand.vmem [shape: f32[2,8,32], index: 0, kind: input, shape index: {}]   ;;  %s735_s1 = inlined_call_operand.vmem [shape: f32[2,8,64], index: 1, kind: input, shape index: {}]   ;;  %s736_s2 = inlined_call_operand.vmem [shape: f32[2,1,8], index: 2, kind: input, shape index: {}]   ;;  %s737_s3 = inlined_call_operand.vmem [shape: f32[2,8,32], index: 3, kind: output, shape index: {}]  }
   0x1 LB: > { %s564_s13 = sadd.s32 4294967295, %s627_s12   ;;  %p568_p0 = scmp.ge.s32.totalorder %s627_s12, 1  ;;  %s627_s12 = sphi %s660_s12, %s13_s12  }
   0x2   : > { %p153_p1 = scmp.lt.s32.totalorder %s627_s12, 3 }
   0x4   : > { %p154_p2 = pnand %p568_p0, %p153_p1 }
   0x5   : > { %p182_p3 = scmp.lt.s32.totalorder (!%p154_p2), %s564_s13, 1  ;;  %s629_s21 = smov (!%p154_p2), 120  }
   0x6   : > { %157 = sbr.rel (%p154_p2) target bundleno = 1055 (0x41f), region = 32  ;;  %s631_s25 = smov (!%p154_p2), 112  }
   0x7   : > { %s632_s26 = smov (!%p154_p2), 96   ;;  %s633_s27 = smov (!%p154_p2), 104  }
   0x8   : > { %s634_s28 = smov (!%p154_p2), 80   ;;  %s635_s29 = smov (!%p154_p2), 88  }
   0x9   : > { %s636_s30 = smov (!%p154_p2), 72   ;;  %s637_s4 = smov (!%p154_p2), 8  }
   0xa   : > { %s638_s5 = smov (!%p154_p2), 16   ;;  %s639_s6 = smov (!%p154_p2), 24  }
   0xb   : > { %s741_s13 = smov (!%p182_p3, %s564_s13), 1  ;;  %vm201_vm0 = vcmask 64512   ;;  %v630_v3 = vmov 0   ;;  %vm484_vm3 = vcmask 130048   ;;  %vm486_vm4 = vcmask 195584  }
   0xc   : > { %s668_s14 = sshll.u32 %s741_s13, 3  ;;  %s192_s24 = scalar_lea.vmem %s736_s2, %s741_s13  ;;  %vm488_vm5 = vcmask 261120  }
   0xd   : > { %s189_s17 = scalar_lea.vmem %s735_s1, %s668_s14  ;;  %s185_s20 = scalar_lea.vmem %s734_s0, %s668_s14  ;;  %v199_v2 = vld [vmem:[%s192_s24] sm:$0x1] }
   0xe   : > { %v678_v0 = vld [vmem:[%s189_s17] sm:$0xff]  ;;  %vm200_vm1 = vcmp.gt.f32.partialorder %v199_v2, 0.0  ;;  %s196_s9 = scalar_lea.vmem %s737_s3, %s668_s14 }
   0xf   : > { %572 = vmatpush.xpose.msk.msra.mxu0 %vm201_vm0, %v678_v0  ;;  %v197_v1 = vld [vmem:[%s185_s20] sm:$0xff]  ;;  %272 = vrot.lane.b32.xlu1 %v678_v0, %s629_s21  ;;  %v229_v4 = vsel %vm200_vm1, 1, %v630_v3 }
  0x10   : > { %v230_v5 = vperm.slane %v229_v4, 0  ;;  %244 = vrot.lane.b32.xlu2 %v678_v0, %s632_s26 }
  0x12   : > { %573 = vmatmul.msk.f32.vlgmr.msra.gmra.mxu0 %vm201_vm0, %v197_v1  ;;  %vm687_vm2 = vcmp.eq.s32.totalorder %v230_v5, 1 }
  0x17   : > { %270 = vrot.lane.b32.xlu1 %v197_v1, %s629_s21 }
  0x18   : > { %339 = vrot.lane.b32.xlu2 %v678_v0, %s631_s25 }
  0x1f   : > { %337 = vrot.lane.b32.xlu1 %v197_v1, %s631_s25 }
  0x20   : > { %404 = vrot.lane.b32.xlu2 %v197_v1, %s633_s27 }
  0x6a   : > { %v245_v18 = vpop.permute.xlu2 %244 }
  0x6b   : > { %265 = vmatpush.msra.mxu1 %v245_v18 }
  0x72   : > { %v340_v19 = vpop.permute.xlu2 %339 }
  0x73   : > { %578 = vmatpush.xpose.msk.msrb.mxu1 %vm201_vm0, %v340_v19 }
  0x7a   : > { %v405_v29 = vpop.permute.xlu2 %404 }
  0x81   : > { %v273_v11 = vpop.permute.xlu1 %272 }
  0x82   : > { %575 = vmatpush.xpose.msk.msra.mxu2 %vm201_vm0, %v273_v11 }
  0x89   : > { %v271_v12 = vpop.permute.xlu1 %270 }
  0x8a   : > { %576 = vmatmul.msk.f32.vlgmr.msra.gmra.mxu2 %vm201_vm0, %v271_v12 }
  0x8f   : > { %v225_v6 = vpop.f32.mrf.mxu0 }
  0x90   : > { %v228_v8 = vmul.f32 0.35355338, %v225_v6 }
  0x91   : > { %v338_v27 = vpop.permute.xlu1 %337 }
  0x92   : > { %v232_v9 = vsel %vm687_vm2, %v228_v8, -1e+09 }
  0x93   : > { %v233_v10 = vsel %vm201_vm0, %v232_v9, -inf }
  0x94   : > { %234 = vmax.xlane.f32.xlu0 %v233_v10 }
 0x107   : > { %v235_v13 = vpop.xlane.xlu0 %234 }
 0x108   : > { %v236_v14 = vsub.f32 %v232_v9, %v235_v13 }
 0x10a   : > { %v237_v15 = vmul.f32 1.442695, %v236_v14 }
 0x10c   : > { %605 = vpow2.f32 %v237_v15 }
 0x10d   : > { %v295_v20 = vpop.f32.mrf.mxu2 }
 0x10e   : > { %v298_v21 = vmul.f32 0.35355338, %v295_v20 }
 0x110   : > { %v299_v22 = vsel %vm687_vm2, %v298_v21, -1e+09 }
 0x111   : > { %v300_v23 = vsel %vm201_vm0, %v299_v22, -inf }
 0x112   : > { %v606_v16 = vpop.eup %605  ;;  %301 = vmax.xlane.f32.xlu1 %v300_v23 }
 0x113   : > { %v239_v17 = vsel %vm201_vm0, %v606_v16, 0.0 }
 0x114   : > { %240 = vadd.xlane.f32.xlu0 %v239_v17 }
 0x128   : > { %406 = vrot.lane.b32.xlu0 %v678_v0, %s633_s27 }
 0x185   : > { %v302_v30 = vpop.xlane.xlu1 %301 }
 0x186   : > { %v303_v32 = vsub.f32 %v299_v22, %v302_v30 }
 0x187   : > { %v241_v24 = vpop.xlane.xlu0 %240 }
 0x188   : > { %607 = vrcp.f32 %v241_v24  ;;  %v304_v33 = vmul.f32 1.442695, %v303_v32 }
 0x18a   : > { %609 = vpow2.f32 %v304_v33 }
 0x18e   : > { %v608_v25 = vpop.eup %607 }
 0x18f   : > { %v243_v26 = vmul.f32 %v608_v25, %v606_v16 }
 0x190   : > { %v610_v40 = vpop.eup %609 }
 0x191   : > { %574 = vmatmul.msk.f32.vlgmr.msra.gmra.mxu1 %vm201_vm0, %v243_v26  ;;  %v306_v43 = vsel %vm201_vm0, %v610_v40, 0.0 }
 0x199   : > { %579 = vmatmul.msk.f32.vlgmr.msrb.gmra.mxu1 %vm201_vm0, %v338_v27 }
 0x19a   : > { %v407_v28 = vpop.permute.xlu0 %406 }
 0x19b   : > { %581 = vmatpush.xpose.msk.msrb.mxu0 %vm201_vm0, %v407_v28 }
 0x19e   : > { %582 = vmatmul.msk.f32.vlgmr.msrb.gmra.mxu0 %vm201_vm0, %v405_v29 }
 0x20e   : > { %v708_v31 = vpop.f32.mrf.mxu1 }
 0x216   : > { %v362_v34 = vpop.f32.mrf.mxu1 }
 0x217   : > { %v365_v35 = vmul.f32 0.35355338, %v362_v34 }
 0x219   : > { %v366_v36 = vsel %vm687_vm2, %v365_v35, -1e+09 }
 0x21a   : > { %v367_v37 = vsel %vm201_vm0, %v366_v36, -inf }
 0x21b   : > { %368 = vmax.xlane.f32.xlu2 %v367_v37  ;;  %v429_v38 = vpop.f32.mrf.mxu0 }
 0x21c   : > { %v432_v39 = vmul.f32 0.35355338, %v429_v38 }
 0x21e   : > { %v433_v41 = vsel %vm687_vm2, %v432_v39, -1e+09 }
 0x21f   : > { %v434_v42 = vsel %vm201_vm0, %v433_v41, -inf }
 0x220   : > { %435 = vmax.xlane.f32.xlu0 %v434_v42 }
 0x223   : > { %307 = vadd.xlane.f32.xlu2 %v306_v43 }
 0x234   : > { %378 = vrot.lane.b32.xlu0 %v678_v0, %s634_s28 }
 0x23b   : > { %311 = vrot.lane.b32.xlu2 %v678_v0, %s635_s29 }
 0x28e   : > { %v369_v44 = vpop.xlane.xlu2 %368 }
 0x28f   : > { %v370_v47 = vsub.f32 %v366_v36, %v369_v44 }
 0x291   : > { %v371_v50 = vmul.f32 1.442695, %v370_v47 }
 0x293   : > { %v436_v45 = vpop.xlane.xlu0 %435 }
 0x294   : > { %v437_v46 = vsub.f32 %v433_v41, %v436_v45 }
 0x296   : > { %v438_v48 = vmul.f32 1.442695, %v437_v46  ;;  %v308_v49 = vpop.xlane.xlu2 %307 }
 0x297   : > { %611 = vrcp.f32 %v308_v49 }
 0x298   : > { %613 = vpow2.f32 %v438_v48 }
 0x299   : > { %615 = vpow2.f32 %v371_v50 }
 0x29d   : > { %v612_v51 = vpop.eup %611 }
 0x29e   : > { %v614_v52 = vpop.eup %613  ;;  %v312_v53 = vpop.permute.xlu2 %311  ;;  %v310_v54 = vmul.f32 %v612_v51, %v610_v40 }
 0x29f   : > { %332 = vmatpush.msra.mxu3 %v312_v53  ;;  %v440_v55 = vsel %vm201_vm0, %v614_v52, 0.0  ;;  %v616_v56 = vpop.eup %615 }
 0x2a0   : > { %577 = vmatmul.msk.f32.vlgmr.msra.gmra.mxu3 %vm201_vm0, %v310_v54  ;;  %441 = vadd.xlane.f32.xlu1 %v440_v55  ;;  %v373_v57 = vsel %vm201_vm0, %v616_v56, 0.0 }
 0x2a6   : > { %v379_v58 = vpop.permute.xlu0 %378 }
 0x2a7   : > { %399 = vmatpush.msrb.mxu3 %v379_v58 }
 0x2a8   : > { %374 = vadd.xlane.f32.xlu1 %v373_v57 }
 0x2c1   : > { %445 = vrot.lane.b32.xlu1 %v678_v0, %s636_s30 }
 0x313   : > { %v442_v59 = vpop.xlane.xlu1 %441 }
 0x31b   : > { %v375_v60 = vpop.xlane.xlu1 %374 }
 0x31c   : > { %617 = vrcp.f32 %v375_v60 }
 0x31d   : > { %619 = vrcp.f32 %v442_v59 }
 0x322   : > { %v618_v61 = vpop.eup %617 }
 0x323   : > { %v334_v62 = vpop.f32.mrf.mxu3  ;;  %v377_v63 = vmul.f32 %v618_v61, %v616_v56  ;;  %v620_v1 = vpop.eup %619 }
 0x324   : > { %472 = vrot.lane.b32.xlu2 %v334_v62, %s637_s4  ;;  %v444_v3 = vmul.f32 %v620_v1, %v614_v52 }
 0x325   : > { %580 = vmatmul.msk.f32.vlgmr.msrb.gmra.mxu3 %vm201_vm0, %v377_v63 }
 0x333   : > { %v446_v2 = vpop.permute.xlu1 %445 }
 0x334   : > { %466 = vmatpush.msrb.mxu2 %v446_v2 }
 0x335   : > { %583 = vmatmul.msk.f32.vlgmr.msrb.gmra.mxu2 %vm201_vm0, %v444_v3 }
 0x37e   : > { %v473_v5 = vpop.permute.xlu2 %472 }
 0x37f   : > { %v483_v6 = vsel %vm201_vm0, %v708_v31, %v473_v5 }
 0x3a8   : > { %v401_v0 = vpop.f32.mrf.mxu3 }
 0x3a9   : > { %476 = vrot.lane.b32.xlu0 %v401_v0, %s638_s5 }
 0x3b8   : > { %v468_v4 = vpop.f32.mrf.mxu2 }
 0x3b9   : > { %480 = vrot.lane.b32.xlu2 %v468_v4, %s639_s6 }
 0x413   : > { %v481_v8 = vpop.permute.xlu2 %480 }
 0x41b   : > { %v477_v7 = vpop.permute.xlu0 %476 }
 0x41c   : > { %v485_v9 = vsel %vm484_vm3, %v483_v6, %v477_v7 }
 0x41d   : > { %v487_v10 = vsel %vm486_vm4, %v485_v9, %v481_v8 }
 0x41e   : > { %489 = vst.msk [vmem:[%s196_s9] sm:$0xff] %vm488_vm5, %v487_v10 }
 0x41f PF: > { %s13_s12 = sadd.s32 1, %s627_s12  }
 0x420   : > { %p10_p4 = scmp.ge.s32.totalorder %s13_s12, 4  }
 0x422   :  { %12 = sbr.rel (!%p10_p4) target bundleno = 1 (0x1), region = 68 }

// kernel: scratch_model_forward.49
= control target key start
LH: loop header
LB: loop body
LE: loop exit
PB: predicated region body
PF: predicated region fallthrough
CT: control target
= control target key end

     0   :  { %vm28_vm0 = vcmask 261120   ;;  %v208_v4 = vmov 32.0   ;;  %vm143_vm8 = vcmask 523264   ;;  %s337_s0 = inlined_call_operand.vmem [shape: f32[16,32], index: 0, kind: input, shape index: {}]   ;;  %s338_s1 = inlined_call_operand.vmem [shape: f32[1,32], index: 1, kind: input, shape index: {}]   ;;  %s339_s2 = inlined_call_operand.vmem [shape: f32[1,32], index: 2, kind: input, shape index: {}, may-alias: {2,6}]   ;;  %s340_s4 = inlined_call_operand.vmem [shape: f32[1,64], index: 4, kind: input, shape index: {}]   ;;  %s341_s3 = inlined_call_operand.vmem [shape: f32[32,64], index: 3, kind: input, shape index: {}]   ;;  %s342_s5 = inlined_call_operand.vmem [shape: f32[64,32], index: 5, kind: input, shape index: {}]   ;;  %s343_s6 = inlined_call_operand.vmem [shape: f32[1,32], index: 6, kind: input, shape index: {}, may-alias: {2,6}]   ;;  %s344_s7 = inlined_call_operand.vmem [shape: f32[16,32], index: 7, kind: output, shape index: {}]  }
   0x1   :  { %v252_v0 = vld [vmem:[%s337_s0 + $0x8] sm:$0xff]  ;;  %v259_v2 = vld [vmem:[%s337_s0] sm:$0xff]  ;;  %202 = vrcp.f32 %v208_v4  ;;  %v95_v21 = vld [vmem:[%s341_s3 + $0x18] sm:$0xff] }
   0x2   :  { %v32_v1 = vsel %vm28_vm0, %v252_v0, 0.0  ;;  %v29_v3 = vsel %vm28_vm0, %v259_v2, 0.0  ;;  %185 = vmatpush.msra.mxu3 %v95_v21  ;;  %118 = vmatpush.msra.mxu0 %v95_v21  ;;  %v94_v22 = vld [vmem:[%s341_s3 + $0x10] sm:$0xff]  ;;  %v93_v23 = vld [vmem:[%s341_s3 + $0x8] sm:$0xff]  ;;  %v92_v24 = vld [vmem:[%s341_s3] sm:$0xff] }
   0x3   :  { %33 = vadd.xlane.f32.xlu0 %v32_v1  ;;  %v138_v28 = vld [vmem:[%s342_s5 + $0x38] sm:$0xff]  ;;  %v137_v29 = vld [vmem:[%s342_s5 + $0x30] sm:$0xff]  ;;  %v136_v30 = vld [vmem:[%s342_s5 + $0x28] sm:$0xff] }
   0x4   :  { %186 = vmatpush.msra.mxu3 %v94_v22  ;;  %119 = vmatpush.msra.mxu0 %v94_v22  ;;  %v135_v33 = vld [vmem:[%s342_s5 + $0x20] sm:$0xff]  ;;  %v134_v36 = vld [vmem:[%s342_s5 + $0x18] sm:$0xff]  ;;  %v133_v58 = vld [vmem:[%s342_s5 + $0x10] sm:$0xff] }
   0x5   :  { %189 = vmatpush.msra.mxu2 %v138_v28  ;;  %158 = vmatpush.msra.mxu1 %v138_v28  ;;  %v198_v44 = vld [vmem:[%s338_s1] ss:$0 sm:$0xff]  ;;  %v132_v59 = vld [vmem:[%s342_s5 + $0x8] sm:$0xff] }
   0x6   :  { %187 = vmatpush.msra.mxu3 %v93_v23  ;;  %120 = vmatpush.msra.mxu0 %v93_v23  ;;  %v199_v48 = vld [vmem:[%s339_s2] ss:$0 sm:$0xff] }
   0x7   :  { %v203_v5 = vpop.eup %202  ;;  %190 = vmatpush.msra.mxu2 %v137_v29  ;;  %159 = vmatpush.msra.mxu1 %v137_v29  ;;  %v131_v60 = vld [vmem:[%s342_s5] sm:$0xff] }
   0x8   :  { %v36_v6 = vmul.f32 32.0, %v203_v5  ;;  %vm40_vm1 = vweird.f32 %v203_v5  ;;  %188 = vmatpush.msra.mxu3 %v92_v24  ;;  %121 = vmatpush.msra.mxu0 %v92_v24  ;;  %v200_v61 = vld [vmem:[%s340_s4] ss:$0 sm:$0xff] }
   0x9   :  { %191 = vmatpush.msra.mxu2 %v136_v30  ;;  %160 = vmatpush.msra.mxu1 %v136_v30 }
   0xa   :  { %v37_v7 = vsub.f32 1.0, %v36_v6  ;;  %v201_v6 = vld [vmem:[%s343_s6] ss:$0 sm:$0xff] }
   0xb   :  { %30 = vadd.xlane.f32.xlu0 %v29_v3  ;;  %192 = vmatpush.msra.mxu2 %v135_v33 }
   0xc   :  { %v38_v8 = vmul.f32 %v203_v5, %v37_v7  ;;  %161 = vmatpush.msra.mxu1 %v135_v33 }
   0xd   :  { %193 = vmatpush.msra.mxu2 %v134_v36 }
   0xe   :  { %v39_v9 = vadd.f32 %v203_v5, %v38_v8  ;;  %162 = vmatpush.msra.mxu1 %v134_v36 }
   0xf   :  { %194 = vmatpush.msra.mxu2 %v133_v58 }
  0x10   :  { %v41_v10 = vsel %vm40_vm1, %v203_v5, %v39_v9  ;;  %163 = vmatpush.msra.mxu1 %v133_v58 }
  0x11   :  { %195 = vmatpush.msra.mxu2 %v132_v59 }
  0x12   :  { %164 = vmatpush.msra.mxu1 %v132_v59 }
  0x13   :  { %196 = vmatpush.msra.mxu2 %v131_v60 }
  0x14   :  { %165 = vmatpush.msra.mxu1 %v131_v60 }
  0x76   :  { %v34_v11 = vpop.xlane.xlu0 %33 }
  0x77   :  { %v43_v12 = vmul.f32 %v41_v10, %v34_v11 }
  0x79   :  { %v264_v13 = vsub.f32 %v252_v0, %v43_v12 }
  0x7b   :  { %v47_v14 = vmul.f32 %v264_v13, %v264_v13 }
  0x7d   :  { %v51_v15 = vsel %vm28_vm0, %v47_v14, 0.0 }
  0x7e   :  { %52 = vadd.xlane.f32.xlu1 %v51_v15  ;;  %v31_v16 = vpop.xlane.xlu0 %30 }
  0x7f   :  { %v42_v17 = vmul.f32 %v41_v10, %v31_v16 }
  0x81   :  { %v270_v18 = vsub.f32 %v259_v2, %v42_v17 }
  0x83   :  { %v46_v19 = vmul.f32 %v270_v18, %v270_v18 }
  0x85   :  { %v48_v20 = vsel %vm28_vm0, %v46_v19, 0.0 }
  0x86   :  { %49 = vadd.xlane.f32.xlu1 %v48_v20 }
  0xf1   :  { %v53_v25 = vpop.xlane.xlu1 %52 }
  0xf2   :  { %v55_v26 = vmul.f32 %v53_v25, %v41_v10 }
  0xf4   :  { %v57_v27 = vadd.f32 1e-06, %v55_v26 }
  0xf6   :  { %204 = vrsqrt.f32 %v57_v27  ;;  %vm74_vm3 = vweird.f32 %v57_v27 }
  0xf9   :  { %v50_v31 = vpop.xlane.xlu1 %49 }
  0xfa   :  { %v54_v32 = vmul.f32 %v50_v31, %v41_v10 }
  0xfc   :  { %v205_v34 = vpop.eup %204  ;;  %v56_v35 = vadd.f32 1e-06, %v54_v32 }
  0xfd   :  { %v69_v37 = vmul.f32 %v205_v34, %v57_v27  ;;  %vm75_vm2 = vweird.f32 %v205_v34 }
  0xfe   :  { %206 = vrsqrt.f32 %v56_v35  ;;  %vm76_vm4 = vmor %vm74_vm3, %vm75_vm2  ;;  %vm64_vm6 = vweird.f32 %v56_v35 }
  0xff   :  { %v70_v38 = vmul.f32 %v205_v34, %v69_v37 }
 0x101   :  { %v71_v39 = vmul.f32 0.5, %v70_v38 }
 0x103   :  { %v72_v40 = vsub.f32 1.5, %v71_v39 }
 0x104   :  { %v207_v41 = vpop.eup %206 }
 0x105   :  { %v73_v42 = vmul.f32 %v205_v34, %v72_v40  ;;  %v59_v43 = vmul.f32 %v207_v41, %v56_v35  ;;  %vm65_vm5 = vweird.f32 %v207_v41 }
 0x106   :  { %vm66_vm7 = vmor %vm64_vm6, %vm65_vm5 }
 0x107   :  { %v77_v45 = vsel %vm76_vm4, %v205_v34, %v73_v42  ;;  %v60_v46 = vmul.f32 %v207_v41, %v59_v43 }
 0x108   :  { %v79_v47 = vmul.f32 %v77_v45, %v264_v13 }
 0x109   :  { %v61_v49 = vmul.f32 0.5, %v60_v46 }
 0x10a   :  { %v85_v50 = vmul.f32 %v198_v44, %v79_v47 }
 0x10b   :  { %v62_v51 = vsub.f32 1.5, %v61_v49 }
 0x10c   :  { %v91_v52 = vadd.f32 %v199_v48, %v85_v50 }
 0x10d   :  { %v63_v53 = vmul.f32 %v207_v41, %v62_v51 }
 0x10e   :  { %182 = vmatmul.msk.f32.vlgmr.msra.gmra.mxu3 %vm28_vm0, %v91_v52 }
 0x10f   :  { %v67_v54 = vsel %vm66_vm7, %v207_v41, %v63_v53 }
 0x110   :  { %v78_v55 = vmul.f32 %v67_v54, %v270_v18 }
 0x112   :  { %v84_v56 = vmul.f32 %v198_v44, %v78_v55 }
 0x114   :  { %v90_v57 = vadd.f32 %v199_v48, %v84_v56 }
 0x116   :  { %181 = vmatmul.msk.f32.vlgmr.msra.gmra.mxu0 %vm28_vm0, %v90_v57 }
 0x191   :  { %v126_v62 = vpop.f32.mrf.mxu3 }
 0x192   :  { %v127_v63 = vadd.f32 %v200_v61, %v126_v62 }
 0x193   :  { %v123_v1 = vpop.f32.mrf.mxu0 }
 0x194   :  { %v130_v3 = vmax.f32 %v127_v63, 0.0  ;;  %v124_v4 = vadd.f32 %v200_v61, %v123_v1 }
 0x196   :  { %v129_v5 = vmax.f32 %v124_v4, 0.0  ;;  %184 = vmatmul.msk.f32.vlgmr.msra.gmra.mxu2 %vm143_vm8, %v130_v3 }
 0x198   :  { %183 = vmatmul.msk.f32.vlgmr.msra.gmra.mxu1 %vm143_vm8, %v129_v5 }
 0x215   :  { %v167_v7 = vpop.f32.mrf.mxu1 }
 0x216   :  { %v168_v8 = vadd.f32 %v201_v6, %v167_v7 }
 0x218   :  { %v173_v9 = vadd.f32 %v168_v8, %v259_v2 }
 0x219   :  { %v170_v10 = vpop.f32.mrf.mxu2 }
 0x21a   :  { %175 = vst.msk [vmem:[%s344_s7] sm:$0xff] %vm28_vm0, %v173_v9  ;;  %v171_v11 = vadd.f32 %v201_v6, %v170_v10 }
 0x21c   :  { %v174_v12 = vadd.f32 %v171_v11, %v252_v0 }
 0x21e   :  { %176 = vst.msk [vmem:[%s344_s7 + $0x8] sm:$0xff] %vm28_vm0, %v174_v12 }

// kernel: scratch_model_forward.50
= control target key start
LH: loop header
LB: loop body
LE: loop exit
PB: predicated region body
PF: predicated region fallthrough
CT: control target
= control target key end

     0   :  { %vm18_vm0 = vcmask 523264   ;;  %v89_v2 = vmov 0.0   ;;  %vm29_vm1 = vcmask 261120   ;;  %s143_s1 = inlined_call_operand.vmem [shape: f32[32,64], index: 1, kind: input, shape index: {}]   ;;  %s144_s2 = inlined_call_operand.vmem [shape: f32[1,64], index: 2, kind: input, shape index: {}]   ;;  %s145_s0 = inlined_call_operand.vmem [shape: f32[16,32], index: 0, kind: input, shape index: {}]   ;;  %s146_s3 = inlined_call_operand.vmem [shape: f32[16,64], index: 3, kind: output, shape index: {}]  }
   0x1   :  { %v28_v0 = vld [vmem:[%s143_s1 + $0x18] sm:$0xff]  ;;  %v27_v1 = vld [vmem:[%s143_s1 + $0x10] sm:$0xff]  ;;  %19 = vst.msk [vmem:[#allocation2] sm:$0xff] %vm18_vm0, %v89_v2  ;;  %v26_v3 = vld [vmem:[%s143_s1 + $0x8] sm:$0xff] }
   0x2   :  { %48 = vmatpush.msra.mxu0 %v28_v0  ;;  %83 = vmatpush.msra.mxu1 %v28_v0  ;;  %20 = vst.msk [vmem:[#allocation2 + $0x8] sm:$0xff] %vm18_vm0, %v89_v2  ;;  %v25_v4 = vld [vmem:[%s143_s1] sm:$0xff]  ;;  %v24_v6 = vld [vmem:[%s145_s0 + $0x8] sm:$0xff] }
   0x3   :  { %v23_v5 = vld [vmem:[%s145_s0] sm:$0xff] }
   0x4   :  { %49 = vmatpush.msra.mxu0 %v27_v1  ;;  %84 = vmatpush.msra.mxu1 %v27_v1  ;;  %v88_v13 = vld [vmem:[%s144_s2] ss:$0 sm:$0xff] }
   0x6   :  { %50 = vmatpush.msra.mxu0 %v26_v3  ;;  %85 = vmatpush.msra.mxu1 %v26_v3 }
   0x8   :  { %51 = vmatpush.msra.mxu0 %v25_v4  ;;  %86 = vmatpush.msra.mxu1 %v25_v4  ;;  %v21_v7 = vld [vmem:[#allocation2] sm:$0xff] }
   0x9   :  { %81 = vmatmul.msk.f32.vlgmr.msra.gmra.mxu0 %vm29_vm1, %v23_v5  ;;  %82 = vmatmul.msk.f32.vlgmr.msra.gmra.mxu1 %vm29_vm1, %v24_v6  ;;  %v22_v8 = vld [vmem:[#allocation2 + $0x8] sm:$0xff] }
  0x86   :  { %v53_v9 = vpop.f32.mrf.mxu0  ;;  %v56_v10 = vpop.f32.mrf.mxu1 }
  0x87   :  { %v59_v11 = vadd.f32 %v53_v9, %v21_v7  ;;  %v60_v12 = vadd.f32 %v56_v10, %v22_v8 }
  0x89   :  { %62 = vst.msk [vmem:[#allocation2] sm:$0xff] %vm18_vm0, %v59_v11 }
  0x8a   :  { %63 = vst.msk [vmem:[#allocation2 + $0x8] sm:$0xff] %vm18_vm0, %v60_v12 }
  0x90   :  { %v67_v14 = vld [vmem:[#allocation2] sm:$0xff] }
  0x91   :  { %v73_v15 = vadd.f32 %v88_v13, %v67_v14  ;;  %v68_v16 = vld [vmem:[#allocation2 + $0x8] sm:$0xff] }
  0x92   :  { %v74_v17 = vadd.f32 %v88_v13, %v68_v16 }
  0x93   :  { %75 = vst.msk [vmem:[%s146_s3] sm:$0xff] %vm18_vm0, %v73_v15 }
  0x94   :  { %76 = vst.msk [vmem:[%s146_s3 + $0x8] sm:$0xff] %vm18_vm0, %v74_v17 }

// kernel: scratch_model_forward.51
= control target key start
LH: loop header
LB: loop body
LE: loop exit
PB: predicated region body
PF: predicated region fallthrough
CT: control target
= control target key end

     0   :  { %vm22_vm0 = vcmask 523264   ;;  %v142_v3 = vmov 0   ;;  %s183_s0 = inlined_call_operand.vmem [shape: f32[16,64], index: 0, kind: input, shape index: {}]   ;;  %s184_s1 = inlined_call_operand.vmem [shape: s32[16,1], index: 1, kind: input, shape index: {}]   ;;  %s185_s2 = inlined_call_operand.hbm [shape: f32[1,1], index: 2, kind: output, shape index: {}]  }
   0x1   :  { %v18_v0 = vld [vmem:[%s183_s0] sm:$0xff]  ;;  %106 = vset.pattern.permute.xlu1 %v142_v3  ;;  %107 = vset.pattern.permute.xlu0 %v142_v3 }
   0x2   :  { %v20_v1 = vld [vmem:[%s184_s1] sm:$0xff]  ;;  %v23_v2 = vsel %vm22_vm0, %v18_v0, -inf }
   0x3   :  { %7 = vsyncpa [#allocation3], 0  ;;  %24 = vmax.xlane.f32.xlu0 %v23_v2  ;;  %50 = vperm.xlu1 %106, %v20_v1   ;;  %v19_v4 = vld [vmem:[%s183_s0 + $0x8] sm:$0xff]  ;;  %v47_v7 = vlaneseq  ;;  %vm68_vm3 = vcmask 7168   ;;  %vm16_vm4 = vcmask 0   ;;  %v143_v40 = vmov 0.0  }
   0x4   :  { %v26_v5 = vsel %vm22_vm0, %v19_v4, -inf  ;;  %v21_v6 = vld [vmem:[%s184_s1 + $0x8] sm:$0xff]  ;;  %17 = vst.msk [vmem:[#allocation2] sm:$0x1] %vm16_vm4, %v143_v40  ;;  %s144_s0 = smov [#allocation2]   ;;  %s92_s19 = sshll.u32 %s185_s2, 4  ;;  %s93_s19 = int_to_ptr.hbm [resolvable:$true] %s92_s19 }
   0x5   :  { %v48_v8 = vand.u32 127, %v47_v7  ;;  %s90_s1 = sshll.u32 %s144_s0, 4  ;;  %s91_s1 = int_to_ptr.vmem [resolvable:$true] %s90_s1 }
   0xb   :  { %27 = vmax.xlane.f32.xlu0 %v26_v5  ;;  %53 = vperm.xlu1 %106, %v21_v6   ;;  %v65_v48 = vld [vmem:[#allocation2] sm:$0x1] }
  0x75   :  { %v51_v9 = vpop.permute.xlu1 %50 }
  0x76   :  { %v25_v10 = vpop.xlane.xlu0 %24  ;;  %vm55_vm1 = vcmp.eq.s32.totalorder %v48_v8, %v51_v9 }
  0x77   :  { %v29_v11 = vsub.f32 %v18_v0, %v25_v10  ;;  %v57_v12 = vsel %vm55_vm1, %v18_v0, 0.0 }
  0x78   :  { %v59_v13 = vsel %vm22_vm0, %v57_v12, 0.0 }
  0x79   :  { %v31_v14 = vmul.f32 1.442695, %v29_v11  ;;  %60 = vadd.xlane.f32.xlu0 %v59_v13 }
  0x7b   :  { %108 = vpow2.f32 %v31_v14 }
  0x7d   :  { %v54_v15 = vpop.permute.xlu1 %53 }
  0x7e   :  { %v28_v16 = vpop.xlane.xlu0 %27  ;;  %vm56_vm2 = vcmp.eq.s32.totalorder %v48_v8, %v54_v15 }
  0x7f   :  { %v30_v17 = vsub.f32 %v19_v4, %v28_v16  ;;  %v58_v18 = vsel %vm56_vm2, %v19_v4, 0.0 }
  0x80   :  { %v62_v19 = vsel %vm22_vm0, %v58_v18, 0.0 }
  0x81   :  { %v109_v20 = vpop.eup %108  ;;  %v33_v21 = vmul.f32 1.442695, %v30_v17  ;;  %63 = vadd.xlane.f32.xlu1 %v62_v19 }
  0x82   :  { %v35_v22 = vsel %vm22_vm0, %v109_v20, 0.0 }
  0x83   :  { %110 = vpow2.f32 %v33_v21  ;;  %36 = vadd.xlane.f32.xlu2 %v35_v22 }
  0x89   :  { %v111_v23 = vpop.eup %110 }
  0x8a   :  { %v38_v24 = vsel %vm22_vm0, %v111_v23, 0.0 }
  0x8b   :  { %39 = vadd.xlane.f32.xlu2 %v38_v24 }
  0xec   :  { %v61_v31 = vpop.xlane.xlu0 %60 }
  0xf4   :  { %v64_v35 = vpop.xlane.xlu1 %63 }
  0xf6   :  { %v37_v25 = vpop.xlane.xlu2 %36 }
  0xf7   :  { %112 = vlog2.f32 %v37_v25 }
  0xfd   :  { %v113_v26 = vpop.eup %112 }
  0xfe   :  { %v40_v27 = vpop.xlane.xlu2 %39  ;;  %v42_v28 = vmul.f32 0.6931472, %v113_v26 }
  0xff   :  { %114 = vlog2.f32 %v40_v27 }
 0x100   :  { %v45_v29 = vadd.f32 %v42_v28, %v25_v10 }
 0x102   :  { %v66_v34 = vsub.f32 %v45_v29, %v61_v31 }
 0x104   :  { %v69_v37 = vsel %vm68_vm3, %v66_v34, 0.0 }
 0x105   :  { %v115_v30 = vpop.eup %114 }
 0x106   :  { %v44_v32 = vmul.f32 0.6931472, %v115_v30 }
 0x108   :  { %v46_v33 = vadd.f32 %v44_v32, %v28_v16 }
 0x10a   :  { %v67_v36 = vsub.f32 %v46_v33, %v64_v35 }
 0x10c   :  { %v70_v38 = vsel %vm68_vm3, %v67_v36, 0.0 }
 0x10d   :  { %v71_v39 = vadd.f32 %v70_v38, %v69_v37 }
 0x10f   :  { %72 = vadd.xlane.f32.xlu2 %v71_v39 }
 0x182   :  { %v73_v41 = vpop.xlane.xlu2 %72 }
 0x183   :  { %v74_v42 = vrot.slane %v73_v41, 4 }
 0x185   :  { %v75_v43 = vadd.f32 %v74_v42, %v73_v41 }
 0x187   :  { %v76_v44 = vrot.slane %v75_v43, 2 }
 0x189   :  { %v77_v45 = vadd.f32 %v76_v44, %v75_v43 }
 0x18b   :  { %v78_v46 = vrot.slane %v77_v45, 1 }
 0x18d   :  { %v79_v47 = vadd.f32 %v78_v46, %v77_v45 }
 0x18f   :  { %101 = vpush %v79_v47 }
 0x1c0   :  { %s102_s20 = spop %101 }
 0x1c1   :  { %v81_v49 = vstv %s102_s20 }
 0x1c2   :  { %v82_v50 = vadd.f32 %v81_v49, %v65_v48 }
 0x1c4   :  { %84 = vst.msk [vmem:[#allocation2] sm:$0x1] %vm16_vm4, %v82_v50 }
 0x1c5   :  { %95 = dma.vmem_to_hbm [thread:$0]  %s91_s1, 16, %s93_s19, [#allocation3]  }
 0x1c6   :  { %140 = dma.done.wait [#allocation3], 16  }
 0x1c7   :  { %141 = vsyncadd [#allocation3], 4294967280 }
 0x1c8   :  { %100 = vsyncpa [#allocation3], 1 }

</bundles_post_ra>
